<compile_context>
chip_gen: v6e
topology: v6e:2x2x1
jax: 0.10.0
libtpu: 0.0.40
codegen_flags: <defaults>
</compile_context>

<pallas_src>
import math
import functools

import jax
import jax.numpy as jnp
from jax.experimental import pallas as pl
from jax.experimental.pallas import tpu as pltpu


# ---------------------------------------------------------------------------
# Pallas kernel: one fused post-norm transformer encoder layer, G sequences
# per grid step.
# ---------------------------------------------------------------------------
def _encoder_layer_kernel(num_heads, head_dim, input_scale, eps,
                          has_bias, has_residual, *refs):
    it = iter(refs)
    x_ref = next(it)
    bias_ref = next(it) if has_bias else None
    wqkv_ref, bqkv_ref = next(it), next(it)
    wo_ref, bo_ref = next(it), next(it)
    ln1g_ref, ln1b_ref = next(it), next(it)
    w1_ref, b1_ref = next(it), next(it)
    w2_ref, b2_ref = next(it), next(it)
    ln2g_ref, ln2b_ref = next(it), next(it)
    res_ref = next(it) if has_residual else None
    o_ref = next(it)

    G, S, D = x_ref.shape
    H, hd = num_heads, head_dim
    mm = jnp.bfloat16  # MXU input dtype; accumulation is f32 everywhere

    x = x_ref[...].astype(jnp.float32).reshape(G * S, D)
    if input_scale != 1.0:
        x = x * input_scale

    # --- fused QKV projection (single MXU call; Wq/bq pre-scaled by 1/sqrt(hd)) ---
    qkv = jnp.dot(x.astype(mm), wqkv_ref[...],
                  preferred_element_type=jnp.float32) + bqkv_ref[0]
    q = qkv[:, :D].reshape(G, S, D).astype(mm)
    k = qkv[:, D:2 * D].reshape(G, S, D).astype(mm)
    v = qkv[:, 2 * D:].reshape(G, S, D).astype(mm)

    # --- attention: per-head score matmuls batched over the G sequences ---
    s_heads = []
    for h in range(H):                                   # static unroll (H small)
        sl = slice(h * hd, (h + 1) * hd)
        s_heads.append(jnp.einsum('gqd,gkd->gqk', q[:, :, sl], k[:, :, sl],
                                  preferred_element_type=jnp.float32))
    scores = jnp.stack(s_heads, axis=1)                  # (G, H, S, S) f32
    if has_bias:
        scores = scores + bias_ref[...].astype(jnp.float32)

    # single widened softmax pass; reciprocal on the EUP instead of a divide
    scores = scores - jnp.max(scores, axis=-1, keepdims=True)
    p = jnp.exp(scores)
    p = p * pl.reciprocal(jnp.sum(p, axis=-1, keepdims=True), approx=True)
    p = p.astype(mm)

    ctx = jnp.concatenate(
        [jnp.einsum('gqk,gkd->gqd', p[:, h], v[:, :, h * hd:(h + 1) * hd],
                    preferred_element_type=jnp.float32) for h in range(H)],
        axis=-1).reshape(G * S, D)

    attn = jnp.dot(ctx.astype(mm), wo_ref[...],
                   preferred_element_type=jnp.float32) + bo_ref[0]

    # --- residual + LayerNorm 1 (f32) ---
    h1 = x + attn
    mu = jnp.mean(h1, axis=-1, keepdims=True)
    var = jnp.mean((h1 - mu) ** 2, axis=-1, keepdims=True)
    h1 = (h1 - mu) * jax.lax.rsqrt(var + eps) * ln1g_ref[0] + ln1b_ref[0]

    # --- FFN (ReLU) ---
    f = jnp.dot(h1.astype(mm), w1_ref[...],
                preferred_element_type=jnp.float32) + b1_ref[0]
    f = jnp.maximum(f, 0.0)
    f = jnp.dot(f.astype(mm), w2_ref[...],
                preferred_element_type=jnp.float32) + b2_ref[0]

    # --- residual + LayerNorm 2 (f32) ---
    h2 = h1 + f
    mu2 = jnp.mean(h2, axis=-1, keepdims=True)
    var2 = jnp.mean((h2 - mu2) ** 2, axis=-1, keepdims=True)
    out = (h2 - mu2) * jax.lax.rsqrt(var2 + eps) * ln2g_ref[0] + ln2b_ref[0]

    out = out.reshape(G, S, D)
    if has_residual:
        out = out + res_ref[...].astype(jnp.float32)     # fused `t + s`
    o_ref[...] = out.astype(o_ref.dtype)                 # one slab store


def _pick_block(batch, max_block=64):
    """Largest divisor of `batch` <= max_block that keeps >= 2 grid steps
    (v7x has 2 TensorCores; negligible extra overhead on v5e/v6e)."""
    best = 1
    for g in range(1, min(batch, max_block) + 1):
        if batch % g == 0 and batch // g >= 2:
            best = g
    return best


def encoder_layer(x, params, num_heads, bias=None, residual=None,
                  input_scale=1.0, eps=1e-5, block_g=None):
    """x: (BB, S, D); bias: optional (BB, H, S, S); residual: optional (BB, S, D)."""
    BB, S, D = x.shape
    H = num_heads
    assert D % H == 0, "embed_dim must be divisible by num_heads"
    hd = D // H

    G = _pick_block(BB) if block_g is None else block_g
    assert BB % G == 0
    grid = (BB // G,)

    mm = jnp.bfloat16
    qk_scale = 1.0 / math.sqrt(hd)
    # Fused QKV packing; fold the query 1/sqrt(head_dim) scale into Wq / bq.
    wqkv = jnp.concatenate(
        [params["wq"] * qk_scale, params["wk"], params["wv"]], axis=1).astype(mm)
    bqkv = jnp.concatenate(
        [params["bq"] * qk_scale, params["bk"], params["bv"]], axis=1
    ).astype(jnp.float32)

    def rep(shape):
        nd = len(shape)
        return pl.BlockSpec(tuple(shape), lambda b, _n=nd: (0,) * _n)

    in_specs = [pl.BlockSpec((G, S, D), lambda b: (b, 0, 0))]
    args = [x]
    if bias is not None:
        in_specs.append(pl.BlockSpec((G, H, S, S), lambda b: (b, 0, 0, 0)))
        args.append(bias)

    weight_list = [
        wqkv, bqkv,
        params["wo"].astype(mm), params["bo"],
        params["ln1g"], params["ln1b"],
        params["w1"].astype(mm), params["b1"],
        params["w2"].astype(mm), params["b2"],
        params["ln2g"], params["ln2b"],
    ]
    for arr in weight_list:
        in_specs.append(rep(arr.shape))
        args.append(arr)

    if residual is not None:
        in_specs.append(pl.BlockSpec((G, S, D), lambda b: (b, 0, 0)))
        args.append(residual)

    kernel = functools.partial(_encoder_layer_kernel, H, hd, float(input_scale),
                               float(eps), bias is not None, residual is not None)

    return pl.pallas_call(
        kernel,
        out_shape=jax.ShapeDtypeStruct((BB, S, D), x.dtype),
        grid_spec=pltpu.PrefetchScalarGridSpec(
            num_scalar_prefetch=0,
            grid=grid,
            in_specs=in_specs,
            out_specs=pl.BlockSpec((G, S, D), lambda b: (b, 0, 0)),
        ),
        compiler_params=pltpu.CompilerParams(dimension_semantics=("parallel",)),
    )(*args)


# ---------------------------------------------------------------------------
# STGLayerSep forward (glue in plain JAX, hot path in the kernel above)
# ---------------------------------------------------------------------------
def stg_layer_sep(t_patches, s_patches, attn_bias, t_params, s_params,
                  embed_dim, t_heads, s_heads):
    B, N, L, D = t_patches.shape

    # ---- spatial (Graphormer) branch: sequence over nodes, batch = B * n_patch
    Bs, n_node, n_patch, _ = s_patches.shape
    assert L == n_patch
    s = s_patches.transpose(0, 2, 1, 3).reshape(Bs * n_patch, n_node, D)
    # attn_bias.repeat(n_patch,1,1,1).view(bsz*H,T,T): bias for flattened batch
    # element j (= b*n_patch + p) is attn_bias[j % B]  (torch quirk kept as-is).
    bias_eff = attn_bias[jnp.arange(Bs * n_patch) % Bs]        # (B*P, H, N, N)
    # TODO(synk): bias_eff duplicates attn_bias n_patch-fold in HBM; an in-kernel
    # gather (prefetched indices + one-hot matmul) would remove the duplication.
    s = encoder_layer(s, s_params, s_heads, bias=bias_eff, input_scale=1.0)
    s = s.reshape(Bs, n_patch, n_node, D).transpose(0, 2, 1, 3)  # (B, N, P, D)

    # ---- temporal branch (sqrt(D) scaling inside kernel); the spatial output
    # is fused in as a residual so the final `t + s` costs no extra HBM pass.
    t = t_patches.reshape(B * N, L, D)
    res = s.reshape(B * N, L, D)
    out = encoder_layer(t, t_params, t_heads, residual=res,
                        input_scale=math.sqrt(embed_dim))
    return out.reshape(B, N, L, D)


# ---------------------------------------------------------------------------
# Deterministic synthetic parameters (PyTorch-default-like: LN gamma=1, beta=0)
# ---------------------------------------------------------------------------
def init_layer_params(key, D, F):
    ks = jax.random.split(key, 12)
    lin = lambda k, din, dout: jax.random.normal(k, (din, dout), jnp.float32) * 0.05
    vec = lambda k, d: jax.random.normal(k, (1, d), jnp.float32) * 0.05
    return dict(
        wq=lin(ks[0], D, D), bq=vec(ks[1], D),
        wk=lin(ks[2], D, D), bk=vec(ks[3], D),
        wv=lin(ks[4], D, D), bv=vec(ks[5], D),
        wo=lin(ks[6], D, D), bo=vec(ks[7], D),
        ln1g=jnp.ones((1, D), jnp.float32), ln1b=jnp.zeros((1, D), jnp.float32),
        w1=lin(ks[8], D, F), b1=vec(ks[9], F),
        w2=lin(ks[10], F, D), b2=vec(ks[11], D),
        ln2g=jnp.ones((1, D), jnp.float32), ln2b=jnp.zeros((1, D), jnp.float32),
    )


# ---------------------------------------------------------------------------
# Plain-JAX f32 reference (for a sanity check only)
# ---------------------------------------------------------------------------
def _ref_layer(x, bias, p, H, input_scale, eps=1e-5):
    B, S, D = x.shape
    hd = D // H
    x = x * input_scale
    q = x @ p["wq"] + p["bq"][0]
    k = x @ p["wk"] + p["bk"][0]
    v = x @ p["wv"] + p["bv"][0]
    q = q.reshape(B, S, H, hd).transpose(0, 2, 1, 3) / math.sqrt(hd)
    k = k.reshape(B, S, H, hd).transpose(0, 2, 1, 3)
    v = v.reshape(B, S, H, hd).transpose(0, 2, 1, 3)
    s = jnp.einsum("bhqd,bhkd->bhqk", q, k) + bias
    pr = jax.nn.softmax(s, axis=-1)
    ctx = jnp.einsum("bhqk,bhkd->bhqd", pr, v).transpose(0, 2, 1, 3).reshape(B, S, D)
    attn = ctx @ p["wo"] + p["bo"][0]

    def ln(y, g, b):
        mu = jnp.mean(y, -1, keepdims=True)
        var = jnp.mean((y - mu) ** 2, -1, keepdims=True)
        return (y - mu) * jax.lax.rsqrt(var + eps) * g + b

    h1 = ln(x + attn, p["ln1g"][0], p["ln1b"][0])
    f = jnp.maximum(h1 @ p["w1"] + p["b1"][0], 0.0) @ p["w2"] + p["b2"][0]
    return ln(h1 + f, p["ln2g"][0], p["ln2b"][0])


def stg_layer_sep_ref(t_patches, s_patches, attn_bias, t_params, s_params,
                      embed_dim, t_heads, s_heads):
    B, N, L, D = t_patches.shape
    t = _ref_layer(t_patches.reshape(B * N, L, D),
                   jnp.zeros((B * N, t_heads, L, L), jnp.float32),
                   t_params, t_heads, math.sqrt(embed_dim)).reshape(B, N, L, D)
    Bs, n_node, n_patch, _ = s_patches.shape
    s = s_patches.transpose(0, 2, 1, 3).reshape(Bs * n_patch, n_node, D)
    bias_eff = attn_bias[jnp.arange(Bs * n_patch) % Bs]
    s = _ref_layer(s, bias_eff, s_params, s_heads, 1.0)
    s = s.reshape(Bs, n_patch, n_node, D).transpose(0, 2, 1, 3)
    return t + s


if __name__ == "__main__":
    # cfg for STGLayerSep
    cfg = dict(embed_dim=32, num_heads=4, mlp_ratio=4, dropout=0.0)
    D = cfg["embed_dim"]
    # Positional-arg quirk of the original module (see note at top):
    t_heads, t_ffn = cfg["mlp_ratio"], cfg["num_heads"]       # temporal layer
    s_heads, s_ffn = cfg["num_heads"], cfg["mlp_ratio"] * D   # Graphormer layer

    B, N, P = 2, 4, 8    # batch, nodes (graph size), patches (L == n_patch)

    key = jax.random.PRNGKey(0)
    k1, k2, k3, k4, k5 = jax.random.split(key, 5)
    t_patches = jax.random.normal(k1, (B, N, P, D), jnp.float32)
    s_patches = jax.random.normal(k2, (B, N, P, D), jnp.float32)
    attn_bias = jax.random.normal(k3, (B, s_heads, N, N), jnp.float32) * 0.1

    t_params = init_layer_params(k4, D, t_ffn)
    s_params = init_layer_params(k5, D, s_ffn)

    out = stg_layer_sep(t_patches, s_patches, attn_bias, t_params, s_params,
                        D, t_heads, s_heads)
    out = jax.block_until_ready(out)

    ref = stg_layer_sep_ref(t_patches, s_patches, attn_bias, t_params, s_params,
                            D, t_heads, s_heads)
    assert out.shape == (B, N, P, D)
    # Kernel matmuls use bf16 inputs (f32 accumulation) + EUP approx reciprocal
    # in the softmax; reference is full f32, so allow ~1e-2-level drift.
    assert bool(jnp.allclose(out, ref, atol=2e-2, rtol=2e-2))

    # TODO(synk): dropout layers are modeled at eval-time (p=0.0) only.
    print("KERNEL_OK")
</pallas_src>

<mosaic_0001>
module attributes {stable_mosaic.version = 11 : i64} {
  func.func @_encoder_layer_kernel(%arg0: i32, %arg1: memref<8x4x32xf32, #tpu.memory_space<vmem>>, %arg2: memref<8x4x4x4xf32, #tpu.memory_space<vmem>>, %arg3: memref<32x96xbf16, #tpu.memory_space<vmem>>, %arg4: memref<1x96xf32, #tpu.memory_space<vmem>>, %arg5: memref<32x32xbf16, #tpu.memory_space<vmem>>, %arg6: memref<1x32xf32, #tpu.memory_space<vmem>>, %arg7: memref<1x32xf32, #tpu.memory_space<vmem>>, %arg8: memref<1x32xf32, #tpu.memory_space<vmem>>, %arg9: memref<32x128xbf16, #tpu.memory_space<vmem>>, %arg10: memref<1x128xf32, #tpu.memory_space<vmem>>, %arg11: memref<128x32xbf16, #tpu.memory_space<vmem>>, %arg12: memref<1x32xf32, #tpu.memory_space<vmem>>, %arg13: memref<1x32xf32, #tpu.memory_space<vmem>>, %arg14: memref<1x32xf32, #tpu.memory_space<vmem>>, %arg15: memref<8x4x32xf32, #tpu.memory_space<vmem>>) attributes {dimension_semantics = [#tpu.dimension_semantics<parallel>], iteration_bounds = array<i64: 2>, scalar_prefetch = 0 : i64, scratch_operands = 0 : i64, tpu.core_type = #tpu.core_type<tc>, window_params = [{transform_indices = @transform_0, window_bounds = array<i64: 8, 4, 32>}, {transform_indices = @transform_1, window_bounds = array<i64: 8, 4, 4, 4>}, {pipeline_mode = #tpu.pipeline_mode<synchronous>, transform_indices = @transform_2, window_bounds = array<i64: 32, 96>}, {pipeline_mode = #tpu.pipeline_mode<synchronous>, transform_indices = @transform_3, window_bounds = array<i64: 1, 96>}, {pipeline_mode = #tpu.pipeline_mode<synchronous>, transform_indices = @transform_4, window_bounds = array<i64: 32, 32>}, {pipeline_mode = #tpu.pipeline_mode<synchronous>, transform_indices = @transform_5, window_bounds = array<i64: 1, 32>}, {pipeline_mode = #tpu.pipeline_mode<synchronous>, transform_indices = @transform_6, window_bounds = array<i64: 1, 32>}, {pipeline_mode = #tpu.pipeline_mode<synchronous>, transform_indices = @transform_7, window_bounds = array<i64: 1, 32>}, {pipeline_mode = #tpu.pipeline_mode<synchronous>, transform_indices = @transform_8, window_bounds = array<i64: 32, 128>}, {pipeline_mode = #tpu.pipeline_mode<synchronous>, transform_indices = @transform_9, window_bounds = array<i64: 1, 128>}, {pipeline_mode = #tpu.pipeline_mode<synchronous>, transform_indices = @transform_10, window_bounds = array<i64: 128, 32>}, {pipeline_mode = #tpu.pipeline_mode<synchronous>, transform_indices = @transform_11, window_bounds = array<i64: 1, 32>}, {pipeline_mode = #tpu.pipeline_mode<synchronous>, transform_indices = @transform_12, window_bounds = array<i64: 1, 32>}, {pipeline_mode = #tpu.pipeline_mode<synchronous>, transform_indices = @transform_13, window_bounds = array<i64: 1, 32>}, {transform_indices = @transform_14, window_bounds = array<i64: 8, 4, 32>}]} {
    %c0 = arith.constant 0 : index
    %c0_0 = arith.constant 0 : index
    %c0_1 = arith.constant 0 : index
    %0 = vector.load %arg1[%c0, %c0_0, %c0_1] : memref<8x4x32xf32, #tpu.memory_space<vmem>>, vector<8x4x32xf32>
    %1 = vector.shape_cast %0 : vector<8x4x32xf32> to vector<32x32xf32>
    %2 = arith.truncf %1 : vector<32x32xf32> to vector<32x32xbf16>
    %c0_2 = arith.constant 0 : index
    %c0_3 = arith.constant 0 : index
    %3 = vector.load %arg3[%c0_2, %c0_3] : memref<32x96xbf16, #tpu.memory_space<vmem>>, vector<32x96xbf16>
    %cst = arith.constant dense<0.000000e+00> : vector<32x96xf32>
    %4 = tpu.matmul %2, %3, %cst {dimension_numbers = #tpu.dot_dimension_numbers<[1], [0], [0], [1], [0, 0, 1, 1], [], []>} : vector<32x32xbf16>, vector<32x96xbf16>, vector<32x96xf32> -> vector<32x96xf32>
    %c0_4 = arith.constant 0 : index
    %c0_5 = arith.constant 0 : index
    %5 = vector.load %arg4[%c0_4, %c0_5] : memref<1x96xf32, #tpu.memory_space<vmem>>, vector<1x96xf32>
    %6 = vector.shape_cast %5 : vector<1x96xf32> to vector<96xf32>
    %7 = vector.shape_cast %6 : vector<96xf32> to vector<1x96xf32>
    %8 = vector.broadcast %7 : vector<1x96xf32> to vector<32x96xf32>
    %9 = arith.addf %4, %8 : vector<32x96xf32>
    %10 = vector.extract_strided_slice %9 {offsets = [0, 0], sizes = [32, 32], strides = [1, 1]} : vector<32x96xf32> to vector<32x32xf32>
    %11 = vector.shape_cast %10 : vector<32x32xf32> to vector<8x4x32xf32>
    %12 = arith.truncf %11 : vector<8x4x32xf32> to vector<8x4x32xbf16>
    %13 = vector.extract_strided_slice %9 {offsets = [0, 32], sizes = [32, 32], strides = [1, 1]} : vector<32x96xf32> to vector<32x32xf32>
    %14 = vector.shape_cast %13 : vector<32x32xf32> to vector<8x4x32xf32>
    %15 = arith.truncf %14 : vector<8x4x32xf32> to vector<8x4x32xbf16>
    %16 = vector.extract_strided_slice %9 {offsets = [0, 64], sizes = [32, 32], strides = [1, 1]} : vector<32x96xf32> to vector<32x32xf32>
    %17 = vector.shape_cast %16 : vector<32x32xf32> to vector<8x4x32xf32>
    %18 = arith.truncf %17 : vector<8x4x32xf32> to vector<8x4x32xbf16>
    %19 = vector.extract_strided_slice %12 {offsets = [0, 0, 0], sizes = [8, 4, 8], strides = [1, 1, 1]} : vector<8x4x32xbf16> to vector<8x4x8xbf16>
    %20 = vector.extract_strided_slice %15 {offsets = [0, 0, 0], sizes = [8, 4, 8], strides = [1, 1, 1]} : vector<8x4x32xbf16> to vector<8x4x8xbf16>
    "tpu.trace_start"() <{level = 10 : i32, message = "gqd,gkd->gqk"}> : () -> ()
    %cst_6 = arith.constant dense<0.000000e+00> : vector<8x4x4xf32>
    %21 = tpu.matmul %19, %20, %cst_6 {dimension_numbers = #tpu.dot_dimension_numbers<[2], [2], [1], [1], [0, 0, 0, 1, 1, 1], [0], [0]>} : vector<8x4x8xbf16>, vector<8x4x8xbf16>, vector<8x4x4xf32> -> vector<8x4x4xf32>
    "tpu.trace_stop"() : () -> ()
    %22 = vector.extract_strided_slice %12 {offsets = [0, 0, 8], sizes = [8, 4, 8], strides = [1, 1, 1]} : vector<8x4x32xbf16> to vector<8x4x8xbf16>
    %23 = vector.extract_strided_slice %15 {offsets = [0, 0, 8], sizes = [8, 4, 8], strides = [1, 1, 1]} : vector<8x4x32xbf16> to vector<8x4x8xbf16>
    "tpu.trace_start"() <{level = 10 : i32, message = "gqd,gkd->gqk"}> : () -> ()
    %cst_7 = arith.constant dense<0.000000e+00> : vector<8x4x4xf32>
    %24 = tpu.matmul %22, %23, %cst_7 {dimension_numbers = #tpu.dot_dimension_numbers<[2], [2], [1], [1], [0, 0, 0, 1, 1, 1], [0], [0]>} : vector<8x4x8xbf16>, vector<8x4x8xbf16>, vector<8x4x4xf32> -> vector<8x4x4xf32>
    "tpu.trace_stop"() : () -> ()
    %25 = vector.extract_strided_slice %12 {offsets = [0, 0, 16], sizes = [8, 4, 8], strides = [1, 1, 1]} : vector<8x4x32xbf16> to vector<8x4x8xbf16>
    %26 = vector.extract_strided_slice %15 {offsets = [0, 0, 16], sizes = [8, 4, 8], strides = [1, 1, 1]} : vector<8x4x32xbf16> to vector<8x4x8xbf16>
    "tpu.trace_start"() <{level = 10 : i32, message = "gqd,gkd->gqk"}> : () -> ()
    %cst_8 = arith.constant dense<0.000000e+00> : vector<8x4x4xf32>
    %27 = tpu.matmul %25, %26, %cst_8 {dimension_numbers = #tpu.dot_dimension_numbers<[2], [2], [1], [1], [0, 0, 0, 1, 1, 1], [0], [0]>} : vector<8x4x8xbf16>, vector<8x4x8xbf16>, vector<8x4x4xf32> -> vector<8x4x4xf32>
    "tpu.trace_stop"() : () -> ()
    %28 = vector.extract_strided_slice %12 {offsets = [0, 0, 24], sizes = [8, 4, 8], strides = [1, 1, 1]} : vector<8x4x32xbf16> to vector<8x4x8xbf16>
    %29 = vector.extract_strided_slice %15 {offsets = [0, 0, 24], sizes = [8, 4, 8], strides = [1, 1, 1]} : vector<8x4x32xbf16> to vector<8x4x8xbf16>
    "tpu.trace_start"() <{level = 10 : i32, message = "gqd,gkd->gqk"}> : () -> ()
    %cst_9 = arith.constant dense<0.000000e+00> : vector<8x4x4xf32>
    %30 = tpu.matmul %28, %29, %cst_9 {dimension_numbers = #tpu.dot_dimension_numbers<[2], [2], [1], [1], [0, 0, 0, 1, 1, 1], [0], [0]>} : vector<8x4x8xbf16>, vector<8x4x8xbf16>, vector<8x4x4xf32> -> vector<8x4x4xf32>
    "tpu.trace_stop"() : () -> ()
    %31 = vector.shape_cast %21 : vector<8x4x4xf32> to vector<8x1x4x4xf32>
    %32 = vector.shape_cast %24 : vector<8x4x4xf32> to vector<8x1x4x4xf32>
    %33 = vector.shape_cast %27 : vector<8x4x4xf32> to vector<8x1x4x4xf32>
    %34 = vector.shape_cast %30 : vector<8x4x4xf32> to vector<8x1x4x4xf32>
    %35 = tpu.concatenate %31, %32, %33, %34 in 1 : vector<8x1x4x4xf32>, vector<8x1x4x4xf32>, vector<8x1x4x4xf32>, vector<8x1x4x4xf32> -> vector<8x4x4x4xf32>
    %c0_10 = arith.constant 0 : index
    %c0_11 = arith.constant 0 : index
    %c0_12 = arith.constant 0 : index
    %c0_13 = arith.constant 0 : index
    %36 = vector.load %arg2[%c0_10, %c0_11, %c0_12, %c0_13] : memref<8x4x4x4xf32, #tpu.memory_space<vmem>>, vector<8x4x4x4xf32>
    %37 = arith.addf %35, %36 : vector<8x4x4x4xf32>
    %cst_14 = arith.constant dense<0xFF800000> : vector<8x4x4xf32>
    %38 = vector.multi_reduction <maximumf>, %37, %cst_14 [3] : vector<8x4x4x4xf32> to vector<8x4x4xf32>
    %39 = vector.shape_cast %38 : vector<8x4x4xf32> to vector<8x4x4x1xf32>
    %40 = vector.broadcast %39 : vector<8x4x4x1xf32> to vector<8x4x4x4xf32>
    %41 = arith.subf %37, %40 : vector<8x4x4x4xf32>
    %42 = math.exp %41 : vector<8x4x4x4xf32>
    %cst_15 = arith.constant dense<0.000000e+00> : vector<8x4x4xf32>
    %43 = vector.multi_reduction <add>, %42, %cst_15 [3] : vector<8x4x4x4xf32> to vector<8x4x4xf32>
    %44 = vector.shape_cast %43 : vector<8x4x4xf32> to vector<8x4x4x1xf32>
    %45 = tpu.reciprocal %44 {approx = true} : vector<8x4x4x1xf32> -> vector<8x4x4x1xf32>
    %46 = vector.broadcast %45 : vector<8x4x4x1xf32> to vector<8x4x4x4xf32>
    %47 = arith.mulf %42, %46 : vector<8x4x4x4xf32>
    %48 = arith.truncf %47 : vector<8x4x4x4xf32> to vector<8x4x4x4xbf16>
    %49 = vector.extract_strided_slice %48 {offsets = [0, 0, 0, 0], sizes = [8, 1, 4, 4], strides = [1, 1, 1, 1]} : vector<8x4x4x4xbf16> to vector<8x1x4x4xbf16>
    %50 = vector.shape_cast %49 : vector<8x1x4x4xbf16> to vector<8x4x4xbf16>
    %51 = vector.extract_strided_slice %18 {offsets = [0, 0, 0], sizes = [8, 4, 8], strides = [1, 1, 1]} : vector<8x4x32xbf16> to vector<8x4x8xbf16>
    "tpu.trace_start"() <{level = 10 : i32, message = "gqk,gkd->gqd"}> : () -> ()
    %cst_16 = arith.constant dense<0.000000e+00> : vector<8x4x8xf32>
    %52 = tpu.matmul %50, %51, %cst_16 {dimension_numbers = #tpu.dot_dimension_numbers<[2], [1], [1], [2], [0, 0, 0, 1, 1, 2], [0], [0]>} : vector<8x4x4xbf16>, vector<8x4x8xbf16>, vector<8x4x8xf32> -> vector<8x4x8xf32>
    "tpu.trace_stop"() : () -> ()
    %53 = vector.extract_strided_slice %48 {offsets = [0, 1, 0, 0], sizes = [8, 1, 4, 4], strides = [1, 1, 1, 1]} : vector<8x4x4x4xbf16> to vector<8x1x4x4xbf16>
    %54 = vector.shape_cast %53 : vector<8x1x4x4xbf16> to vector<8x4x4xbf16>
    %55 = vector.extract_strided_slice %18 {offsets = [0, 0, 8], sizes = [8, 4, 8], strides = [1, 1, 1]} : vector<8x4x32xbf16> to vector<8x4x8xbf16>
    "tpu.trace_start"() <{level = 10 : i32, message = "gqk,gkd->gqd"}> : () -> ()
    %cst_17 = arith.constant dense<0.000000e+00> : vector<8x4x8xf32>
    %56 = tpu.matmul %54, %55, %cst_17 {dimension_numbers = #tpu.dot_dimension_numbers<[2], [1], [1], [2], [0, 0, 0, 1, 1, 2], [0], [0]>} : vector<8x4x4xbf16>, vector<8x4x8xbf16>, vector<8x4x8xf32> -> vector<8x4x8xf32>
    "tpu.trace_stop"() : () -> ()
    %57 = vector.extract_strided_slice %48 {offsets = [0, 2, 0, 0], sizes = [8, 1, 4, 4], strides = [1, 1, 1, 1]} : vector<8x4x4x4xbf16> to vector<8x1x4x4xbf16>
    %58 = vector.shape_cast %57 : vector<8x1x4x4xbf16> to vector<8x4x4xbf16>
    %59 = vector.extract_strided_slice %18 {offsets = [0, 0, 16], sizes = [8, 4, 8], strides = [1, 1, 1]} : vector<8x4x32xbf16> to vector<8x4x8xbf16>
    "tpu.trace_start"() <{level = 10 : i32, message = "gqk,gkd->gqd"}> : () -> ()
    %cst_18 = arith.constant dense<0.000000e+00> : vector<8x4x8xf32>
    %60 = tpu.matmul %58, %59, %cst_18 {dimension_numbers = #tpu.dot_dimension_numbers<[2], [1], [1], [2], [0, 0, 0, 1, 1, 2], [0], [0]>} : vector<8x4x4xbf16>, vector<8x4x8xbf16>, vector<8x4x8xf32> -> vector<8x4x8xf32>
    "tpu.trace_stop"() : () -> ()
    %61 = vector.extract_strided_slice %48 {offsets = [0, 3, 0, 0], sizes = [8, 1, 4, 4], strides = [1, 1, 1, 1]} : vector<8x4x4x4xbf16> to vector<8x1x4x4xbf16>
    %62 = vector.shape_cast %61 : vector<8x1x4x4xbf16> to vector<8x4x4xbf16>
    %63 = vector.extract_strided_slice %18 {offsets = [0, 0, 24], sizes = [8, 4, 8], strides = [1, 1, 1]} : vector<8x4x32xbf16> to vector<8x4x8xbf16>
    "tpu.trace_start"() <{level = 10 : i32, message = "gqk,gkd->gqd"}> : () -> ()
    %cst_19 = arith.constant dense<0.000000e+00> : vector<8x4x8xf32>
    %64 = tpu.matmul %62, %63, %cst_19 {dimension_numbers = #tpu.dot_dimension_numbers<[2], [1], [1], [2], [0, 0, 0, 1, 1, 2], [0], [0]>} : vector<8x4x4xbf16>, vector<8x4x8xbf16>, vector<8x4x8xf32> -> vector<8x4x8xf32>
    "tpu.trace_stop"() : () -> ()
    %65 = tpu.concatenate %52, %56, %60, %64 in 2 : vector<8x4x8xf32>, vector<8x4x8xf32>, vector<8x4x8xf32>, vector<8x4x8xf32> -> vector<8x4x32xf32>
    %66 = vector.shape_cast %65 : vector<8x4x32xf32> to vector<32x32xf32>
    %67 = arith.truncf %66 : vector<32x32xf32> to vector<32x32xbf16>
    %c0_20 = arith.constant 0 : index
    %c0_21 = arith.constant 0 : index
    %68 = vector.load %arg5[%c0_20, %c0_21] : memref<32x32xbf16, #tpu.memory_space<vmem>>, vector<32x32xbf16>
    %cst_22 = arith.constant dense<0.000000e+00> : vector<32x32xf32>
    %69 = tpu.matmul %67, %68, %cst_22 {dimension_numbers = #tpu.dot_dimension_numbers<[1], [0], [0], [1], [0, 0, 1, 1], [], []>} : vector<32x32xbf16>, vector<32x32xbf16>, vector<32x32xf32> -> vector<32x32xf32>
    %c0_23 = arith.constant 0 : index
    %c0_24 = arith.constant 0 : index
    %70 = vector.load %arg6[%c0_23, %c0_24] : memref<1x32xf32, #tpu.memory_space<vmem>>, vector<1x32xf32>
    %71 = vector.shape_cast %70 : vector<1x32xf32> to vector<32xf32>
    %72 = vector.shape_cast %71 : vector<32xf32> to vector<1x32xf32>
    %73 = vector.broadcast %72 : vector<1x32xf32> to vector<32x32xf32>
    %74 = arith.addf %69, %73 : vector<32x32xf32>
    %75 = arith.addf %1, %74 : vector<32x32xf32>
    %cst_25 = arith.constant dense<0.000000e+00> : vector<32xf32>
    %76 = vector.multi_reduction <add>, %75, %cst_25 [1] : vector<32x32xf32> to vector<32xf32>
    %77 = vector.shape_cast %76 : vector<32xf32> to vector<32x1xf32>
    %cst_26 = arith.constant 3.200000e+01 : f32
    %78 = vector.broadcast %cst_26 : f32 to vector<32x1xf32>
    %79 = arith.divf %77, %78 : vector<32x1xf32>
    %80 = vector.broadcast %79 : vector<32x1xf32> to vector<32x32xf32>
    %81 = arith.subf %75, %80 : vector<32x32xf32>
    %82 = arith.mulf %81, %81 : vector<32x32xf32>
    %cst_27 = arith.constant dense<0.000000e+00> : vector<32xf32>
    %83 = vector.multi_reduction <add>, %82, %cst_27 [1] : vector<32x32xf32> to vector<32xf32>
    %84 = vector.shape_cast %83 : vector<32xf32> to vector<32x1xf32>
    %cst_28 = arith.constant 3.200000e+01 : f32
    %85 = vector.broadcast %cst_28 : f32 to vector<32x1xf32>
    %86 = arith.divf %84, %85 : vector<32x1xf32>
    %87 = vector.broadcast %79 : vector<32x1xf32> to vector<32x32xf32>
    %88 = arith.subf %75, %87 : vector<32x32xf32>
    %cst_29 = arith.constant 9.99999974E-6 : f32
    %89 = vector.broadcast %cst_29 : f32 to vector<32x1xf32>
    %90 = arith.addf %86, %89 : vector<32x1xf32>
    %91 = math.rsqrt %90 : vector<32x1xf32>
    %92 = vector.broadcast %91 : vector<32x1xf32> to vector<32x32xf32>
    %93 = arith.mulf %88, %92 : vector<32x32xf32>
    %c0_30 = arith.constant 0 : index
    %c0_31 = arith.constant 0 : index
    %94 = vector.load %arg7[%c0_30, %c0_31] : memref<1x32xf32, #tpu.memory_space<vmem>>, vector<1x32xf32>
    %95 = vector.shape_cast %94 : vector<1x32xf32> to vector<32xf32>
    %96 = vector.shape_cast %95 : vector<32xf32> to vector<1x32xf32>
    %97 = vector.broadcast %96 : vector<1x32xf32> to vector<32x32xf32>
    %98 = arith.mulf %93, %97 : vector<32x32xf32>
    %c0_32 = arith.constant 0 : index
    %c0_33 = arith.constant 0 : index
    %99 = vector.load %arg8[%c0_32, %c0_33] : memref<1x32xf32, #tpu.memory_space<vmem>>, vector<1x32xf32>
    %100 = vector.shape_cast %99 : vector<1x32xf32> to vector<32xf32>
    %101 = vector.shape_cast %100 : vector<32xf32> to vector<1x32xf32>
    %102 = vector.broadcast %101 : vector<1x32xf32> to vector<32x32xf32>
    %103 = arith.addf %98, %102 : vector<32x32xf32>
    %104 = arith.truncf %103 : vector<32x32xf32> to vector<32x32xbf16>
    %c0_34 = arith.constant 0 : index
    %c0_35 = arith.constant 0 : index
    %105 = vector.load %arg9[%c0_34, %c0_35] : memref<32x128xbf16, #tpu.memory_space<vmem>>, vector<32x128xbf16>
    %cst_36 = arith.constant dense<0.000000e+00> : vector<32x128xf32>
    %106 = tpu.matmul %104, %105, %cst_36 {dimension_numbers = #tpu.dot_dimension_numbers<[1], [0], [0], [1], [0, 0, 1, 1], [], []>} : vector<32x32xbf16>, vector<32x128xbf16>, vector<32x128xf32> -> vector<32x128xf32>
    %c0_37 = arith.constant 0 : index
    %c0_38 = arith.constant 0 : index
    %107 = vector.load %arg10[%c0_37, %c0_38] : memref<1x128xf32, #tpu.memory_space<vmem>>, vector<1x128xf32>
    %108 = vector.shape_cast %107 : vector<1x128xf32> to vector<128xf32>
    %109 = vector.shape_cast %108 : vector<128xf32> to vector<1x128xf32>
    %110 = vector.broadcast %109 : vector<1x128xf32> to vector<32x128xf32>
    %111 = arith.addf %106, %110 : vector<32x128xf32>
    %cst_39 = arith.constant 0.000000e+00 : f32
    %112 = vector.broadcast %cst_39 : f32 to vector<32x128xf32>
    %113 = arith.maximumf %111, %112 : vector<32x128xf32>
    %114 = arith.truncf %113 : vector<32x128xf32> to vector<32x128xbf16>
    %c0_40 = arith.constant 0 : index
    %c0_41 = arith.constant 0 : index
    %115 = vector.load %arg11[%c0_40, %c0_41] : memref<128x32xbf16, #tpu.memory_space<vmem>>, vector<128x32xbf16>
    %cst_42 = arith.constant dense<0.000000e+00> : vector<32x32xf32>
    %116 = tpu.matmul %114, %115, %cst_42 {dimension_numbers = #tpu.dot_dimension_numbers<[1], [0], [0], [1], [0, 0, 1, 1], [], []>} : vector<32x128xbf16>, vector<128x32xbf16>, vector<32x32xf32> -> vector<32x32xf32>
    %c0_43 = arith.constant 0 : index
    %c0_44 = arith.constant 0 : index
    %117 = vector.load %arg12[%c0_43, %c0_44] : memref<1x32xf32, #tpu.memory_space<vmem>>, vector<1x32xf32>
    %118 = vector.shape_cast %117 : vector<1x32xf32> to vector<32xf32>
    %119 = vector.shape_cast %118 : vector<32xf32> to vector<1x32xf32>
    %120 = vector.broadcast %119 : vector<1x32xf32> to vector<32x32xf32>
    %121 = arith.addf %116, %120 : vector<32x32xf32>
    %122 = arith.addf %103, %121 : vector<32x32xf32>
    %cst_45 = arith.constant dense<0.000000e+00> : vector<32xf32>
    %123 = vector.multi_reduction <add>, %122, %cst_45 [1] : vector<32x32xf32> to vector<32xf32>
    %124 = vector.shape_cast %123 : vector<32xf32> to vector<32x1xf32>
    %cst_46 = arith.constant 3.200000e+01 : f32
    %125 = vector.broadcast %cst_46 : f32 to vector<32x1xf32>
    %126 = arith.divf %124, %125 : vector<32x1xf32>
    %127 = vector.broadcast %126 : vector<32x1xf32> to vector<32x32xf32>
    %128 = arith.subf %122, %127 : vector<32x32xf32>
    %129 = arith.mulf %128, %128 : vector<32x32xf32>
    %cst_47 = arith.constant dense<0.000000e+00> : vector<32xf32>
    %130 = vector.multi_reduction <add>, %129, %cst_47 [1] : vector<32x32xf32> to vector<32xf32>
    %131 = vector.shape_cast %130 : vector<32xf32> to vector<32x1xf32>
    %cst_48 = arith.constant 3.200000e+01 : f32
    %132 = vector.broadcast %cst_48 : f32 to vector<32x1xf32>
    %133 = arith.divf %131, %132 : vector<32x1xf32>
    %134 = vector.broadcast %126 : vector<32x1xf32> to vector<32x32xf32>
    %135 = arith.subf %122, %134 : vector<32x32xf32>
    %cst_49 = arith.constant 9.99999974E-6 : f32
    %136 = vector.broadcast %cst_49 : f32 to vector<32x1xf32>
    %137 = arith.addf %133, %136 : vector<32x1xf32>
    %138 = math.rsqrt %137 : vector<32x1xf32>
    %139 = vector.broadcast %138 : vector<32x1xf32> to vector<32x32xf32>
    %140 = arith.mulf %135, %139 : vector<32x32xf32>
    %c0_50 = arith.constant 0 : index
    %c0_51 = arith.constant 0 : index
    %141 = vector.load %arg13[%c0_50, %c0_51] : memref<1x32xf32, #tpu.memory_space<vmem>>, vector<1x32xf32>
    %142 = vector.shape_cast %141 : vector<1x32xf32> to vector<32xf32>
    %143 = vector.shape_cast %142 : vector<32xf32> to vector<1x32xf32>
    %144 = vector.broadcast %143 : vector<1x32xf32> to vector<32x32xf32>
    %145 = arith.mulf %140, %144 : vector<32x32xf32>
    %c0_52 = arith.constant 0 : index
    %c0_53 = arith.constant 0 : index
    %146 = vector.load %arg14[%c0_52, %c0_53] : memref<1x32xf32, #tpu.memory_space<vmem>>, vector<1x32xf32>
    %147 = vector.shape_cast %146 : vector<1x32xf32> to vector<32xf32>
    %148 = vector.shape_cast %147 : vector<32xf32> to vector<1x32xf32>
    %149 = vector.broadcast %148 : vector<1x32xf32> to vector<32x32xf32>
    %150 = arith.addf %145, %149 : vector<32x32xf32>
    %151 = vector.shape_cast %150 : vector<32x32xf32> to vector<8x4x32xf32>
    %c0_54 = arith.constant 0 : index
    %c0_55 = arith.constant 0 : index
    %c0_56 = arith.constant 0 : index
    %152 = vector.load %arg15[%c0_54, %c0_55, %c0_56] : memref<8x4x32xf32, #tpu.memory_space<vmem>>, vector<8x4x32xf32>
    tpu.vector_store %arg15[%c0_54, %c0_55, %c0_56], %151 {strides = array<i32>} : memref<8x4x32xf32, #tpu.memory_space<vmem>>, vector<8x4x32xf32>,
    return
  }
  func.func @transform_0(%arg0: i32) -> (i32, i32, i32) {
    %c0_i32 = arith.constant 0 : i32
    %c0_i32_0 = arith.constant 0 : i32
    %c0_i32_1 = arith.constant 0 : i32
    return %arg0, %c0_i32, %c0_i32_0 : i32, i32, i32
  }
  func.func @transform_1(%arg0: i32) -> (i32, i32, i32, i32) {
    %c0_i32 = arith.constant 0 : i32
    %c0_i32_0 = arith.constant 0 : i32
    %c0_i32_1 = arith.constant 0 : i32
    %c0_i32_2 = arith.constant 0 : i32
    return %arg0, %c0_i32, %c0_i32_0, %c0_i32_1 : i32, i32, i32, i32
  }
  func.func @transform_2(%arg0: i32) -> (i32, i32) {
    %c0_i32 = arith.constant 0 : i32
    %c0_i32_0 = arith.constant 0 : i32
    %c0_i32_1 = arith.constant 0 : i32
    return %c0_i32, %c0_i32_0 : i32, i32
  }
  func.func @transform_3(%arg0: i32) -> (i32, i32) {
    %c0_i32 = arith.constant 0 : i32
    %c0_i32_0 = arith.constant 0 : i32
    %c0_i32_1 = arith.constant 0 : i32
    return %c0_i32, %c0_i32_0 : i32, i32
  }
  func.func @transform_4(%arg0: i32) -> (i32, i32) {
    %c0_i32 = arith.constant 0 : i32
    %c0_i32_0 = arith.constant 0 : i32
    %c0_i32_1 = arith.constant 0 : i32
    return %c0_i32, %c0_i32_0 : i32, i32
  }
  func.func @transform_5(%arg0: i32) -> (i32, i32) {
    %c0_i32 = arith.constant 0 : i32
    %c0_i32_0 = arith.constant 0 : i32
    %c0_i32_1 = arith.constant 0 : i32
    return %c0_i32, %c0_i32_0 : i32, i32
  }
  func.func @transform_6(%arg0: i32) -> (i32, i32) {
    %c0_i32 = arith.constant 0 : i32
    %c0_i32_0 = arith.constant 0 : i32
    %c0_i32_1 = arith.constant 0 : i32
    return %c0_i32, %c0_i32_0 : i32, i32
  }
  func.func @transform_7(%arg0: i32) -> (i32, i32) {
    %c0_i32 = arith.constant 0 : i32
    %c0_i32_0 = arith.constant 0 : i32
    %c0_i32_1 = arith.constant 0 : i32
    return %c0_i32, %c0_i32_0 : i32, i32
  }
  func.func @transform_8(%arg0: i32) -> (i32, i32) {
    %c0_i32 = arith.constant 0 : i32
    %c0_i32_0 = arith.constant 0 : i32
    %c0_i32_1 = arith.constant 0 : i32
    return %c0_i32, %c0_i32_0 : i32, i32
  }
  func.func @transform_9(%arg0: i32) -> (i32, i32) {
    %c0_i32 = arith.constant 0 : i32
    %c0_i32_0 = arith.constant 0 : i32
    %c0_i32_1 = arith.constant 0 : i32
    return %c0_i32, %c0_i32_0 : i32, i32
  }
  func.func @transform_10(%arg0: i32) -> (i32, i32) {
    %c0_i32 = arith.constant 0 : i32
    %c0_i32_0 = arith.constant 0 : i32
    %c0_i32_1 = arith.constant 0 : i32
    return %c0_i32, %c0_i32_0 : i32, i32
  }
  func.func @transform_11(%arg0: i32) -> (i32, i32) {
    %c0_i32 = arith.constant 0 : i32
    %c0_i32_0 = arith.constant 0 : i32
    %c0_i32_1 = arith.constant 0 : i32
    return %c0_i32, %c0_i32_0 : i32, i32
  }
  func.func @transform_12(%arg0: i32) -> (i32, i32) {
    %c0_i32 = arith.constant 0 : i32
    %c0_i32_0 = arith.constant 0 : i32
    %c0_i32_1 = arith.constant 0 : i32
    return %c0_i32, %c0_i32_0 : i32, i32
  }
  func.func @transform_13(%arg0: i32) -> (i32, i32) {
    %c0_i32 = arith.constant 0 : i32
    %c0_i32_0 = arith.constant 0 : i32
    %c0_i32_1 = arith.constant 0 : i32
    return %c0_i32, %c0_i32_0 : i32, i32
  }
  func.func @transform_14(%arg0: i32) -> (i32, i32, i32) {
    %c0_i32 = arith.constant 0 : i32
    %c0_i32_0 = arith.constant 0 : i32
    %c0_i32_1 = arith.constant 0 : i32
    return %arg0, %c0_i32, %c0_i32_0 : i32, i32, i32
  }
}

</mosaic_0001>

<bundles_post_ra>
// kernel: tpu_custom_call.1
= control target key start
LH: loop header
LB: loop body
LE: loop exit
PB: predicated region body
PF: predicated region fallthrough
CT: control target
= control target key end

     0   :  { %s7682_s0 = inlined_call_operand.vmem [shape: f32[16,4,32], index: 0, kind: input, shape index: {}]   ;;  %s7683_s1 = inlined_call_operand.vmem [shape: f32[16,4,4,4], index: 1, kind: input, shape index: {}]   ;;  %s7684_s2 = inlined_call_operand.vmem [shape: bf16[32,96], index: 2, kind: input, shape index: {}]   ;;  %s7685_s3 = inlined_call_operand.vmem [shape: f32[1,96], index: 3, kind: input, shape index: {}]   ;;  %s7686_s4 = inlined_call_operand.vmem [shape: bf16[32,32], index: 4, kind: input, shape index: {}]   ;;  %s7687_s5 = inlined_call_operand.vmem [shape: f32[1,32], index: 5, kind: input, shape index: {}]   ;;  %s7688_s6 = inlined_call_operand.vmem [shape: f32[1,32], index: 6, kind: input, shape index: {}]   ;;  %s7689_s7 = inlined_call_operand.vmem [shape: f32[1,32], index: 7, kind: input, shape index: {}]   ;;  %s7690_s8 = inlined_call_operand.vmem [shape: bf16[32,128], index: 8, kind: input, shape index: {}]   ;;  %s7691_s9 = inlined_call_operand.vmem [shape: f32[1,128], index: 9, kind: input, shape index: {}]   ;;  %s7692_s10 = inlined_call_operand.vmem [shape: bf16[128,32], index: 10, kind: input, shape index: {}]   ;;  %s7693_s11 = inlined_call_operand.vmem [shape: f32[1,32], index: 11, kind: input, shape index: {}]   ;;  %s7694_s12 = inlined_call_operand.vmem [shape: f32[1,32], index: 12, kind: input, shape index: {}]   ;;  %s7695_s13 = inlined_call_operand.vmem [shape: f32[1,32], index: 13, kind: input, shape index: {}]   ;;  %s7696_s14 = inlined_call_operand.hbm [shape: f32[16,4,32], index: 14, kind: output, shape index: {}]  }
   0x1   :  { %7700 = sst [smem:[#allocation16_spill]] %s7682_s0 }
   0x2   :  { %7701 = sst [smem:[#allocation17_spill]] %s7683_s1 }
   0x3   :  { %7702 = sst [smem:[#allocation18_spill]] %s7684_s2 }
   0x4   :  { %19 = vsyncpa [#allocation3], 0 }
   0x5   :  { %21 = vsyncpa [#allocation3 + $0x1], 0  ;;  %s6382_s29 = smov 0   ;;  %s6384_s30 = smov 0  }
   0x6   :  { %s6386_s15 = smov 0   ;;  %s6388_s16 = smov 0  }
   0x7 LB: > { %s6403_s17 = sadd.s32 4294967295, %s6285_s16   ;;  %s5310_s18 = sadd.s32 4294967294, %s6285_s16   ;;  %s6285_s16 = sphi %s6388_s16, %s7735_s16   ;;  %s6281_s15 = sphi %s6386_s15, %s7734_s15   ;;  %s6277_s30 = sphi %s6384_s30, %s7733_s30   ;;  %s6273_s29 = sphi %s6382_s29, %s7732_s29  }
   0x8   : > { %s6407_s19 = sadd.s32 1, %s6285_s16   ;;  %s338_s20 = sadd.s32 1, %s6281_s15 }
   0x9   : > { %s335_s21 = ssub.s32 %s6285_s16, %s6407_s19  ;;  %p348_p0 = scmp.ne.s32.totalorder %s6281_s15, %s6277_s30 }
   0xa   : > { %p336_p1 = scmp.eq.s32.totalorder %s335_s21, 0  ;;  %p349_p2 = scmp.eq.s32.totalorder %s6403_s17, 1 }
   0xb   : > { %p354_p3 = scmp.ne.s32.totalorder %s6277_s30, %s6273_s29  ;;  %p355_p4 = scmp.eq.s32.totalorder %s5310_s18, 1 }
   0xc   : > { %s6418_s22 = scalar_select %p336_p1, %s6281_s15, %s338_s20  }
   0xd   : > { %p6420_p5 = por %p349_p2, %p348_p0  ;;  %p6424_p6 = por %p355_p4, %p354_p3 }
   0xe   : > { %7703 = sst [smem:[#allocation5_spill]] %s6418_s22  ;;  %p5313_p7 = scmp.ge.s32.totalorder %s6285_s16, 1 }
   0xf   : > { %p428_p8 = scmp.lt.s32.totalorder %s6285_s16, 3 }
  0x11   : > { %p429_p9 = pnand %p5313_p7, %p428_p8 }
  0x13   : > { %432 = sbr.rel (%p429_p9) target bundleno = 2647 (0xa57), region = 76 }
  0x18   : > { %s7706_s2 = sld [smem:[#allocation18_spill]]  ;;  %s5315_s27 = sshll.u32 %s6403_s17, 3  ;;  %vm544_vm0 = vcmask 261120   ;;  %v7697_v16 = vmov 0.0   ;;  %vm6288_vm1 = vmmov 0   ;;  %vm623_vm2 = vcmask 64512  }
  0x19   : > { %p481_p10 = scmp.lt.s32.totalorder %s5315_s27, 15  ;;  %s7707_s0 = sld [smem:[#allocation16_spill]]  ;;  %5589 = vmatprep.subr.bf16.mxu1 %v7697_v16  ;;  %5591 = vmatprep.mubr.msk.bf16.mxu1 %vm6288_vm1, %v7697_v16  ;;  %v5320_v18 = vld [vmem:[%s7685_s3] ss:$0 sm:$0xff]  ;;  %vm2668_vm3 = vcmask 1041408   ;;  %vm2277_vm4 = vcmask 27648  }
  0x1a   : > { %s6289_s28 = smov 96   ;;  %s6290_s18 = smov 88   ;;  %vm2664_vm5 = vcmask 31744   ;;  %vm4304_vm6 = vcmask 130048   ;;  %vm4313_vm7 = vcmask 195584   ;;  %vm5213_vm8 = vcmask 257024  }
  0x1b   : > { %s7737_s27 = smov (!%p481_p10, %s5315_s27), 15  ;;  %s6292_s21 = smov 80  }
  0x1c   : > { %s5316_s20 = sshll.u32 %s7737_s27, 2  ;;  %s6293_s22 = smov 112  }
  0x1d   : > { %s6294_s26 = smov 72   ;;  %s7708_s1 = sld [smem:[#allocation17_spill]] }
  0x1e   : > { %v6055_v0 = vld [vmem:[%s7706_s2 + $0x8] sm:$0xff]   ;;  %v6056_v1 = vld [vmem:[%s7706_s2] sm:$0xff]  }
  0x1f   : > { %5569 = vmatprep.subr.bf16.mxu0 %v6055_v0  ;;  %s6443_s25 = scalar_lea.vmem %s7707_s0, %s5316_s20  ;;  %s6291_s20 = smov 120  }
  0x20   : > { %5570 = vmatpush3.bf16.msra.mxu0 %v6055_v0  ;;  %v495_v2 = vld [vmem:[%s6443_s25] sm:$0xf]  ;;  %v496_v3 = vld [vmem:[%s6443_s25 + $0x4] sm:$0xf]  ;;  %v497_v4 = vld [vmem:[%s6443_s25 + $0x8] sm:$0xf] }
  0x21   : > { %5571 = vmatprep.subr.bf16.mxu0 %v6056_v1  ;;  %v498_v5 = vld [vmem:[%s6443_s25 + $0xc] sm:$0xf]  ;;  %v511_v6 = vcombine.low %v495_v2, %v496_v3  ;;  %v499_v7 = vld [vmem:[%s6443_s25 + $0x10] sm:$0xf]  ;;  %v500_v8 = vld [vmem:[%s6443_s25 + $0x14] sm:$0xf] }
  0x22   : > { %v512_v9 = vcombine.low %v497_v4, %v498_v5  ;;  %v501_v10 = vld [vmem:[%s6443_s25 + $0x18] sm:$0xf]  ;;  %v502_v11 = vld [vmem:[%s6443_s25 + $0x1c] sm:$0xf]  ;;  %v513_v12 = vcombine.low %v499_v7, %v500_v8 }
  0x23   : > { %v514_v13 = vcombine.low %v501_v10, %v502_v11 }
  0x24   : > { %5572 = vmatpush3.bf16.msra.mxu0 %v6056_v1  ;;  %v519_v14 = vpack.c.bf16 %v512_v9, %v511_v6 }
  0x25   : > { %v520_v15 = vpack.c.bf16 %v514_v13, %v513_v12  ;;  %5577 = vmatprep.subr.bf16.mxu0 %v7697_v16 }
  0x26   : > { %5573 = vmatprep.mubr.msk.bf16.mxu0 %vm544_vm0, %v519_v14 }
  0x27   : > { %5574 = vmatmul.mubr.msk.bf16.vlgmr.msra.gmra.mxu0 %vm544_vm0, %v520_v15 }
  0x28   : > { %5579 = vmatprep.mubr.msk.bf16.mxu0 %vm6288_vm1, %v7697_v16 }
  0xe7   : > { %v5575_v17 = vpop.f32.mrf.mxu0 }
  0xe8   : > { %v594_v26 = vadd.f32 %v5575_v17, %v5320_v18 }
  0xe9   : > { %v585_v19 = vpop.f32.mrf.mxu0 }
  0xea   : > { %v586_v20 = vadd.f32 %v5320_v18, %v585_v19  ;;  %v606_v30 = vcombine.high %v594_v26, %v594_v26  ;;  %v6473_v31 = vpack.c.bf16 %v594_v26, %v594_v26 }
  0xeb   : > { %v5576_v21 = vpop.f32.mrf.mxu0 }
  0xec   : > { %v604_v22 = vcombine.high %v586_v20, %v586_v20  ;;  %v6464_v23 = vpack.c.bf16 %v586_v20, %v586_v20  ;;  %v597_v32 = vadd.f32 %v5576_v21, %v5320_v18  ;;  %v6479_v34 = vpack.c.bf16 %v606_v30, %v606_v30 }
  0xed   : > { %v588_v24 = vpop.f32.mrf.mxu0 }
  0xee   : > { %v589_v25 = vadd.f32 %v5320_v18, %v588_v24  ;;  %621 = vrot.lane.b32.xlu0 %v6464_v23, %s6289_s28  ;;  %v6467_v27 = vpack.c.bf16 %v604_v22, %v604_v22  ;;  %v607_v35 = vcombine.high %v597_v32, %v597_v32  ;;  %v6481_v36 = vpack.c.bf16 %v597_v32, %v597_v32 }
  0xf0   : > { %v605_v28 = vcombine.high %v589_v25, %v589_v25  ;;  %v6469_v29 = vpack.c.bf16 %v589_v25, %v589_v25  ;;  %v6485_v37 = vpack.c.bf16 %v607_v35, %v607_v35 }
  0xf2   : > { %720 = vrot.lane.b32.xlu1 %v6469_v29, %s6289_s28  ;;  %671 = vrot.lane.b32.xlu0 %v6467_v27, %s6289_s28  ;;  %v6475_v33 = vpack.c.bf16 %v605_v28, %v605_v28 }
  0xf6   : > { %769 = vrot.lane.b32.xlu1 %v6475_v33, %s6289_s28  ;;  %818 = vrot.lane.b32.xlu0 %v6473_v31, %s6289_s28 }
  0xfa   : > { %867 = vrot.lane.b32.xlu1 %v6479_v34, %s6289_s28  ;;  %916 = vrot.lane.b32.xlu0 %v6481_v36, %s6289_s28 }
  0xfe   : > { %965 = vrot.lane.b32.xlu1 %v6485_v37, %s6289_s28  ;;  %1015 = vrot.lane.b32.xlu0 %v6464_v23, %s6290_s18  ;;  %s6295_s28 = smov 104  }
 0x102   : > { %1065 = vrot.lane.b32.xlu1 %v6467_v27, %s6290_s18  ;;  %1013 = vrot.lane.b32.xlu0 %v6464_v23, %s6291_s20 }
 0x106   : > { %1063 = vrot.lane.b32.xlu1 %v6467_v27, %s6291_s20  ;;  %1115 = vrot.lane.b32.xlu0 %v6469_v29, %s6290_s18 }
 0x10a   : > { %1165 = vrot.lane.b32.xlu1 %v6475_v33, %s6290_s18  ;;  %1113 = vrot.lane.b32.xlu0 %v6469_v29, %s6291_s20 }
 0x10e   : > { %1265 = vrot.lane.b32.xlu1 %v6479_v34, %s6290_s18  ;;  %1215 = vrot.lane.b32.xlu0 %v6473_v31, %s6290_s18 }
 0x112   : > { %1163 = vrot.lane.b32.xlu1 %v6475_v33, %s6291_s20  ;;  %1213 = vrot.lane.b32.xlu0 %v6473_v31, %s6291_s20 }
 0x116   : > { %1263 = vrot.lane.b32.xlu1 %v6479_v34, %s6291_s20  ;;  %1315 = vrot.lane.b32.xlu0 %v6481_v36, %s6290_s18 }
 0x11a   : > { %1365 = vrot.lane.b32.xlu1 %v6485_v37, %s6290_s18  ;;  %1313 = vrot.lane.b32.xlu0 %v6481_v36, %s6291_s20  ;;  %s7699_s18 = smov 64  }
 0x11e   : > { %1363 = vrot.lane.b32.xlu1 %v6485_v37, %s6291_s20  ;;  %1415 = vrot.lane.b32.xlu0 %v6464_v23, %s6292_s21  ;;  %s6297_s20 = smov 56  }
 0x122   : > { %1465 = vrot.lane.b32.xlu1 %v6467_v27, %s6292_s21  ;;  %1413 = vrot.lane.b32.xlu0 %v6464_v23, %s6293_s22 }
 0x126   : > { %1463 = vrot.lane.b32.xlu1 %v6467_v27, %s6293_s22  ;;  %1515 = vrot.lane.b32.xlu0 %v6469_v29, %s6292_s21 }
 0x12a   : > { %1565 = vrot.lane.b32.xlu1 %v6475_v33, %s6292_s21  ;;  %1513 = vrot.lane.b32.xlu0 %v6469_v29, %s6293_s22 }
 0x12e   : > { %1665 = vrot.lane.b32.xlu1 %v6479_v34, %s6292_s21  ;;  %1615 = vrot.lane.b32.xlu0 %v6473_v31, %s6292_s21 }
 0x132   : > { %1563 = vrot.lane.b32.xlu1 %v6475_v33, %s6293_s22  ;;  %1613 = vrot.lane.b32.xlu0 %v6473_v31, %s6293_s22 }
 0x136   : > { %1663 = vrot.lane.b32.xlu1 %v6479_v34, %s6293_s22  ;;  %1715 = vrot.lane.b32.xlu0 %v6481_v36, %s6292_s21 }
 0x13a   : > { %1765 = vrot.lane.b32.xlu1 %v6485_v37, %s6292_s21  ;;  %1713 = vrot.lane.b32.xlu0 %v6481_v36, %s6293_s22  ;;  %s6298_s21 = smov 48  }
 0x13e   : > { %1763 = vrot.lane.b32.xlu1 %v6485_v37, %s6293_s22  ;;  %1815 = vrot.lane.b32.xlu0 %v6464_v23, %s6294_s26  ;;  %s5417_s22 = sshll.u32 %s7737_s27, 4  ;;  %s6299_s27 = smov 40  }
 0x142   : > { %1865 = vrot.lane.b32.xlu1 %v6467_v27, %s6294_s26  ;;  %1813 = vrot.lane.b32.xlu0 %v6464_v23, %s6295_s28 }
 0x146   : > { %1863 = vrot.lane.b32.xlu1 %v6467_v27, %s6295_s28  ;;  %1915 = vrot.lane.b32.xlu0 %v6469_v29, %s6294_s26 }
 0x14a   : > { %1965 = vrot.lane.b32.xlu1 %v6475_v33, %s6294_s26  ;;  %1913 = vrot.lane.b32.xlu0 %v6469_v29, %s6295_s28 }
 0x14e   : > { %2065 = vrot.lane.b32.xlu1 %v6479_v34, %s6294_s26  ;;  %2015 = vrot.lane.b32.xlu0 %v6473_v31, %s6294_s26 }
 0x152   : > { %1963 = vrot.lane.b32.xlu1 %v6475_v33, %s6295_s28  ;;  %2013 = vrot.lane.b32.xlu0 %v6473_v31, %s6295_s28 }
 0x156   : > { %2063 = vrot.lane.b32.xlu1 %v6479_v34, %s6295_s28  ;;  %2115 = vrot.lane.b32.xlu0 %v6481_v36, %s6294_s26 }
 0x15a   : > { %2165 = vrot.lane.b32.xlu1 %v6485_v37, %s6294_s26  ;;  %2113 = vrot.lane.b32.xlu0 %v6481_v36, %s6295_s28  ;;  %s6302_s26 = smov 24  }
 0x15e   : > { %2163 = vrot.lane.b32.xlu1 %v6485_v37, %s6295_s28  ;;  %2712 = vrot.lane.b32.xlu0 %v6467_v27, %s7699_s18 }
 0x160   : > { %v622_v38 = vpop.permute.xlu0 %621 }
 0x161   : > { %v628_v39 = vsel %vm623_vm2, %v622_v38, 0 }
 0x162   : > { %5578 = vmatpush3.bf16.xpose.msra.mxu0 %v628_v39  ;;  %2662 = vrot.lane.b32.xlu1 %v6464_v23, %s7699_s18 }
 0x163   : > { %2904 = vrot.lane.b32.xlu0 %v6479_v34, %s7699_s18  ;;  %5583 = vmatprep.subr.bf16.mxu0 %v7697_v16 }
 0x164   : > { %v721_v40 = vpop.permute.xlu1 %720  ;;  %v672_v41 = vpop.permute.xlu0 %671 }
 0x165   : > { %v726_v42 = vsel %vm623_vm2, %v721_v40, 0  ;;  %v677_v45 = vsel %vm623_vm2, %v672_v41, 0 }
 0x166   : > { %5590 = vmatpush3.bf16.xpose.msra.mxu1 %v726_v42  ;;  %2760 = vrot.lane.b32.xlu1 %v6469_v29, %s7699_s18 }
 0x167   : > { %3000 = vrot.lane.b32.xlu0 %v6485_v37, %s7699_s18  ;;  %5601 = vmatprep.subr.bf16.mxu1 %v7697_v16 }
 0x168   : > { %v770_v43 = vpop.permute.xlu1 %769  ;;  %v819_v44 = vpop.permute.xlu0 %818 }
 0x169   : > { %5580 = vmatmul.mubr.msk.bf16.vlgmr.msra.gmra.mxu0 %vm623_vm2, %v6464_v23  ;;  %v824_v48 = vsel %vm623_vm2, %v819_v44, 0  ;;  %v775_v51 = vsel %vm623_vm2, %v770_v43, 0 }
 0x16a   : > { %2856 = vrot.lane.b32.xlu1 %v6473_v31, %s7699_s18  ;;  %5584 = vmatpush3.bf16.xpose.msra.mxu0 %v677_v45 }
 0x16b   : > { %3096 = vrot.lane.b32.xlu0 %v6467_v27, %s6297_s20  ;;  %5585 = vmatprep.mubr.msk.bf16.mxu0 %vm6288_vm1, %v7697_v16 }
 0x16c   : > { %v868_v46 = vpop.permute.xlu1 %867  ;;  %v917_v47 = vpop.permute.xlu0 %916  ;;  %5595 = vmatprep.subr.bf16.mxu0 %v7697_v16 }
 0x16d   : > { %5592 = vmatmul.mubr.msk.bf16.vlgmr.msra.gmra.mxu1 %vm623_vm2, %v6469_v29  ;;  %v922_v54 = vsel %vm623_vm2, %v917_v47, 0  ;;  %v873_v57 = vsel %vm623_vm2, %v868_v46, 0 }
 0x16e   : > { %2952 = vrot.lane.b32.xlu1 %v6481_v36, %s7699_s18  ;;  %5602 = vmatpush3.bf16.xpose.msra.mxu1 %v824_v48 }
 0x16f   : > { %2808 = vrot.lane.b32.xlu0 %v6475_v33, %s7699_s18  ;;  %5603 = vmatprep.mubr.msk.bf16.mxu1 %vm6288_vm1, %v7697_v16 }
 0x170   : > { %v966_v49 = vpop.permute.xlu1 %965  ;;  %v1016_v50 = vpop.permute.xlu0 %1015  ;;  %5613 = vmatprep.subr.bf16.mxu1 %v7697_v16 }
 0x171   : > { %5586 = vmatmul.mubr.msk.bf16.vlgmr.msra.gmra.mxu0 %vm623_vm2, %v6467_v27  ;;  %v1021_v60 = vsel %vm623_vm2, %v1016_v50, 0  ;;  %v971_v63 = vsel %vm623_vm2, %v966_v49, 0 }
 0x172   : > { %3048 = vrot.lane.b32.xlu1 %v6464_v23, %s6297_s20  ;;  %5596 = vmatpush3.bf16.xpose.msra.mxu0 %v775_v51 }
 0x173   : > { %3192 = vrot.lane.b32.xlu0 %v6475_v33, %s6297_s20  ;;  %5597 = vmatprep.mubr.msk.bf16.mxu0 %vm6288_vm1, %v7697_v16 }
 0x174   : > { %v1066_v52 = vpop.permute.xlu1 %1065  ;;  %v1014_v53 = vpop.permute.xlu0 %1013  ;;  %5607 = vmatprep.subr.bf16.mxu0 %v7697_v16 }
 0x175   : > { %5604 = vmatmul.mubr.msk.bf16.vlgmr.msra.gmra.mxu1 %vm623_vm2, %v6473_v31  ;;  %v1071_v5 = vsel %vm623_vm2, %v1066_v52, 0 }
 0x176   : > { %3144 = vrot.lane.b32.xlu1 %v6469_v29, %s6297_s20  ;;  %5614 = vmatpush3.bf16.xpose.msra.mxu1 %v922_v54 }
 0x177   : > { %3288 = vrot.lane.b32.xlu0 %v6479_v34, %s6297_s20  ;;  %5615 = vmatprep.mubr.msk.bf16.mxu1 %vm6288_vm1, %v7697_v16 }
 0x178   : > { %v1064_v55 = vpop.permute.xlu1 %1063  ;;  %v1116_v56 = vpop.permute.xlu0 %1115  ;;  %5625 = vmatprep.subr.bf16.mxu1 %v7697_v16 }
 0x179   : > { %5598 = vmatmul.mubr.msk.bf16.vlgmr.msra.gmra.mxu0 %vm623_vm2, %v6475_v33  ;;  %v1121_v2 = vsel %vm623_vm2, %v1116_v56, 0 }
 0x17a   : > { %3240 = vrot.lane.b32.xlu1 %v6473_v31, %s6297_s20  ;;  %5608 = vmatpush3.bf16.xpose.msra.mxu0 %v873_v57 }
 0x17b   : > { %3384 = vrot.lane.b32.xlu0 %v6485_v37, %s6297_s20  ;;  %5609 = vmatprep.mubr.msk.bf16.mxu0 %vm6288_vm1, %v7697_v16 }
 0x17c   : > { %v1166_v58 = vpop.permute.xlu1 %1165  ;;  %v1114_v59 = vpop.permute.xlu0 %1113  ;;  %5619 = vmatprep.subr.bf16.mxu0 %v7697_v16 }
 0x17d   : > { %5616 = vmatmul.mubr.msk.bf16.vlgmr.msra.gmra.mxu1 %vm623_vm2, %v6481_v36  ;;  %v1171_v11 = vsel %vm623_vm2, %v1166_v58, 0 }
 0x17e   : > { %3336 = vrot.lane.b32.xlu1 %v6481_v36, %s6297_s20  ;;  %5626 = vmatpush3.bf16.xpose.msra.mxu1 %v1021_v60  ;;  %s6752_s20 = scalar_lea.vmem %s7708_s1, %s5417_s22  ;;  %s6301_s22 = smov 16  }
 0x17f   : > { %3480 = vrot.lane.b32.xlu0 %v6467_v27, %s6298_s21  ;;  %5627 = vmatprep.mubr.msk.bf16.mxu1 %vm6288_vm1, %v7697_v16 }
 0x180   : > { %v1266_v61 = vpop.permute.xlu1 %1265  ;;  %v1216_v62 = vpop.permute.xlu0 %1215  ;;  %5637 = vmatprep.subr.bf16.mxu1 %v7697_v16 }
 0x181   : > { %5610 = vmatmul.mubr.msk.bf16.vlgmr.msra.gmra.mxu0 %vm623_vm2, %v6479_v34  ;;  %v1221_v8 = vsel %vm623_vm2, %v1216_v62, 0  ;;  %v1271_v18 = vsel %vm623_vm2, %v1266_v61, 0 }
 0x182   : > { %3432 = vrot.lane.b32.xlu1 %v6464_v23, %s6298_s21  ;;  %5620 = vmatpush3.bf16.xpose.msra.mxu0 %v971_v63 }
 0x183   : > { %3576 = vrot.lane.b32.xlu0 %v6475_v33, %s6298_s21  ;;  %5621 = vmatprep.mubr.msk.bf16.mxu0 %vm6288_vm1, %v7697_v16 }
 0x184   : > { %v1164_v0 = vpop.permute.xlu1 %1163  ;;  %v1214_v1 = vpop.permute.xlu0 %1213  ;;  %5631 = vmatprep.subr.bf16.mxu0 %v7697_v16 }
 0x185   : > { %5628 = vmatmul.mubr.msk.bf16.vlgmr.msra.gmra.mxu1 %vm623_vm2, %v1014_v53 }
 0x186   : > { %3528 = vrot.lane.b32.xlu1 %v6469_v29, %s6298_s21  ;;  %5638 = vmatpush3.bf16.xpose.msra.mxu1 %v1121_v2 }
 0x187   : > { %5639 = vmatprep.mubr.msk.bf16.mxu1 %vm6288_vm1, %v7697_v16  ;;  %5649 = vmatprep.subr.bf16.mxu1 %v7697_v16 }
 0x188   : > { %v1264_v3 = vpop.permute.xlu1 %1263  ;;  %v1316_v4 = vpop.permute.xlu0 %1315 }
 0x189   : > { %5622 = vmatmul.mubr.msk.bf16.vlgmr.msra.gmra.mxu0 %vm623_vm2, %v6485_v37  ;;  %v1321_v14 = vsel %vm623_vm2, %v1316_v4, 0 }
 0x18a   : > { %5632 = vmatpush3.bf16.xpose.msra.mxu0 %v1071_v5  ;;  %5633 = vmatprep.mubr.msk.bf16.mxu0 %vm6288_vm1, %v7697_v16 }
 0x18b   : > { %5643 = vmatprep.subr.bf16.mxu0 %v7697_v16 }
 0x18c   : > { %v1366_v6 = vpop.permute.xlu1 %1365  ;;  %v1314_v7 = vpop.permute.xlu0 %1313 }
 0x18d   : > { %5640 = vmatmul.mubr.msk.bf16.vlgmr.msra.gmra.mxu1 %vm623_vm2, %v1114_v59  ;;  %v1371_v25 = vsel %vm623_vm2, %v1366_v6, 0 }
 0x18e   : > { %5650 = vmatpush3.bf16.xpose.msra.mxu1 %v1221_v8  ;;  %5651 = vmatprep.mubr.msk.bf16.mxu1 %vm6288_vm1, %v7697_v16 }
 0x18f   : > { %5661 = vmatprep.subr.bf16.mxu1 %v7697_v16 }
 0x190   : > { %v1364_v9 = vpop.permute.xlu1 %1363  ;;  %v1416_v10 = vpop.permute.xlu0 %1415 }
 0x191   : > { %5634 = vmatmul.mubr.msk.bf16.vlgmr.msra.gmra.mxu0 %vm623_vm2, %v1064_v55  ;;  %v1421_v21 = vsel %vm623_vm2, %v1416_v10, 0 }
 0x192   : > { %5644 = vmatpush3.bf16.xpose.msra.mxu0 %v1171_v11  ;;  %5645 = vmatprep.mubr.msk.bf16.mxu0 %vm6288_vm1, %v7697_v16  ;;  %v2213_v11 = vld [vmem:[%s6752_s20] sm:$0xf] }
 0x193   : > { %5655 = vmatprep.subr.bf16.mxu0 %v7697_v16 }
 0x194   : > { %v1466_v12 = vpop.permute.xlu1 %1465  ;;  %v1414_v13 = vpop.permute.xlu0 %1413 }
 0x195   : > { %5652 = vmatmul.mubr.msk.bf16.vlgmr.msra.gmra.mxu1 %vm623_vm2, %v1214_v1  ;;  %v1471_v38 = vsel %vm623_vm2, %v1466_v12, 0 }
 0x196   : > { %5662 = vmatpush3.bf16.xpose.msra.mxu1 %v1321_v14  ;;  %5663 = vmatprep.mubr.msk.bf16.mxu1 %vm6288_vm1, %v7697_v16 }
 0x197   : > { %5673 = vmatprep.subr.bf16.mxu1 %v7697_v16 }
 0x198   : > { %v1464_v15 = vpop.permute.xlu1 %1463  ;;  %v1516_v17 = vpop.permute.xlu0 %1515 }
 0x199   : > { %5646 = vmatmul.mubr.msk.bf16.vlgmr.msra.gmra.mxu0 %vm623_vm2, %v1164_v0  ;;  %v1521_v30 = vsel %vm623_vm2, %v1516_v17, 0 }
 0x19a   : > { %5656 = vmatpush3.bf16.xpose.msra.mxu0 %v1271_v18  ;;  %5657 = vmatprep.mubr.msk.bf16.mxu0 %vm6288_vm1, %v7697_v16 }
 0x19b   : > { %5667 = vmatprep.subr.bf16.mxu0 %v7697_v16 }
 0x19c   : > { %v1566_v19 = vpop.permute.xlu1 %1565  ;;  %v1514_v20 = vpop.permute.xlu0 %1513 }
 0x19d   : > { %5664 = vmatmul.mubr.msk.bf16.vlgmr.msra.gmra.mxu1 %vm623_vm2, %v1314_v7  ;;  %v1571_v44 = vsel %vm623_vm2, %v1566_v19, 0 }
 0x19e   : > { %5674 = vmatpush3.bf16.xpose.msra.mxu1 %v1421_v21  ;;  %5675 = vmatprep.mubr.msk.bf16.mxu1 %vm6288_vm1, %v7697_v16 }
 0x19f   : > { %5685 = vmatprep.subr.bf16.mxu1 %v7697_v16 }
 0x1a0   : > { %v1666_v22 = vpop.permute.xlu1 %1665  ;;  %v1616_v24 = vpop.permute.xlu0 %1615 }
 0x1a1   : > { %5658 = vmatmul.mubr.msk.bf16.vlgmr.msra.gmra.mxu0 %vm623_vm2, %v1264_v3  ;;  %v1621_v41 = vsel %vm623_vm2, %v1616_v24, 0  ;;  %v1671_v49 = vsel %vm623_vm2, %v1666_v22, 0  ;;  %v2217_v24 = vld [vmem:[%s6752_s20 + $0x10] sm:$0xf] }
 0x1a2   : > { %5668 = vmatpush3.bf16.xpose.msra.mxu0 %v1371_v25  ;;  %5669 = vmatprep.mubr.msk.bf16.mxu0 %vm6288_vm1, %v7697_v16 }
 0x1a3   : > { %5679 = vmatprep.subr.bf16.mxu0 %v7697_v16 }
 0x1a4   : > { %v1564_v26 = vpop.permute.xlu1 %1563  ;;  %v1614_v28 = vpop.permute.xlu0 %1613 }
 0x1a5   : > { %5676 = vmatmul.mubr.msk.bf16.vlgmr.msra.gmra.mxu1 %vm623_vm2, %v1414_v13 }
 0x1a6   : > { %5686 = vmatpush3.bf16.xpose.msra.mxu1 %v1521_v30  ;;  %5687 = vmatprep.mubr.msk.bf16.mxu1 %vm6288_vm1, %v7697_v16 }
 0x1a7   : > { %5697 = vmatprep.subr.bf16.mxu1 %v7697_v16 }
 0x1a8   : > { %v1664_v32 = vpop.permute.xlu1 %1663  ;;  %v1716_v35 = vpop.permute.xlu0 %1715 }
 0x1a9   : > { %5670 = vmatmul.mubr.msk.bf16.vlgmr.msra.gmra.mxu0 %vm623_vm2, %v1364_v9  ;;  %v1721_v47 = vsel %vm623_vm2, %v1716_v35, 0 }
 0x1aa   : > { %5680 = vmatpush3.bf16.xpose.msra.mxu0 %v1471_v38  ;;  %5681 = vmatprep.mubr.msk.bf16.mxu0 %vm6288_vm1, %v7697_v16 }
 0x1ab   : > { %5691 = vmatprep.subr.bf16.mxu0 %v7697_v16 }
 0x1ac   : > { %v1766_v39 = vpop.permute.xlu1 %1765  ;;  %v1714_v40 = vpop.permute.xlu0 %1713 }
 0x1ad   : > { %5688 = vmatmul.mubr.msk.bf16.vlgmr.msra.gmra.mxu1 %vm623_vm2, %v1514_v20  ;;  %v1771_v55 = vsel %vm623_vm2, %v1766_v39, 0 }
 0x1ae   : > { %5698 = vmatpush3.bf16.xpose.msra.mxu1 %v1621_v41  ;;  %5699 = vmatprep.mubr.msk.bf16.mxu1 %vm6288_vm1, %v7697_v16 }
 0x1af   : > { %5709 = vmatprep.subr.bf16.mxu1 %v7697_v16 }
 0x1b0   : > { %v1764_v42 = vpop.permute.xlu1 %1763  ;;  %v1816_v43 = vpop.permute.xlu0 %1815 }
 0x1b1   : > { %5682 = vmatmul.mubr.msk.bf16.vlgmr.msra.gmra.mxu0 %vm623_vm2, %v1464_v15  ;;  %v1821_v52 = vsel %vm623_vm2, %v1816_v43, 0  ;;  %v2221_v15 = vld [vmem:[%s6752_s20 + $0x20] sm:$0xf]  ;;  %v2225_v43 = vld [vmem:[%s6752_s20 + $0x30] sm:$0xf] }
 0x1b2   : > { %5692 = vmatpush3.bf16.xpose.msra.mxu0 %v1571_v44  ;;  %5693 = vmatprep.mubr.msk.bf16.mxu0 %vm6288_vm1, %v7697_v16 }
 0x1b3   : > { %5703 = vmatprep.subr.bf16.mxu0 %v7697_v16 }
 0x1b4   : > { %v1866_v45 = vpop.permute.xlu1 %1865  ;;  %v1814_v46 = vpop.permute.xlu0 %1813 }
 0x1b5   : > { %5700 = vmatmul.mubr.msk.bf16.vlgmr.msra.gmra.mxu1 %vm623_vm2, %v1614_v28  ;;  %v1871_v60 = vsel %vm623_vm2, %v1866_v45, 0 }
 0x1b6   : > { %5710 = vmatpush3.bf16.xpose.msra.mxu1 %v1721_v47  ;;  %5711 = vmatprep.mubr.msk.bf16.mxu1 %vm6288_vm1, %v7697_v16 }
 0x1b7   : > { %5721 = vmatprep.subr.bf16.mxu1 %v7697_v16 }
 0x1b8   : > { %v1864_v48 = vpop.permute.xlu1 %1863  ;;  %v1916_v50 = vpop.permute.xlu0 %1915 }
 0x1b9   : > { %5694 = vmatmul.mubr.msk.bf16.vlgmr.msra.gmra.mxu0 %vm623_vm2, %v1564_v26  ;;  %v1921_v57 = vsel %vm623_vm2, %v1916_v50, 0 }
 0x1ba   : > { %5704 = vmatpush3.bf16.xpose.msra.mxu0 %v1671_v49  ;;  %5705 = vmatprep.mubr.msk.bf16.mxu0 %vm6288_vm1, %v7697_v16 }
 0x1bb   : > { %5715 = vmatprep.subr.bf16.mxu0 %v7697_v16 }
 0x1bc   : > { %v1966_v51 = vpop.permute.xlu1 %1965  ;;  %v1914_v53 = vpop.permute.xlu0 %1913 }
 0x1bd   : > { %5712 = vmatmul.mubr.msk.bf16.vlgmr.msra.gmra.mxu1 %vm623_vm2, %v1714_v40  ;;  %v1971_v0 = vsel %vm623_vm2, %v1966_v51, 0 }
 0x1be   : > { %5722 = vmatpush3.bf16.xpose.msra.mxu1 %v1821_v52  ;;  %5723 = vmatprep.mubr.msk.bf16.mxu1 %vm6288_vm1, %v7697_v16 }
 0x1bf   : > { %5733 = vmatprep.subr.bf16.mxu1 %v7697_v16 }
 0x1c0   : > { %v2066_v54 = vpop.permute.xlu1 %2065  ;;  %v2016_v58 = vpop.permute.xlu0 %2015 }
 0x1c1   : > { %5706 = vmatmul.mubr.msk.bf16.vlgmr.msra.gmra.mxu0 %vm623_vm2, %v1664_v32  ;;  %v2021_v62 = vsel %vm623_vm2, %v2016_v58, 0  ;;  %v2071_v4 = vsel %vm623_vm2, %v2066_v54, 0 }
 0x1c2   : > { %5716 = vmatpush3.bf16.xpose.msra.mxu0 %v1771_v55  ;;  %5717 = vmatprep.mubr.msk.bf16.mxu0 %vm6288_vm1, %v7697_v16 }
 0x1c3   : > { %5727 = vmatprep.subr.bf16.mxu0 %v7697_v16 }
 0x1c4   : > { %v1964_v56 = vpop.permute.xlu1 %1963  ;;  %v2014_v61 = vpop.permute.xlu0 %2013 }
 0x1c5   : > { %5724 = vmatmul.mubr.msk.bf16.vlgmr.msra.gmra.mxu1 %vm623_vm2, %v1814_v46 }
 0x1c6   : > { %5734 = vmatpush3.bf16.xpose.msra.mxu1 %v1921_v57  ;;  %5735 = vmatprep.mubr.msk.bf16.mxu1 %vm6288_vm1, %v7697_v16 }
 0x1c7   : > { %5745 = vmatprep.subr.bf16.mxu1 %v7697_v16 }
 0x1c8   : > { %v2064_v59 = vpop.permute.xlu1 %2063  ;;  %v2116_v1 = vpop.permute.xlu0 %2115 }
 0x1c9   : > { %5718 = vmatmul.mubr.msk.bf16.vlgmr.msra.gmra.mxu0 %vm623_vm2, %v1764_v42  ;;  %v2121_v3 = vsel %vm623_vm2, %v2116_v1, 0 }
 0x1ca   : > { %5728 = vmatpush3.bf16.xpose.msra.mxu0 %v1871_v60  ;;  %5729 = vmatprep.mubr.msk.bf16.mxu0 %vm6288_vm1, %v7697_v16 }
 0x1cb   : > { %5739 = vmatprep.subr.bf16.mxu0 %v7697_v16 }
 0x1cc   : > { %v2166_v63 = vpop.permute.xlu1 %2165  ;;  %v2114_v6 = vpop.permute.xlu0 %2113 }
 0x1cd   : > { %5736 = vmatmul.mubr.msk.bf16.vlgmr.msra.gmra.mxu1 %vm623_vm2, %v1914_v53  ;;  %v2171_v8 = vsel %vm623_vm2, %v2166_v63, 0 }
 0x1ce   : > { %5746 = vmatpush3.bf16.xpose.msra.mxu1 %v2021_v62  ;;  %5747 = vmatprep.mubr.msk.bf16.mxu1 %vm6288_vm1, %v7697_v16 }
 0x1cf   : > { %5757 = vmatprep.subr.bf16.mxu1 %v7697_v16 }
 0x1d0   : > { %v2164_v2 = vpop.permute.xlu1 %2163  ;;  %v2713_v9 = vpop.permute.xlu0 %2712 }
 0x1d1   : > { %5730 = vmatmul.mubr.msk.bf16.vlgmr.msra.gmra.mxu0 %vm623_vm2, %v1864_v48  ;;  %v2718_v10 = vsel %vm2668_vm3, %v2713_v9, 0 }
 0x1d2   : > { %5740 = vmatpush3.bf16.xpose.msra.mxu0 %v1971_v0  ;;  %5741 = vmatprep.mubr.msk.bf16.mxu0 %vm6288_vm1, %v7697_v16 }
 0x1d3   : > { %5751 = vmatprep.subr.bf16.mxu0 %v7697_v16 }
 0x1d4   : > { %v2663_v5 = vpop.permute.xlu1 %2662 }
 0x1d5   : > { %5748 = vmatmul.mubr.msk.bf16.vlgmr.msra.gmra.mxu1 %vm623_vm2, %v2014_v61  ;;  %v2670_v7 = vsel %vm2668_vm3, %v2663_v5, 0 }
 0x1d6   : > { %5758 = vmatpush3.bf16.xpose.msra.mxu1 %v2121_v3  ;;  %5759 = vmatprep.mubr.msk.bf16.mxu1 %vm6288_vm1, %v7697_v16 }
 0x1d7   : > { %5769 = vmatprep.subr.bf16.mxu1 %v7697_v16 }
 0x1d9   : > { %5742 = vmatmul.mubr.msk.bf16.vlgmr.msra.gmra.mxu0 %vm623_vm2, %v1964_v56 }
 0x1da   : > { %5752 = vmatpush3.bf16.xpose.msra.mxu0 %v2071_v4  ;;  %5753 = vmatprep.mubr.msk.bf16.mxu0 %vm6288_vm1, %v7697_v16 }
 0x1db   : > { %5763 = vmatprep.subr.bf16.mxu0 %v7697_v16 }
 0x1dd   : > { %5760 = vmatmul.mubr.msk.bf16.vlgmr.msra.gmra.mxu1 %vm623_vm2, %v2114_v6 }
 0x1de   : > { %5770 = vmatpush3.bf16.msra.mxu1 %v2670_v7  ;;  %5771 = vmatprep.mubr.msk.bf16.mxu1 %vm6288_vm1, %v7697_v16 }
 0x1df   : > { %5781 = vmatprep.subr.bf16.mxu1 %v7697_v16 }
 0x1e1   : > { %5754 = vmatmul.mubr.msk.bf16.vlgmr.msra.gmra.mxu0 %vm623_vm2, %v2064_v59 }
 0x1e2   : > { %5764 = vmatpush3.bf16.xpose.msra.mxu0 %v2171_v8  ;;  %5765 = vmatprep.mubr.msk.bf16.mxu0 %vm6288_vm1, %v7697_v16 }
 0x1e3   : > { %5775 = vmatprep.subr.bf16.mxu0 %v7697_v16 }
 0x1e9   : > { %5766 = vmatmul.mubr.msk.bf16.vlgmr.msra.gmra.mxu0 %vm623_vm2, %v2164_v2 }
 0x1ea   : > { %5776 = vmatpush3.bf16.msra.mxu0 %v2718_v10  ;;  %5777 = vmatprep.mubr.msk.bf16.mxu0 %vm6288_vm1, %v7697_v16 }
 0x1eb   : > { %5787 = vmatprep.subr.bf16.mxu0 %v7697_v16 }
 0x229   : > { %v664_v12 = vpop.f32.mrf.mxu0 }
 0x22a   : > { %v6755_v13 = vadd.f32 %v2213_v11, %v664_v12 }
 0x22b   : > { %v5581_v14 = vpop.f32.mrf.mxu0 }
 0x22c   : > { %v2278_v17 = vsel %vm2277_vm4, %v6755_v13, -inf }
 0x22d   : > { %v667_v18 = vpop.f32.mrf.mxu0  ;;  %v762_v19 = vpop.f32.mrf.mxu1  ;;  %2279 = vmax.xlane.f32.xlu0 %v2278_v17 }
 0x22e   : > { %v6760_v20 = vadd.f32 %v2221_v15, %v762_v19 }
 0x22f   : > { %v5582_v21 = vpop.f32.mrf.mxu0  ;;  %v5593_v22 = vpop.f32.mrf.mxu1 }
 0x230   : > { %v2302_v25 = vsel %vm2277_vm4, %v6760_v20, -inf }
 0x231   : > { %v765_v26 = vpop.f32.mrf.mxu1  ;;  %2303 = vmax.xlane.f32.xlu0 %v2302_v25  ;;  %v713_v28 = vpop.f32.mrf.mxu0 }
 0x232   : > { %v6765_v30 = vadd.f32 %v2217_v24, %v713_v28 }
 0x233   : > { %v5587_v32 = vpop.f32.mrf.mxu0  ;;  %v5594_v35 = vpop.f32.mrf.mxu1 }
 0x234   : > { %v2290_v38 = vsel %vm2277_vm4, %v6765_v30, -inf  ;;  %v2229_v32 = vld [vmem:[%s6752_s20 + $0x40] sm:$0xf] }
 0x235   : > { %2291 = vmax.xlane.f32.xlu1 %v2290_v38  ;;  %v716_v39 = vpop.f32.mrf.mxu0  ;;  %v860_v40 = vpop.f32.mrf.mxu1 }
 0x236   : > { %v6781_v39 = vadd.f32 %v2229_v32, %v860_v40 }
 0x237   : > { %v5588_v41 = vpop.f32.mrf.mxu0  ;;  %v5605_v42 = vpop.f32.mrf.mxu1 }
 0x239   : > { %v811_v44 = vpop.f32.mrf.mxu0  ;;  %v863_v45 = vpop.f32.mrf.mxu1 }
 0x23a   : > { %v6770_v46 = vadd.f32 %v2225_v43, %v811_v44  ;;  %v2237_v43 = vld [vmem:[%s6752_s20 + $0x60] sm:$0xf] }
 0x23b   : > { %v5599_v47 = vpop.f32.mrf.mxu0  ;;  %v5606_v48 = vpop.f32.mrf.mxu1 }
 0x23c   : > { %v2314_v49 = vsel %vm2277_vm4, %v6770_v46, -inf }
 0x23d   : > { %2315 = vmax.xlane.f32.xlu0 %v2314_v49  ;;  %v814_v50 = vpop.f32.mrf.mxu0  ;;  %v958_v51 = vpop.f32.mrf.mxu1 }
 0x23e   : > { %v6784_v47 = vadd.f32 %v2237_v43, %v958_v51  ;;  %v2326_v50 = vsel %vm2277_vm4, %v6781_v39, -inf  ;;  %v2234_v43 = vld [vmem:[%s6752_s20 + $0x54] sm:$0xf] }
 0x23f   : > { %v5600_v52 = vpop.f32.mrf.mxu0  ;;  %v5617_v53 = vpop.f32.mrf.mxu1 }
 0x240   : > { %v2233_v52 = vld [vmem:[%s6752_s20 + $0x50] sm:$0xf]  ;;  %v2214_v53 = vld [vmem:[%s6752_s20 + $0x4] sm:$0xf] }
 0x241   : > { %v909_v54 = vpop.f32.mrf.mxu0  ;;  %v961_v55 = vpop.f32.mrf.mxu1 }
 0x243   : > { %v5611_v56 = vpop.f32.mrf.mxu0  ;;  %v5618_v57 = vpop.f32.mrf.mxu1 }
 0x244   : > { %v6792_v56 = vadd.f32 %v2233_v52, %v909_v54 }
 0x245   : > { %v912_v58 = vpop.f32.mrf.mxu0  ;;  %v1057_v59 = vpop.f32.mrf.mxu1 }
 0x246   : > { %3624 = vrot.lane.b32.xlu1 %v6473_v31, %s6298_s21  ;;  %v6794_v57 = vadd.f32 %v2214_v53, %v1057_v59  ;;  %v2338_v59 = vsel %vm2277_vm4, %v6792_v56, -inf }
 0x247   : > { %v5612_v60 = vpop.f32.mrf.mxu0  ;;  %v5629_v61 = vpop.f32.mrf.mxu1 }
 0x248   : > { %v2350_v60 = vsel %vm2277_vm4, %v6784_v47, -inf  ;;  %v2241_v61 = vld [vmem:[%s6752_s20 + $0x70] sm:$0xf] }
 0x249   : > { %v1007_v62 = vpop.f32.mrf.mxu0  ;;  %v1060_v63 = vpop.f32.mrf.mxu1 }
 0x24a   : > { %v2222_v63 = vld [vmem:[%s6752_s20 + $0x24] sm:$0xf] }
 0x24b   : > { %v5623_v0 = vpop.f32.mrf.mxu0  ;;  %v5630_v1 = vpop.f32.mrf.mxu1 }
 0x24d   : > { %v1010_v2 = vpop.f32.mrf.mxu0  ;;  %v1157_v3 = vpop.f32.mrf.mxu1 }
 0x24e   : > { %v6800_v2 = vadd.f32 %v2241_v61, %v1007_v62 }
 0x24f   : > { %v5624_v4 = vpop.f32.mrf.mxu0  ;;  %v5641_v5 = vpop.f32.mrf.mxu1 }
 0x250   : > { %v6802_v4 = vadd.f32 %v2222_v63, %v1157_v3 }
 0x251   : > { %v1107_v6 = vpop.f32.mrf.mxu0  ;;  %v1160_v7 = vpop.f32.mrf.mxu1 }
 0x252   : > { %v2281_v7 = vsel %vm2277_vm4, %v6794_v57, -inf }
 0x253   : > { %3672 = vrot.lane.b32.xlu0 %v6479_v34, %s6298_s21  ;;  %v5635_v8 = vpop.f32.mrf.mxu0  ;;  %v5642_v9 = vpop.f32.mrf.mxu1 }
 0x254   : > { %v2218_v8 = vld [vmem:[%s6752_s20 + $0x14] sm:$0xf]  ;;  %v2230_v9 = vld [vmem:[%s6752_s20 + $0x44] sm:$0xf] }
 0x255   : > { %v1110_v10 = vpop.f32.mrf.mxu0  ;;  %v1257_v11 = vpop.f32.mrf.mxu1  ;;  %v6810_v62 = vadd.f32 %v2218_v8, %v1107_v6  ;;  %v2231_v8 = vld [vmem:[%s6752_s20 + $0x48] sm:$0xf] }
 0x256   : > { %v6812_v3 = vadd.f32 %v2230_v9, %v1257_v11 }
 0x257   : > { %v5636_v12 = vpop.f32.mrf.mxu0  ;;  %v5653_v14 = vpop.f32.mrf.mxu1 }
 0x259   : > { %v1207_v15 = vpop.f32.mrf.mxu0  ;;  %v1260_v17 = vpop.f32.mrf.mxu1 }
 0x25b   : > { %v5647_v18 = vpop.f32.mrf.mxu0  ;;  %v5654_v19 = vpop.f32.mrf.mxu1 }
 0x25c   : > { %v2362_v18 = vsel %vm2277_vm4, %v6800_v2, -inf  ;;  %v2305_v19 = vsel %vm2277_vm4, %v6802_v4, -inf }
 0x25d   : > { %v1210_v21 = vpop.f32.mrf.mxu0  ;;  %v1357_v22 = vpop.f32.mrf.mxu1 }
 0x25e   : > { %v2226_v21 = vld [vmem:[%s6752_s20 + $0x34] sm:$0xf] }
 0x25f   : > { %v5648_v24 = vpop.f32.mrf.mxu0  ;;  %v5665_v25 = vpop.f32.mrf.mxu1  ;;  %v6820_v6 = vadd.f32 %v2226_v21, %v1207_v15  ;;  %v2227_v21 = vld [vmem:[%s6752_s20 + $0x38] sm:$0xf] }
 0x260   : > { %v2238_v24 = vld [vmem:[%s6752_s20 + $0x64] sm:$0xf] }
 0x261   : > { %v6778_v26 = vpop.f32.mrf.mxu0  ;;  %v1360_v28 = vpop.f32.mrf.mxu1  ;;  %v6822_v11 = vadd.f32 %v2238_v24, %v1357_v22  ;;  %v2317_v53 = vsel %vm2277_vm4, %v6820_v6, -inf  ;;  %v2239_v24 = vld [vmem:[%s6752_s20 + $0x68] sm:$0xf] }
 0x262   : > { %v6831_v15 = vadd.f32 %v2234_v43, %v6778_v26 }
 0x263   : > { %v5659_v35 = vpop.f32.mrf.mxu0  ;;  %v5666_v38 = vpop.f32.mrf.mxu1 }
 0x264   : > { %v2293_v38 = vsel %vm2277_vm4, %v6810_v62, -inf }
 0x265   : > { %v1310_v41 = vpop.f32.mrf.mxu0  ;;  %v1457_v42 = vpop.f32.mrf.mxu1 }
 0x266   : > { %v2329_v41 = vsel %vm2277_vm4, %v6812_v3, -inf }
 0x267   : > { %v5660_v44 = vpop.f32.mrf.mxu0  ;;  %v5677_v45 = vpop.f32.mrf.mxu1 }
 0x268   : > { %v2215_v44 = vld [vmem:[%s6752_s20 + $0x8] sm:$0xf] }
 0x269   : > { %v6786_v48 = vpop.f32.mrf.mxu0  ;;  %v1460_v49 = vpop.f32.mrf.mxu1  ;;  %v6833_v22 = vadd.f32 %v2215_v44, %v1457_v42 }
 0x26a   : > { %2327 = vmax.xlane.f32.xlu1 %v2326_v50 }
 0x26b   : > { %v5671_v40 = vpop.f32.mrf.mxu0  ;;  %v5678_v55 = vpop.f32.mrf.mxu1 }
 0x26c   : > { %v2353_v40 = vsel %vm2277_vm4, %v6822_v11, -inf  ;;  %v2242_v55 = vld [vmem:[%s6752_s20 + $0x74] sm:$0xf] }
 0x26d   : > { %v1410_v58 = vpop.f32.mrf.mxu0  ;;  %v1557_v51 = vpop.f32.mrf.mxu1  ;;  %v6842_v26 = vadd.f32 %v2242_v55, %v6786_v48 }
 0x26e   : > { %2351 = vmax.xlane.f32.xlu1 %v2350_v60  ;;  %v2223_v58 = vld [vmem:[%s6752_s20 + $0x28] sm:$0xf] }
 0x26f   : > { %v5672_v0 = vpop.f32.mrf.mxu0  ;;  %v5689_v1 = vpop.f32.mrf.mxu1  ;;  %v6844_v42 = vadd.f32 %v2223_v58, %v1557_v51 }
 0x270   : > { %v2341_v1 = vsel %vm2277_vm4, %v6831_v15, -inf }
 0x271   : > { %v1507_v54 = vpop.f32.mrf.mxu0  ;;  %v1560_v5 = vpop.f32.mrf.mxu1 }
 0x272   : > { %2339 = vmax.xlane.f32.xlu0 %v2338_v59  ;;  %2282 = vmax.xlane.f32.xlu1 %v2281_v7  ;;  %v2284_v5 = vsel %vm2277_vm4, %v6833_v22, -inf  ;;  %v6850_v59 = vpop.permute.xlu0 %2904  ;;  %v2219_v7 = vld [vmem:[%s6752_s20 + $0x18] sm:$0xf] }
 0x273   : > { %v5683_v10 = vpop.f32.mrf.mxu0  ;;  %v5690_v12 = vpop.f32.mrf.mxu1  ;;  %v6854_v51 = vadd.f32 %v2219_v7, %v1507_v54 }
 0x275   : > { %v1510_v14 = vpop.f32.mrf.mxu0  ;;  %v1657_v17 = vpop.f32.mrf.mxu1  ;;  %v2296_v43 = vsel %vm2277_vm4, %v6854_v51, -inf }
 0x276   : > { %2363 = vmax.xlane.f32.xlu0 %v2362_v18  ;;  %2306 = vmax.xlane.f32.xlu1 %v2305_v19  ;;  %v6856_v10 = vadd.f32 %v2231_v8, %v1657_v17  ;;  %v2365_v18 = vsel %vm2277_vm4, %v6842_v26, -inf  ;;  %v2308_v19 = vsel %vm2277_vm4, %v6844_v42, -inf  ;;  %v6864_v54 = vpop.permute.xlu0 %3000 }
 0x277   : > { %v5684_v25 = vpop.f32.mrf.mxu0  ;;  %v5701_v28 = vpop.f32.mrf.mxu1 }
 0x278   : > { %v2332_v44 = vsel %vm2277_vm4, %v6856_v10, -inf }
 0x279   : > { %v1607_v32 = vpop.f32.mrf.mxu0  ;;  %v1660_v35 = vpop.f32.mrf.mxu1 }
 0x27a   : > { %2294 = vmax.xlane.f32.xlu0 %v2293_v38  ;;  %2330 = vmax.xlane.f32.xlu1 %v2329_v41  ;;  %v6866_v17 = vadd.f32 %v2227_v21, %v1607_v32  ;;  %v2220_v21 = vld [vmem:[%s6752_s20 + $0x1c] sm:$0xf] }
 0x27b   : > { %v5695_v45 = vpop.f32.mrf.mxu0  ;;  %v5702_v49 = vpop.f32.mrf.mxu1 }
 0x27c   : > { %v6874_v45 = vpop.permute.xlu1 %2760  ;;  %v2235_v49 = vld [vmem:[%s6752_s20 + $0x58] sm:$0xf] }
 0x27d   : > { %v1610_v50 = vpop.f32.mrf.mxu0  ;;  %v1757_v52 = vpop.f32.mrf.mxu1 }
 0x27e   : > { %2318 = vmax.xlane.f32.xlu0 %v2317_v53  ;;  %2354 = vmax.xlane.f32.xlu1 %v2353_v40  ;;  %v6868_v35 = vadd.f32 %v2239_v24, %v1757_v52  ;;  %v2216_v50 = vld [vmem:[%s6752_s20 + $0xc] sm:$0xf] }
 0x27f   : > { %v5696_v60 = vpop.f32.mrf.mxu0  ;;  %v5713_v61 = vpop.f32.mrf.mxu1 }
 0x280   : > { %v2320_v60 = vsel %vm2277_vm4, %v6866_v17, -inf  ;;  %v2356_v61 = vsel %vm2277_vm4, %v6868_v35, -inf  ;;  %v6890_v8 = vpop.permute.xlu1 %2856 }
 0x281   : > { %v1707_v63 = vpop.f32.mrf.mxu0  ;;  %v1760_v0 = vpop.f32.mrf.mxu1 }
 0x282   : > { %2342 = vmax.xlane.f32.xlu0 %v2341_v1  ;;  %2285 = vmax.xlane.f32.xlu1 %v2284_v5  ;;  %v6878_v52 = vadd.f32 %v2235_v49, %v1707_v63  ;;  %v6886_v0 = vpop.permute.xlu0 %3096  ;;  %v2243_v1 = vld [vmem:[%s6752_s20 + $0x78] sm:$0xf]  ;;  %v2224_v5 = vld [vmem:[%s6752_s20 + $0x2c] sm:$0xf] }
 0x283   : > { %v5707_v48 = vpop.f32.mrf.mxu0  ;;  %v5714_v9 = vpop.f32.mrf.mxu1 }
 0x285   : > { %v1710_v12 = vpop.f32.mrf.mxu0  ;;  %v1857_v14 = vpop.f32.mrf.mxu1 }
 0x286   : > { %2366 = vmax.xlane.f32.xlu0 %v2365_v18  ;;  %2309 = vmax.xlane.f32.xlu1 %v2308_v19  ;;  %v6880_v40 = vadd.f32 %v2216_v50, %v1857_v14  ;;  %v2344_v18 = vsel %vm2277_vm4, %v6878_v52, -inf }
 0x287   : > { %v5708_v25 = vpop.f32.mrf.mxu0  ;;  %v5725_v28 = vpop.f32.mrf.mxu1 }
 0x288   : > { %v2287_v19 = vsel %vm2277_vm4, %v6880_v40, -inf  ;;  %v2232_v28 = vld [vmem:[%s6752_s20 + $0x4c] sm:$0xf] }
 0x289   : > { %v1807_v38 = vpop.f32.mrf.mxu0  ;;  %v1860_v41 = vpop.f32.mrf.mxu1 }
 0x28a   : > { %2297 = vmax.xlane.f32.xlu0 %v2296_v43  ;;  %2333 = vmax.xlane.f32.xlu1 %v2332_v44  ;;  %v6892_v48 = vadd.f32 %v2243_v1, %v1807_v38  ;;  %v6902_v41 = vpop.permute.xlu0 %2808 }
 0x28b   : > { %v5719_v32 = vpop.f32.mrf.mxu0  ;;  %v5726_v53 = vpop.f32.mrf.mxu1 }
 0x28c   : > { %v2368_v49 = vsel %vm2277_vm4, %v6892_v48, -inf  ;;  %v6910_v32 = vpop.permute.xlu1 %2952 }
 0x28d   : > { %v1810_v55 = vpop.f32.mrf.mxu0  ;;  %v1957_v58 = vpop.f32.mrf.mxu1 }
 0x28e   : > { %2321 = vmax.xlane.f32.xlu0 %v2320_v60  ;;  %2357 = vmax.xlane.f32.xlu1 %v2356_v61  ;;  %v6894_v9 = vadd.f32 %v2224_v5, %v1957_v58  ;;  %v2228_v60 = vld [vmem:[%s6752_s20 + $0x3c] sm:$0xf] }
 0x28f   : > { %v5720_v63 = vpop.f32.mrf.mxu0  ;;  %v5737_v7 = vpop.f32.mrf.mxu1 }
 0x290   : > { %v2311_v50 = vsel %vm2277_vm4, %v6894_v9, -inf  ;;  %v6919_v7 = vpop.permute.xlu0 %3192 }
 0x291   : > { %v1907_v12 = vpop.f32.mrf.mxu0  ;;  %v1960_v14 = vpop.f32.mrf.mxu1  ;;  %7709 = vst [vmem:[#allocation6_spill] sm:$0xff] %v6919_v7 }
 0x292   : > { %2345 = vmax.xlane.f32.xlu0 %v2344_v18  ;;  %2288 = vmax.xlane.f32.xlu1 %v2287_v19  ;;  %v6904_v38 = vadd.f32 %v2220_v21, %v1907_v12  ;;  %v2240_v19 = vld [vmem:[%s6752_s20 + $0x6c] sm:$0xf]  ;;  %v6924_v21 = vpop.permute.xlu1 %3048 }
 0x293   : > { %v5731_v24 = vpop.f32.mrf.mxu0  ;;  %v5738_v25 = vpop.f32.mrf.mxu1 }
 0x294   : > { %v2299_v63 = vsel %vm2277_vm4, %v6904_v38, -inf }
 0x295   : > { %v1910_v43 = vpop.f32.mrf.mxu0  ;;  %v2057_v44 = vpop.f32.mrf.mxu1 }
 0x296   : > { %v6912_v53 = vadd.f32 %v2232_v28, %v2057_v44  ;;  %2369 = vmax.xlane.f32.xlu0 %v2368_v49  ;;  %2312 = vmax.xlane.f32.xlu1 %v2311_v50  ;;  %v2236_v50 = vld [vmem:[%s6752_s20 + $0x5c] sm:$0xf] }
 0x297   : > { %v5732_v55 = vpop.f32.mrf.mxu0  ;;  %v5749_v58 = vpop.f32.mrf.mxu1 }
 0x298   : > { %v2335_v61 = vsel %vm2277_vm4, %v6912_v53, -inf  ;;  %v6931_v55 = vpop.permute.xlu0 %3288 }
 0x299   : > { %v2007_v1 = vpop.f32.mrf.mxu0  ;;  %v2060_v5 = vpop.f32.mrf.mxu1  ;;  %7710 = vst [vmem:[#allocation7_spill] sm:$0xff] %v6931_v55 }
 0x29a   : > { %v6921_v12 = vadd.f32 %v2228_v60, %v2007_v1  ;;  %2300 = vmax.xlane.f32.xlu0 %v2299_v63  ;;  %2336 = vmax.xlane.f32.xlu1 %v2335_v61  ;;  %v6935_v1 = vpop.permute.xlu1 %3144 }
 0x29b   : > { %v5743_v14 = vpop.f32.mrf.mxu0  ;;  %v5750_v18 = vpop.f32.mrf.mxu1 }
 0x29c   : > { %v2323_v24 = vsel %vm2277_vm4, %v6921_v12, -inf }
 0x29d   : > { %v2010_v25 = vpop.f32.mrf.mxu0  ;;  %v2157_v28 = vpop.f32.mrf.mxu1 }
 0x29e   : > { %v6928_v43 = vadd.f32 %v2240_v19, %v2157_v28  ;;  %2324 = vmax.xlane.f32.xlu0 %v2323_v24  ;;  %v6941_v24 = vpop.permute.xlu0 %3384  ;;  %v2244_v28 = vld [vmem:[%s6752_s20 + $0x7c] sm:$0xf] }
 0x29f   : > { %v5744_v44 = vpop.f32.mrf.mxu0  ;;  %v5761_v49 = vpop.f32.mrf.mxu1  ;;  %7711 = vst [vmem:[#allocation8_spill] sm:$0xff] %v6941_v24 }
 0x2a0   : > { %v2359_v58 = vsel %vm2277_vm4, %v6928_v43, -inf  ;;  %v6944_v44 = vpop.permute.xlu1 %3240 }
 0x2a1   : > { %v2107_v60 = vpop.f32.mrf.mxu0  ;;  %2360 = vmax.xlane.f32.xlu1 %v2359_v58  ;;  %v2160_v61 = vpop.f32.mrf.mxu1  ;;  %7712 = vst [vmem:[#allocation9_spill] sm:$0xff] %v6944_v44 }
 0x2a2   : > { %v6937_v5 = vadd.f32 %v2236_v50, %v2107_v60  ;;  %v6948_v16 = vpop.permute.xlu0 %3480 }
 0x2a3   : > { %v5755_v63 = vpop.f32.mrf.mxu0  ;;  %v5762_v14 = vpop.f32.mrf.mxu1  ;;  %7713 = vst [vmem:[#allocation10_spill] sm:$0xff] %v6948_v16 }
 0x2a4   : > { %v2347_v18 = vsel %vm2277_vm4, %v6937_v5, -inf  ;;  %v6952_v63 = vpop.permute.xlu1 %3336 }
 0x2a5   : > { %v2110_v19 = vpop.f32.mrf.mxu0  ;;  %2348 = vmax.xlane.f32.xlu0 %v2347_v18  ;;  %7714 = vst [vmem:[#allocation11_spill] sm:$0xff] %v6952_v63 }
 0x2a6   : > { %v6954_v18 = vpop.permute.xlu0 %3576 }
 0x2a7   : > { %v5756_v25 = vpop.f32.mrf.mxu0  ;;  %7715 = vst [vmem:[#allocation12_spill] sm:$0xff] %v6954_v18 }
 0x2a8   : > { %v6956_v19 = vpop.permute.xlu1 %3432 }
 0x2a9   : > { %v2207_v49 = vpop.f32.mrf.mxu0  ;;  %7716 = vst [vmem:[#allocation13_spill] sm:$0xff] %v6956_v19 }
 0x2aa   : > { %v6946_v58 = vadd.f32 %v2244_v28, %v2207_v49 }
 0x2ab   : > { %v5767_v61 = vpop.f32.mrf.mxu0 }
 0x2ac   : > { %v2371_v50 = vsel %vm2277_vm4, %v6946_v58, -inf  ;;  %v6959_v49 = vpop.permute.xlu1 %3528 }
 0x2ad   : > { %v2210_v60 = vpop.f32.mrf.mxu0  ;;  %2372 = vmax.xlane.f32.xlu0 %v2371_v50  ;;  %7717 = vst [vmem:[#allocation14_spill] sm:$0xff] %v6959_v49 }
 0x2af   : > { %v5768_v14 = vpop.f32.mrf.mxu0 }
 0x2b6   : > { %v2280_v25 = vpop.xlane.xlu0 %2279 }
 0x2b7   : > { %v2374_v24 = vsub.f32 %v6755_v13, %v2280_v25 }
 0x2b9   : > { %v2406_v28 = vmul.f32 1.442695, %v2374_v24 }
 0x2ba   : > { %v2304_v61 = vpop.xlane.xlu0 %2303 }
 0x2bb   : > { %6073 = vpow2.f32 %v2406_v28  ;;  %v2382_v16 = vsub.f32 %v6760_v20, %v2304_v61 }
 0x2bd   : > { %v2422_v55 = vmul.f32 1.442695, %v2382_v16 }
 0x2be   : > { %v2292_v60 = vpop.xlane.xlu1 %2291 }
 0x2bf   : > { %6075 = vpow2.f32 %v2422_v55  ;;  %v2378_v50 = vsub.f32 %v6765_v30, %v2292_v60 }
 0x2c1   : > { %v2414_v14 = vmul.f32 1.442695, %v2378_v50 }
 0x2c3   : > { %6077 = vpow2.f32 %v2414_v14 }
 0x2c6   : > { %v2316_v18 = vpop.xlane.xlu0 %2315 }
 0x2c7   : > { %v2386_v19 = vsub.f32 %v6770_v46, %v2316_v18  ;;  %v6980_v18 = vpop.permute.xlu1 %3624 }
 0x2c8   : > { %v6964_v63 = vpop.eup %6073  ;;  %7718 = vst [vmem:[#allocation15_spill] sm:$0xff] %v6980_v18 }
 0x2c9   : > { %v2430_v13 = vmul.f32 1.442695, %v2386_v19  ;;  %v2470_v24 = vsel %vm2277_vm4, %v6964_v63, 0.0 }
 0x2ca   : > { %2471 = vadd.xlane.f32.xlu1 %v2470_v24  ;;  %v6983_v60 = vpop.permute.xlu0 %3672 }
 0x2cb   : > { %6079 = vpow2.f32 %v2430_v13 }
 0x2cc   : > { %v6968_v25 = vpop.eup %6075 }
 0x2cd   : > { %v2494_v16 = vsel %vm2277_vm4, %v6968_v25, 0.0 }
 0x2ce   : > { %2495 = vadd.xlane.f32.xlu1 %v2494_v16 }
 0x2d0   : > { %v6972_v20 = vpop.eup %6077 }
 0x2d1   : > { %v2482_v30 = vsel %vm2277_vm4, %v6972_v20, 0.0 }
 0x2d2   : > { %2483 = vadd.xlane.f32.xlu0 %v2482_v30 }
 0x2d8   : > { %v6976_v46 = vpop.eup %6079 }
 0x2d9   : > { %v2506_v55 = vsel %vm2277_vm4, %v6976_v46, 0.0 }
 0x2da   : > { %2507 = vadd.xlane.f32.xlu0 %v2506_v55 }
 0x2f3   : > { %v2328_v19 = vpop.xlane.xlu1 %2327 }
 0x2f4   : > { %v2390_v28 = vsub.f32 %v6781_v39, %v2328_v19 }
 0x2f6   : > { %v2438_v61 = vmul.f32 1.442695, %v2390_v28 }
 0x2f7   : > { %v2352_v50 = vpop.xlane.xlu1 %2351 }
 0x2f8   : > { %6081 = vpow2.f32 %v2438_v61  ;;  %v2398_v14 = vsub.f32 %v6784_v47, %v2352_v50 }
 0x2fa   : > { %v2454_v13 = vmul.f32 1.442695, %v2398_v14 }
 0x2fb   : > { %v2283_v24 = vpop.xlane.xlu1 %2282  ;;  %v2340_v16 = vpop.xlane.xlu0 %2339 }
 0x2fc   : > { %6083 = vpow2.f32 %v2454_v13  ;;  %v2375_v30 = vsub.f32 %v6794_v57, %v2283_v24  ;;  %v2394_v55 = vsub.f32 %v6792_v56, %v2340_v16 }
 0x2fe   : > { %v2408_v49 = vmul.f32 1.442695, %v2375_v30  ;;  %v2446_v18 = vmul.f32 1.442695, %v2394_v55 }
 0x2ff   : > { %v2307_v7 = vpop.xlane.xlu1 %2306  ;;  %v2364_v44 = vpop.xlane.xlu0 %2363 }
 0x300   : > { %6085 = vpow2.f32 %v2408_v49  ;;  %v2383_v39 = vsub.f32 %v6802_v4, %v2307_v7  ;;  %v2402_v19 = vsub.f32 %v6800_v2, %v2364_v44 }
 0x301   : > { %6087 = vpow2.f32 %v2446_v18 }
 0x302   : > { %v2424_v28 = vmul.f32 1.442695, %v2383_v39  ;;  %v2462_v47 = vmul.f32 1.442695, %v2402_v19 }
 0x303   : > { %v2331_v61 = vpop.xlane.xlu1 %2330  ;;  %v2295_v50 = vpop.xlane.xlu0 %2294 }
 0x304   : > { %6089 = vpow2.f32 %v2424_v28  ;;  %v2391_v14 = vsub.f32 %v6812_v3, %v2331_v61  ;;  %v2379_v57 = vsub.f32 %v6810_v62, %v2295_v50 }
 0x305   : > { %v6992_v56 = vpop.eup %6081  ;;  %6091 = vpow2.f32 %v2462_v47 }
 0x306   : > { %v2440_v13 = vmul.f32 1.442695, %v2391_v14  ;;  %v2416_v24 = vmul.f32 1.442695, %v2379_v57  ;;  %v2518_v4 = vsel %vm2277_vm4, %v6992_v56, 0.0 }
 0x307   : > { %v2355_v7 = vpop.xlane.xlu1 %2354  ;;  %2519 = vadd.xlane.f32.xlu1 %v2518_v4  ;;  %v2319_v2 = vpop.xlane.xlu0 %2318 }
 0x308   : > { %6093 = vpow2.f32 %v2440_v13  ;;  %v2399_v44 = vsub.f32 %v6822_v11, %v2355_v7  ;;  %v2387_v49 = vsub.f32 %v6820_v6, %v2319_v2 }
 0x309   : > { %v6998_v18 = vpop.eup %6083  ;;  %6095 = vpow2.f32 %v2416_v24 }
 0x30a   : > { %v2456_v62 = vmul.f32 1.442695, %v2399_v44  ;;  %v2432_v3 = vmul.f32 1.442695, %v2387_v49  ;;  %v2542_v16 = vsel %vm2277_vm4, %v6998_v18, 0.0 }
 0x30b   : > { %v2286_v30 = vpop.xlane.xlu1 %2285  ;;  %2543 = vadd.xlane.f32.xlu1 %v2542_v16  ;;  %v2343_v55 = vpop.xlane.xlu0 %2342 }
 0x30c   : > { %6097 = vpow2.f32 %v2456_v62  ;;  %v2376_v39 = vsub.f32 %v6833_v22, %v2286_v30  ;;  %v2395_v19 = vsub.f32 %v6831_v15, %v2343_v55 }
 0x30d   : > { %v7004_v28 = vpop.eup %6085  ;;  %6099 = vpow2.f32 %v2432_v3 }
 0x30e   : > { %v7006_v6 = vpop.eup %6087  ;;  %v2410_v11 = vmul.f32 1.442695, %v2376_v39  ;;  %v2448_v47 = vmul.f32 1.442695, %v2395_v19  ;;  %v2473_v61 = vsel %vm2277_vm4, %v7004_v28, 0.0 }
 0x30f   : > { %v2310_v50 = vpop.xlane.xlu1 %2309  ;;  %2474 = vadd.xlane.f32.xlu1 %v2473_v61  ;;  %v2530_v14 = vsel %vm2277_vm4, %v7006_v6, 0.0  ;;  %v2367_v57 = vpop.xlane.xlu0 %2366 }
 0x310   : > { %6101 = vpow2.f32 %v2410_v11  ;;  %v2384_v22 = vsub.f32 %v6844_v42, %v2310_v50  ;;  %2531 = vadd.xlane.f32.xlu0 %v2530_v14  ;;  %v2403_v15 = vsub.f32 %v6842_v26, %v2367_v57 }
 0x311   : > { %v7014_v13 = vpop.eup %6089  ;;  %6103 = vpow2.f32 %v2448_v47 }
 0x312   : > { %v7016_v24 = vpop.eup %6091  ;;  %v2426_v4 = vmul.f32 1.442695, %v2384_v22  ;;  %v2464_v7 = vmul.f32 1.442695, %v2403_v15  ;;  %v2497_v2 = vsel %vm2277_vm4, %v7014_v13, 0.0 }
 0x313   : > { %v2334_v44 = vpop.xlane.xlu1 %2333  ;;  %2498 = vadd.xlane.f32.xlu1 %v2497_v2  ;;  %v2554_v49 = vsel %vm2277_vm4, %v7016_v24, 0.0  ;;  %v2298_v62 = vpop.xlane.xlu0 %2297 }
 0x314   : > { %6105 = vpow2.f32 %v2426_v4  ;;  %v2392_v42 = vsub.f32 %v6856_v10, %v2334_v44  ;;  %2555 = vadd.xlane.f32.xlu0 %v2554_v49  ;;  %v2380_v26 = vsub.f32 %v6854_v51, %v2298_v62 }
 0x315   : > { %v7024_v3 = vpop.eup %6093  ;;  %6107 = vpow2.f32 %v2464_v7 }
 0x316   : > { %v7026_v16 = vpop.eup %6095  ;;  %v2442_v30 = vmul.f32 1.442695, %v2392_v42  ;;  %v2418_v55 = vmul.f32 1.442695, %v2380_v26  ;;  %v2521_v39 = vsel %vm2277_vm4, %v7024_v3, 0.0 }
 0x317   : > { %v2358_v19 = vpop.xlane.xlu1 %2357  ;;  %2522 = vadd.xlane.f32.xlu1 %v2521_v39  ;;  %v2485_v11 = vsel %vm2277_vm4, %v7026_v16, 0.0  ;;  %v2322_v47 = vpop.xlane.xlu0 %2321 }
 0x318   : > { %6109 = vpow2.f32 %v2442_v30  ;;  %v2400_v10 = vsub.f32 %v6868_v35, %v2358_v19  ;;  %2486 = vadd.xlane.f32.xlu0 %v2485_v11  ;;  %v2388_v51 = vsub.f32 %v6866_v17, %v2322_v47 }
 0x319   : > { %v7034_v61 = vpop.eup %6097  ;;  %6111 = vpow2.f32 %v2418_v55 }
 0x31a   : > { %v7036_v50 = vpop.eup %6099  ;;  %v2458_v14 = vmul.f32 1.442695, %v2400_v10  ;;  %v2434_v57 = vmul.f32 1.442695, %v2388_v51  ;;  %v2545_v22 = vsel %vm2277_vm4, %v7034_v61, 0.0 }
 0x31b   : > { %v2289_v15 = vpop.xlane.xlu1 %2288  ;;  %2546 = vadd.xlane.f32.xlu1 %v2545_v22  ;;  %v2509_v4 = vsel %vm2277_vm4, %v7036_v50, 0.0  ;;  %v2346_v7 = vpop.xlane.xlu0 %2345 }
 0x31c   : > { %6113 = vpow2.f32 %v2458_v14  ;;  %v2377_v35 = vsub.f32 %v6880_v40, %v2289_v15  ;;  %2510 = vadd.xlane.f32.xlu0 %v2509_v4  ;;  %v2396_v17 = vsub.f32 %v6878_v52, %v2346_v7 }
 0x31d   : > { %v7044_v2 = vpop.eup %6101  ;;  %6115 = vpow2.f32 %v2434_v57 }
 0x31e   : > { %v7046_v44 = vpop.eup %6103  ;;  %v2412_v49 = vmul.f32 1.442695, %v2377_v35  ;;  %v2450_v62 = vmul.f32 1.442695, %v2396_v17  ;;  %v2476_v42 = vsel %vm2277_vm4, %v7044_v2, 0.0 }
 0x31f   : > { %v2313_v26 = vpop.xlane.xlu1 %2312  ;;  %2477 = vadd.xlane.f32.xlu1 %v2476_v42  ;;  %v2533_v30 = vsel %vm2277_vm4, %v7046_v44, 0.0  ;;  %v2370_v55 = vpop.xlane.xlu0 %2369 }
 0x320   : > { %6117 = vpow2.f32 %v2412_v49  ;;  %v2385_v40 = vsub.f32 %v6894_v9, %v2313_v26  ;;  %2534 = vadd.xlane.f32.xlu0 %v2533_v30  ;;  %v2404_v52 = vsub.f32 %v6892_v48, %v2370_v55 }
 0x321   : > { %v7054_v39 = vpop.eup %6105  ;;  %6119 = vpow2.f32 %v2450_v62 }
 0x322   : > { %v7056_v19 = vpop.eup %6107  ;;  %v2428_v11 = vmul.f32 1.442695, %v2385_v40  ;;  %v2466_v47 = vmul.f32 1.442695, %v2404_v52  ;;  %v2500_v10 = vsel %vm2277_vm4, %v7054_v39, 0.0 }
 0x323   : > { %v2337_v51 = vpop.xlane.xlu1 %2336  ;;  %2501 = vadd.xlane.f32.xlu1 %v2500_v10  ;;  %v2557_v14 = vsel %vm2277_vm4, %v7056_v19, 0.0  ;;  %v2301_v57 = vpop.xlane.xlu0 %2300 }
 0x324   : > { %6121 = vpow2.f32 %v2428_v11  ;;  %v2393_v9 = vsub.f32 %v6912_v53, %v2337_v51  ;;  %2558 = vadd.xlane.f32.xlu0 %v2557_v14  ;;  %v2381_v48 = vsub.f32 %v6904_v38, %v2301_v57 }
 0x325   : > { %v7064_v22 = vpop.eup %6109  ;;  %6123 = vpow2.f32 %v2466_v47 }
 0x326   : > { %v7066_v15 = vpop.eup %6111  ;;  %v2444_v4 = vmul.f32 1.442695, %v2393_v9  ;;  %v2420_v7 = vmul.f32 1.442695, %v2381_v48  ;;  %v2524_v35 = vsel %vm2277_vm4, %v7064_v22, 0.0 }
 0x327   : > { %2525 = vadd.xlane.f32.xlu1 %v2524_v35  ;;  %v2488_v17 = vsel %vm2277_vm4, %v7066_v15, 0.0  ;;  %v2325_v49 = vpop.xlane.xlu0 %2324 }
 0x328   : > { %6125 = vpow2.f32 %v2444_v4  ;;  %2489 = vadd.xlane.f32.xlu0 %v2488_v17  ;;  %v2389_v53 = vsub.f32 %v6921_v12, %v2325_v49 }
 0x329   : > { %v7073_v38 = vpop.eup %6113  ;;  %6127 = vpow2.f32 %v2420_v7 }
 0x32a   : > { %v7075_v62 = vpop.eup %6115  ;;  %v2436_v42 = vmul.f32 1.442695, %v2389_v53  ;;  %v2548_v26 = vsel %vm2277_vm4, %v7073_v38, 0.0 }
 0x32b   : > { %2549 = vadd.xlane.f32.xlu1 %v2548_v26  ;;  %v2512_v30 = vsel %vm2277_vm4, %v7075_v62, 0.0 }
 0x32c   : > { %6129 = vpow2.f32 %v2436_v42  ;;  %2513 = vadd.xlane.f32.xlu0 %v2512_v30  ;;  %v2361_v42 = vpop.xlane.xlu1 %2360 }
 0x32d   : > { %v7081_v55 = vpop.eup %6117  ;;  %v2401_v26 = vsub.f32 %v6928_v43, %v2361_v42  ;;  %v7719_v42 = vmov 0.0  }
 0x32e   : > { %v7083_v40 = vpop.eup %6119  ;;  %v2349_v12 = vpop.xlane.xlu0 %2348  ;;  %v2479_v52 = vsel %vm2277_vm4, %v7081_v55, 0.0 }
 0x32f   : > { %v2397_v11 = vsub.f32 %v6937_v5, %v2349_v12  ;;  %2480 = vadd.xlane.f32.xlu1 %v2479_v52  ;;  %v2536_v47 = vsel %vm2277_vm4, %v7083_v40, 0.0  ;;  %v2460_v12 = vmul.f32 1.442695, %v2401_v26 }
 0x330   : > { %2537 = vadd.xlane.f32.xlu0 %v2536_v47 }
 0x331   : > { %v7090_v10 = vpop.eup %6121  ;;  %v2452_v51 = vmul.f32 1.442695, %v2397_v11 }
 0x332   : > { %v7092_v14 = vpop.eup %6123  ;;  %v2503_v57 = vsel %vm2277_vm4, %v7090_v10, 0.0 }
 0x333   : > { %6131 = vpow2.f32 %v2452_v51  ;;  %2504 = vadd.xlane.f32.xlu1 %v2503_v57  ;;  %v2560_v9 = vsel %vm2277_vm4, %v7092_v14, 0.0 }
 0x334   : > { %2561 = vadd.xlane.f32.xlu0 %v2560_v9 }
 0x335   : > { %v7098_v5 = vpop.eup %6125 }
 0x336   : > { %v7100_v48 = vpop.eup %6127  ;;  %v2527_v4 = vsel %vm2277_vm4, %v7098_v5, 0.0  ;;  %v2373_v52 = vpop.xlane.xlu0 %2372 }
 0x337   : > { %2528 = vadd.xlane.f32.xlu1 %v2527_v4  ;;  %v2491_v7 = vsel %vm2277_vm4, %v7100_v48, 0.0  ;;  %v2405_v51 = vsub.f32 %v6946_v58, %v2373_v52 }
 0x338   : > { %2492 = vadd.xlane.f32.xlu0 %v2491_v7 }
 0x339   : > { %v7106_v35 = vpop.eup %6129  ;;  %v2468_v9 = vmul.f32 1.442695, %v2405_v51  ;;  %v2910_v51 = vsel %vm2668_vm3, %v6850_v59, 0 }
 0x33a   : > { %v2515_v17 = vsel %vm2277_vm4, %v7106_v35, 0.0 }
 0x33c   : > { %2516 = vadd.xlane.f32.xlu0 %v2515_v17 }
 0x340   : > { %v7110_v49 = vpop.eup %6131 }
 0x341   : > { %v2539_v53 = vsel %vm2277_vm4, %v7110_v49, 0.0 }
 0x342   : > { %2540 = vadd.xlane.f32.xlu0 %v2539_v53  ;;  %v2766_v53 = vsel %vm2668_vm3, %v6874_v45, 0 }
 0x348   : > { %3720 = vrot.lane.b32.xlu1 %v6481_v36, %s6298_s21 }
 0x353   : > { %v2472_v30 = vpop.xlane.xlu1 %2471 }
 0x354   : > { %6133 = vrcp.f32 %v2472_v30 }
 0x357   : > { %v2496_v11 = vpop.xlane.xlu1 %2495 }
 0x358   : > { %6135 = vrcp.f32 %v2496_v11  ;;  %3768 = vrot.lane.b32.xlu0 %v6485_v37, %s6298_s21  ;;  %v2862_v11 = vsel %vm2668_vm3, %v6890_v8, 0  ;;  %s6300_s21 = smov 8  }
 0x359   : > { %6137 = vpow2.f32 %v2460_v12 }
 0x35b   : > { %v2484_v47 = vpop.xlane.xlu0 %2483 }
 0x35c   : > { %6139 = vrcp.f32 %v2484_v47  ;;  %v2814_v47 = vsel %vm2668_vm3, %v6902_v41, 0 }
 0x361   : > { %v6134_v57 = vpop.eup %6133 }
 0x362   : > { %v2598_v4 = vmul.f32 %v6134_v57, %v6964_v63 }
 0x363   : > { %v2508_v7 = vpop.xlane.xlu0 %2507 }
 0x364   : > { %6141 = vrcp.f32 %v2508_v7  ;;  %v2630_v43 = vpack.c.bf16 %v2598_v4, %v2598_v4  ;;  %v2958_v7 = vsel %vm2668_vm3, %v6910_v32, 0 }
 0x365   : > { %v6136_v17 = vpop.eup %6135  ;;  %6143 = vpow2.f32 %v2468_v9 }
 0x366   : > { %5772 = vmatmul.mubr.msk.bf16.vlgmr.msra.gmra.mxu1 %vm2664_vm5, %v2630_v43  ;;  %v7126_v58 = vpop.eup %6137  ;;  %v2606_v63 = vmul.f32 %v6136_v17, %v6968_v25 }
 0x367   : > { %5782 = vmatpush3.bf16.msra.mxu1 %v2766_v53  ;;  %5783 = vmatprep.mubr.msk.bf16.mxu1 %vm6288_vm1, %v7719_v42  ;;  %v2551_v12 = vsel %vm2277_vm4, %v7126_v58, 0.0 }
 0x368   : > { %5793 = vmatprep.subr.bf16.mxu1 %v7719_v42  ;;  %v2638_v52 = vpack.c.bf16 %v2606_v63, %v2606_v63 }
 0x369   : > { %v6140_v26 = vpop.eup %6139 }
 0x36a   : > { %v2602_v30 = vmul.f32 %v6140_v26, %v6972_v20 }
 0x36c   : > { %2552 = vadd.xlane.f32.xlu1 %v2551_v12  ;;  %v2634_v45 = vpack.c.bf16 %v2602_v30, %v2602_v30  ;;  %v3054_v30 = vsel %vm2668_vm3, %v6924_v21, 0 }
 0x36e   : > { %5778 = vmatmul.mubr.msk.bf16.vlgmr.msra.gmra.mxu0 %vm2664_vm5, %v2634_v45  ;;  %5784 = vmatmul.mubr.msk.bf16.vlgmr.msra.gmra.mxu1 %vm2664_vm5, %v2638_v52  ;;  %v3006_v45 = vsel %vm2668_vm3, %v6864_v54, 0 }
 0x36f   : > { %5788 = vmatpush3.bf16.msra.mxu0 %v2814_v47  ;;  %5794 = vmatpush3.bf16.msra.mxu1 %v2862_v11 }
 0x370   : > { %5789 = vmatprep.mubr.msk.bf16.mxu0 %vm6288_vm1, %v7719_v42  ;;  %5799 = vmatprep.subr.bf16.mxu0 %v7719_v42 }
 0x371   : > { %v6142_v25 = vpop.eup %6141  ;;  %5795 = vmatprep.mubr.msk.bf16.mxu1 %vm6288_vm1, %v7719_v42  ;;  %5805 = vmatprep.subr.bf16.mxu1 %v7719_v42 }
 0x372   : > { %v2610_v8 = vmul.f32 %v6142_v25, %v6976_v46  ;;  %v7146_v41 = vpop.eup %6143  ;;  %v3150_v25 = vsel %vm2668_vm3, %v6935_v1, 0 }
 0x373   : > { %v2563_v57 = vsel %vm2277_vm4, %v7146_v41, 0.0 }
 0x374   : > { %v2642_v20 = vpack.c.bf16 %v2610_v8, %v2610_v8 }
 0x376   : > { %5790 = vmatmul.mubr.msk.bf16.vlgmr.msra.gmra.mxu0 %vm2664_vm5, %v2642_v20 }
 0x377   : > { %5800 = vmatpush3.bf16.msra.mxu0 %v2910_v51  ;;  %2564 = vadd.xlane.f32.xlu0 %v2563_v57 }
 0x378   : > { %5801 = vmatprep.mubr.msk.bf16.mxu0 %vm6288_vm1, %v7719_v42  ;;  %5811 = vmatprep.subr.bf16.mxu0 %v7719_v42 }
 0x37d   : > { %3816 = vrot.lane.b32.xlu1 %v6464_v23, %s6299_s27 }
 0x381   : > { %3912 = vrot.lane.b32.xlu1 %v6469_v29, %s6299_s27 }
 0x385   : > { %3960 = vrot.lane.b32.xlu1 %v6475_v33, %s6299_s27 }
 0x389   : > { %4056 = vrot.lane.b32.xlu1 %v6479_v34, %s6299_s27 }
 0x38d   : > { %4152 = vrot.lane.b32.xlu1 %v6485_v37, %s6299_s27  ;;  %3864 = vrot.lane.b32.xlu0 %v6467_v27, %s6299_s27 }
 0x390   : > { %v2520_v59 = vpop.xlane.xlu1 %2519 }
 0x391   : > { %6145 = vrcp.f32 %v2520_v59  ;;  %4008 = vrot.lane.b32.xlu0 %v6473_v31, %s6299_s27 }
 0x394   : > { %v2544_v46 = vpop.xlane.xlu1 %2543 }
 0x395   : > { %6147 = vrcp.f32 %v2544_v46  ;;  %4104 = vrot.lane.b32.xlu0 %v6481_v36, %s6299_s27  ;;  %v7720_v46 = vld [vmem:[#allocation9_spill] sm:$0xff]  ;;  %s5418_s27 = sshll.u32 %s6403_s17, 9 }
 0x398   : > { %v2475_v23 = vpop.xlane.xlu1 %2474 }
 0x399   : > { %v2532_v9 = vpop.xlane.xlu0 %2531 }
 0x39a   : > { %6149 = vrcp.f32 %v2532_v9  ;;  %v3246_v9 = vsel %vm2668_vm3, %v7720_v46, 0 }
 0x39b   : > { %6151 = vrcp.f32 %v2475_v23 }
 0x39c   : > { %v2499_v27 = vpop.xlane.xlu1 %2498 }
 0x39d   : > { %v2556_v29 = vpop.xlane.xlu0 %2555 }
 0x39e   : > { %v6146_v33 = vpop.eup %6145  ;;  %6153 = vrcp.f32 %v2556_v29 }
 0x39f   : > { %v2614_v34 = vmul.f32 %v6146_v33, %v6992_v56  ;;  %6155 = vrcp.f32 %v2499_v27 }
 0x3a0   : > { %v2523_v63 = vpop.xlane.xlu1 %2522 }
 0x3a1   : > { %v2646_v37 = vpack.c.bf16 %v2614_v34, %v2614_v34  ;;  %v2487_v31 = vpop.xlane.xlu0 %2486 }
 0x3a2   : > { %v6148_v4 = vpop.eup %6147  ;;  %6157 = vrcp.f32 %v2487_v31 }
 0x3a3   : > { %5796 = vmatmul.mubr.msk.bf16.vlgmr.msra.gmra.mxu1 %vm2664_vm5, %v2646_v37  ;;  %v2622_v36 = vmul.f32 %v6148_v4, %v6998_v18  ;;  %6159 = vrcp.f32 %v2523_v63 }
 0x3a4   : > { %5806 = vmatpush3.bf16.msra.mxu1 %v2958_v7  ;;  %5807 = vmatprep.mubr.msk.bf16.mxu1 %vm6288_vm1, %v7719_v42  ;;  %v2547_v54 = vpop.xlane.xlu1 %2546 }
 0x3a5   : > { %5817 = vmatprep.subr.bf16.mxu1 %v7719_v42  ;;  %v2654_v17 = vpack.c.bf16 %v2622_v36, %v2622_v36  ;;  %v2511_v12 = vpop.xlane.xlu0 %2510 }
 0x3a6   : > { %6161 = vrcp.f32 %v2511_v12 }
 0x3a7   : > { %v6150_v56 = vpop.eup %6149  ;;  %6163 = vrcp.f32 %v2547_v54 }
 0x3a8   : > { %v2618_v43 = vmul.f32 %v6150_v56, %v7006_v6  ;;  %v6152_v53 = vpop.eup %6151  ;;  %v2478_v20 = vpop.xlane.xlu1 %2477  ;;  %v7722_v56 = vld [vmem:[#allocation11_spill] sm:$0xff] }
 0x3a9   : > { %v2599_v18 = vmul.f32 %v6152_v53, %v7004_v28  ;;  %v2535_v8 = vpop.xlane.xlu0 %2534  ;;  %v3102_v28 = vsel %vm2668_vm3, %v6886_v0, 0 }
 0x3aa   : > { %v2650_v32 = vpack.c.bf16 %v2618_v43, %v2618_v43  ;;  %6165 = vrcp.f32 %v2535_v8  ;;  %v3342_v43 = vsel %vm2668_vm3, %v7722_v56, 0 }
 0x3ab   : > { %v6154_v26 = vpop.eup %6153  ;;  %5808 = vmatmul.mubr.msk.bf16.vlgmr.msra.gmra.mxu1 %vm2664_vm5, %v2654_v17  ;;  %v2631_v6 = vpack.c.bf16 %v2599_v18, %v2599_v18  ;;  %6167 = vrcp.f32 %v2478_v20  ;;  %v7724_v18 = vld [vmem:[#allocation13_spill] sm:$0xff] }
 0x3ac   : > { %5802 = vmatmul.mubr.msk.bf16.vlgmr.msra.gmra.mxu0 %vm2664_vm5, %v2650_v32  ;;  %5818 = vmatpush3.bf16.msra.mxu1 %v3054_v30  ;;  %v2626_v21 = vmul.f32 %v6154_v26, %v7016_v24  ;;  %v6156_v52 = vpop.eup %6155  ;;  %v2502_v33 = vpop.xlane.xlu1 %2501 }
 0x3ad   : > { %5812 = vmatpush3.bf16.msra.mxu0 %v3006_v45  ;;  %5813 = vmatprep.mubr.msk.bf16.mxu0 %vm6288_vm1, %v7719_v42  ;;  %v2607_v24 = vmul.f32 %v6156_v52, %v7014_v13  ;;  %v2559_v23 = vpop.xlane.xlu0 %2558  ;;  %v7721_v13 = vld [vmem:[#allocation6_spill] sm:$0xff] }
 0x3ae   : > { %5819 = vmatprep.mubr.msk.bf16.mxu1 %vm6288_vm1, %v7719_v42  ;;  %5823 = vmatprep.subr.bf16.mxu0 %v7719_v42  ;;  %v2658_v11 = vpack.c.bf16 %v2626_v21, %v2626_v21  ;;  %v3198_v29 = vsel %vm2668_vm3, %v7721_v13, 0  ;;  %6169 = vrcp.f32 %v2559_v23  ;;  %v3438_v21 = vsel %vm2668_vm3, %v7724_v18, 0 }
 0x3af   : > { %5829 = vmatprep.subr.bf16.mxu1 %v7719_v42  ;;  %v6158_v47 = vpop.eup %6157  ;;  %v2639_v0 = vpack.c.bf16 %v2607_v24, %v2607_v24  ;;  %6171 = vrcp.f32 %v2502_v33  ;;  %v7726_v24 = vld [vmem:[#allocation14_spill] sm:$0xff]  ;;  %v7728_v33 = vld [vmem:[#allocation15_spill] sm:$0xff] }
 0x3b0   : > { %v2603_v1 = vmul.f32 %v6158_v47, %v7026_v16  ;;  %v6160_v51 = vpop.eup %6159  ;;  %v2526_v7 = vpop.xlane.xlu1 %2525  ;;  %v3534_v20 = vsel %vm2668_vm3, %v7726_v24, 0 }
 0x3b1   : > { %v2615_v16 = vmul.f32 %v6160_v51, %v7024_v3  ;;  %v2490_v37 = vpop.xlane.xlu0 %2489  ;;  %v7723_v3 = vld [vmem:[#allocation7_spill] sm:$0xff] }
 0x3b2   : > { %v2635_v57 = vpack.c.bf16 %v2603_v1, %v2603_v1  ;;  %v3294_v17 = vsel %vm2668_vm3, %v7723_v3, 0  ;;  %6173 = vrcp.f32 %v2490_v37 }
 0x3b3   : > { %5820 = vmatmul.mubr.msk.bf16.vlgmr.msra.gmra.mxu1 %vm2664_vm5, %v2631_v6  ;;  %v6162_v59 = vpop.eup %6161  ;;  %v2647_v4 = vpack.c.bf16 %v2615_v16, %v2615_v16  ;;  %6175 = vrcp.f32 %v2526_v7  ;;  %v3630_v16 = vsel %vm2668_vm3, %v7728_v33, 0 }
 0x3b4   : > { %5814 = vmatmul.mubr.msk.bf16.vlgmr.msra.gmra.mxu0 %vm2664_vm5, %v2658_v11  ;;  %5830 = vmatpush3.bf16.msra.mxu1 %v3150_v25  ;;  %v2611_v34 = vmul.f32 %v6162_v59, %v7036_v50  ;;  %v6164_v27 = vpop.eup %6163  ;;  %v2550_v32 = vpop.xlane.xlu1 %2549 }
 0x3b5   : > { %5824 = vmatpush3.bf16.msra.mxu0 %v3102_v28  ;;  %5825 = vmatprep.mubr.msk.bf16.mxu0 %vm6288_vm1, %v7719_v42  ;;  %v2623_v50 = vmul.f32 %v6164_v27, %v7034_v61  ;;  %v2514_v63 = vpop.xlane.xlu0 %2513  ;;  %v7725_v61 = vld [vmem:[#allocation8_spill] sm:$0xff] }
 0x3b6   : > { %5831 = vmatprep.mubr.msk.bf16.mxu1 %vm6288_vm1, %v7719_v42  ;;  %5835 = vmatprep.subr.bf16.mxu0 %v7719_v42  ;;  %v2643_v31 = vpack.c.bf16 %v2611_v34, %v2611_v34  ;;  %v3390_v54 = vsel %vm2668_vm3, %v7725_v61, 0  ;;  %6177 = vrcp.f32 %v2514_v63 }
 0x3b7   : > { %5841 = vmatprep.subr.bf16.mxu1 %v7719_v42  ;;  %v6166_v36 = vpop.eup %6165  ;;  %v2655_v26 = vpack.c.bf16 %v2623_v50, %v2623_v50  ;;  %6179 = vrcp.f32 %v2550_v32 }
 0x3b8   : > { %v2619_v53 = vmul.f32 %v6166_v36, %v7046_v44  ;;  %v6168_v30 = vpop.eup %6167  ;;  %v2481_v52 = vpop.xlane.xlu1 %2480 }
 0x3b9   : > { %v2538_v44 = vpop.xlane.xlu0 %2537  ;;  %v2600_v6 = vmul.f32 %v6168_v30, %v7044_v2  ;;  %v7727_v2 = vld [vmem:[#allocation10_spill] sm:$0xff] }
 0x3ba   : > { %v2651_v12 = vpack.c.bf16 %v2619_v53, %v2619_v53  ;;  %6181 = vrcp.f32 %v2538_v44 }
 0x3bb   : > { %5832 = vmatmul.mubr.msk.bf16.vlgmr.msra.gmra.mxu1 %vm2664_vm5, %v2639_v0  ;;  %v6170_v45 = vpop.eup %6169  ;;  %v2632_v47 = vpack.c.bf16 %v2600_v6, %v2600_v6  ;;  %v3486_v0 = vsel %vm2668_vm3, %v7727_v2, 0 }
 0x3bc   : > { %5826 = vmatmul.mubr.msk.bf16.vlgmr.msra.gmra.mxu0 %vm2664_vm5, %v2635_v57  ;;  %5842 = vmatpush3.bf16.msra.mxu1 %v3246_v9  ;;  %v2627_v11 = vmul.f32 %v6170_v45, %v7056_v19  ;;  %v6172_v25 = vpop.eup %6171  ;;  %v2505_v51 = vpop.xlane.xlu1 %2504 }
 0x3bd   : > { %5836 = vmatpush3.bf16.msra.mxu0 %v3198_v29  ;;  %5837 = vmatprep.mubr.msk.bf16.mxu0 %vm6288_vm1, %v7719_v42  ;;  %v2562_v1 = vpop.xlane.xlu0 %2561  ;;  %v2608_v19 = vmul.f32 %v6172_v25, %v7054_v39  ;;  %v7729_v39 = vld [vmem:[#allocation12_spill] sm:$0xff] }
 0x3be   : > { %5843 = vmatprep.mubr.msk.bf16.mxu1 %vm6288_vm1, %v7719_v42  ;;  %5847 = vmatprep.subr.bf16.mxu0 %v7719_v42  ;;  %v2659_v8 = vpack.c.bf16 %v2627_v11, %v2627_v11  ;;  %v3582_v34 = vsel %vm2668_vm3, %v7729_v39, 0  ;;  %6183 = vrcp.f32 %v2562_v1 }
 0x3bf   : > { %5853 = vmatprep.subr.bf16.mxu1 %v7719_v42  ;;  %v6174_v28 = vpop.eup %6173  ;;  %v2640_v46 = vpack.c.bf16 %v2608_v19, %v2608_v19  ;;  %6185 = vrcp.f32 %v2481_v52 }
 0x3c0   : > { %v2604_v57 = vmul.f32 %v6174_v28, %v7066_v15  ;;  %v6176_v9 = vpop.eup %6175  ;;  %v2529_v23 = vpop.xlane.xlu1 %2528  ;;  %6187 = vrcp.f32 %v2505_v51 }
 0x3c1   : > { %v2493_v59 = vpop.xlane.xlu0 %2492  ;;  %v2616_v15 = vmul.f32 %v6176_v9, %v7064_v22  ;;  %v3678_v22 = vsel %vm2668_vm3, %v6983_v60, 0 }
 0x3c2   : > { %v2636_v13 = vpack.c.bf16 %v2604_v57, %v2604_v57  ;;  %6189 = vrcp.f32 %v2493_v59 }
 0x3c3   : > { %5844 = vmatmul.mubr.msk.bf16.vlgmr.msra.gmra.mxu1 %vm2664_vm5, %v2647_v4  ;;  %v6178_v29 = vpop.eup %6177  ;;  %v2648_v7 = vpack.c.bf16 %v2616_v15, %v2616_v15  ;;  %6191 = vrcp.f32 %v2529_v23 }
 0x3c4   : > { %5838 = vmatmul.mubr.msk.bf16.vlgmr.msra.gmra.mxu0 %vm2664_vm5, %v2643_v31  ;;  %5854 = vmatpush3.bf16.msra.mxu1 %v3342_v43  ;;  %v2612_v37 = vmul.f32 %v6178_v29, %v7075_v62  ;;  %v3721_v27 = vpop.permute.xlu1 %3720  ;;  %v6180_v31 = vpop.eup %6179 }
 0x3c5   : > { %5848 = vmatpush3.bf16.msra.mxu0 %v3294_v17  ;;  %5849 = vmatprep.mubr.msk.bf16.mxu0 %vm6288_vm1, %v7719_v42  ;;  %v2517_v4 = vpop.xlane.xlu0 %2516  ;;  %v3726_v43 = vsel %vm2668_vm3, %v3721_v27, 0  ;;  %v2624_v62 = vmul.f32 %v6180_v31, %v7073_v38 }
 0x3c6   : > { %5855 = vmatprep.mubr.msk.bf16.mxu1 %vm6288_vm1, %v7719_v42  ;;  %5859 = vmatprep.subr.bf16.mxu0 %v7719_v42  ;;  %v2644_v36 = vpack.c.bf16 %v2612_v37, %v2612_v37  ;;  %6193 = vrcp.f32 %v2517_v4 }
 0x3c7   : > { %5865 = vmatprep.subr.bf16.mxu1 %v7719_v42  ;;  %v6182_v56 = vpop.eup %6181  ;;  %v2656_v50 = vpack.c.bf16 %v2624_v62, %v2624_v62 }
 0x3c8   : > { %v2620_v17 = vmul.f32 %v6182_v56, %v7083_v40 }
 0x3ca   : > { %v2652_v53 = vpack.c.bf16 %v2620_v17, %v2620_v17 }
 0x3cb   : > { %5856 = vmatmul.mubr.msk.bf16.vlgmr.msra.gmra.mxu1 %vm2664_vm5, %v2655_v26  ;;  %v2541_v3 = vpop.xlane.xlu0 %2540  ;;  %v6184_v63 = vpop.eup %6183 }
 0x3cc   : > { %5850 = vmatmul.mubr.msk.bf16.vlgmr.msra.gmra.mxu0 %vm2664_vm5, %v2651_v12  ;;  %5866 = vmatpush3.bf16.msra.mxu1 %v3438_v21  ;;  %v2628_v38 = vmul.f32 %v6184_v63, %v7092_v14  ;;  %v6186_v26 = vpop.eup %6185 }
 0x3cd   : > { %5860 = vmatpush3.bf16.msra.mxu0 %v3390_v54  ;;  %5861 = vmatprep.mubr.msk.bf16.mxu0 %vm6288_vm1, %v7719_v42  ;;  %v2601_v12 = vmul.f32 %v6186_v26, %v7081_v55  ;;  %v6188_v21 = vpop.eup %6187 }
 0x3ce   : > { %5867 = vmatprep.mubr.msk.bf16.mxu1 %vm6288_vm1, %v7719_v42  ;;  %5871 = vmatprep.subr.bf16.mxu0 %v7719_v42  ;;  %v2660_v40 = vpack.c.bf16 %v2628_v38, %v2628_v38  ;;  %v2609_v55 = vmul.f32 %v6188_v21, %v7090_v10 }
 0x3cf   : > { %5877 = vmatprep.subr.bf16.mxu1 %v7719_v42  ;;  %v3769_v60 = vpop.permute.xlu0 %3768  ;;  %v2633_v14 = vpack.c.bf16 %v2601_v12, %v2601_v12  ;;  %v6190_v44 = vpop.eup %6189 }
 0x3d0   : > { %v3774_v32 = vsel %vm2668_vm3, %v3769_v60, 0  ;;  %v2605_v52 = vmul.f32 %v6190_v44, %v7100_v48  ;;  %v2641_v11 = vpack.c.bf16 %v2609_v55, %v2609_v55  ;;  %v6192_v25 = vpop.eup %6191 }
 0x3d2   : > { %v2637_v24 = vpack.c.bf16 %v2605_v52, %v2605_v52 }
 0x3d3   : > { %5868 = vmatmul.mubr.msk.bf16.vlgmr.msra.gmra.mxu1 %vm2664_vm5, %v2632_v47  ;;  %v6194_v10 = vpop.eup %6193 }
 0x3d4   : > { %5862 = vmatmul.mubr.msk.bf16.vlgmr.msra.gmra.mxu0 %vm2664_vm5, %v2659_v8  ;;  %5878 = vmatpush3.bf16.msra.mxu1 %v3534_v20  ;;  %v2617_v20 = vmul.f32 %v6192_v25, %v7098_v5 }
 0x3d5   : > { %5872 = vmatpush3.bf16.msra.mxu0 %v3486_v0  ;;  %5873 = vmatprep.mubr.msk.bf16.mxu0 %vm6288_vm1, %v7719_v42  ;;  %v2613_v0 = vmul.f32 %v6194_v10, %v7106_v35 }
 0x3d6   : > { %5879 = vmatprep.mubr.msk.bf16.mxu1 %vm6288_vm1, %v7719_v42  ;;  %5883 = vmatprep.subr.bf16.mxu0 %v7719_v42  ;;  %v2649_v51 = vpack.c.bf16 %v2617_v20, %v2617_v20 }
 0x3d7   : > { %5889 = vmatprep.subr.bf16.mxu1 %v7719_v42 }
 0x3db   : > { %5880 = vmatmul.mubr.msk.bf16.vlgmr.msra.gmra.mxu1 %vm2664_vm5, %v2640_v46  ;;  %v2645_v46 = vpack.c.bf16 %v2613_v0, %v2613_v0 }
 0x3dc   : > { %5874 = vmatmul.mubr.msk.bf16.vlgmr.msra.gmra.mxu0 %vm2664_vm5, %v2636_v13  ;;  %5890 = vmatpush3.bf16.msra.mxu1 %v3630_v16 }
 0x3dd   : > { %5884 = vmatpush3.bf16.msra.mxu0 %v3582_v34  ;;  %5885 = vmatprep.mubr.msk.bf16.mxu0 %vm6288_vm1, %v7719_v42 }
 0x3de   : > { %5891 = vmatprep.mubr.msk.bf16.mxu1 %vm6288_vm1, %v7719_v42  ;;  %5895 = vmatprep.subr.bf16.mxu0 %v7719_v42 }
 0x3df   : > { %5901 = vmatprep.subr.bf16.mxu1 %v7719_v42 }
 0x3e3   : > { %5892 = vmatmul.mubr.msk.bf16.vlgmr.msra.gmra.mxu1 %vm2664_vm5, %v2648_v7 }
 0x3e4   : > { %5886 = vmatmul.mubr.msk.bf16.vlgmr.msra.gmra.mxu0 %vm2664_vm5, %v2644_v36  ;;  %5902 = vmatpush3.bf16.msra.mxu1 %v3726_v43 }
 0x3e5   : > { %5896 = vmatpush3.bf16.msra.mxu0 %v3678_v22  ;;  %5897 = vmatprep.mubr.msk.bf16.mxu0 %vm6288_vm1, %v7719_v42 }
 0x3e6   : > { %5903 = vmatprep.mubr.msk.bf16.mxu1 %vm6288_vm1, %v7719_v42  ;;  %5907 = vmatprep.subr.bf16.mxu0 %v7719_v42 }
 0x3e7   : > { %5913 = vmatprep.subr.bf16.mxu1 %v7719_v42 }
 0x3eb   : > { %5904 = vmatmul.mubr.msk.bf16.vlgmr.msra.gmra.mxu1 %vm2664_vm5, %v2656_v50 }
 0x3ec   : > { %5898 = vmatmul.mubr.msk.bf16.vlgmr.msra.gmra.mxu0 %vm2664_vm5, %v2652_v53  ;;  %5915 = vmatprep.mubr.msk.bf16.mxu1 %vm6288_vm1, %v7719_v42 }
 0x3ed   : > { %5908 = vmatpush3.bf16.msra.mxu0 %v3774_v32  ;;  %5909 = vmatprep.mubr.msk.bf16.mxu0 %vm6288_vm1, %v7719_v42 }
 0x3ee   : > { %5919 = vmatprep.subr.bf16.mxu0 %v7719_v42 }
 0x3f4   : > { %5910 = vmatmul.mubr.msk.bf16.vlgmr.msra.gmra.mxu0 %vm2664_vm5, %v2660_v40 }
 0x3f5   : > { %v2553_v30 = vpop.xlane.xlu1 %2552  ;;  %5921 = vmatprep.mubr.msk.bf16.mxu0 %vm6288_vm1, %v7719_v42 }
 0x3f6   : > { %6195 = vrcp.f32 %v2553_v30 }
 0x3f7   : > { %6197 = vrcp.f32 %v2541_v3 }
 0x3f9   : > { %v3817_v45 = vpop.permute.xlu1 %3816 }
 0x3fa   : > { %v3822_v18 = vsel %vm2668_vm3, %v3817_v45, 0 }
 0x3fb   : > { %5914 = vmatpush3.bf16.msra.mxu1 %v3822_v18 }
 0x3fc   : > { %5925 = vmatprep.subr.bf16.mxu1 %v7719_v42 }
 0x3fd   : > { %v3913_v61 = vpop.permute.xlu1 %3912 }
 0x3fe   : > { %v3918_v54 = vsel %vm2668_vm3, %v3913_v61, 0  ;;  %5916 = vmatmul.mubr.msk.bf16.vlgmr.msra.gmra.mxu1 %vm2664_vm5, %v2633_v14 }
 0x3ff   : > { %5926 = vmatpush3.bf16.msra.mxu1 %v3918_v54  ;;  %5927 = vmatprep.mubr.msk.bf16.mxu1 %vm6288_vm1, %v7719_v42 }
 0x400   : > { %v2565_v6 = vpop.xlane.xlu0 %2564  ;;  %5937 = vmatprep.subr.bf16.mxu1 %v7719_v42 }
 0x401   : > { %v3961_v28 = vpop.permute.xlu1 %3960  ;;  %6199 = vrcp.f32 %v2565_v6 }
 0x402   : > { %v3966_v1 = vsel %vm2668_vm3, %v3961_v28, 0 }
 0x403   : > { %v6196_v5 = vpop.eup %6195 }
 0x404   : > { %v3865_v47 = vpop.permute.xlu0 %3864  ;;  %v6198_v35 = vpop.eup %6197  ;;  %v2625_v9 = vmul.f32 %v6196_v5, %v7126_v58 }
 0x405   : > { %v3870_v8 = vsel %vm2668_vm3, %v3865_v47, 0  ;;  %v4057_v59 = vpop.permute.xlu1 %4056  ;;  %v2621_v13 = vmul.f32 %v6198_v35, %v7110_v49 }
 0x406   : > { %5920 = vmatpush3.bf16.msra.mxu0 %v3870_v8  ;;  %5928 = vmatmul.mubr.msk.bf16.vlgmr.msra.gmra.mxu1 %vm2664_vm5, %v2641_v11  ;;  %v4062_v23 = vsel %vm2668_vm3, %v4057_v59, 0  ;;  %v2657_v29 = vpack.c.bf16 %v2625_v9, %v2625_v9 }
 0x407   : > { %5931 = vmatprep.subr.bf16.mxu0 %v7719_v42  ;;  %5939 = vmatprep.mubr.msk.bf16.mxu1 %vm6288_vm1, %v7719_v42  ;;  %v2653_v16 = vpack.c.bf16 %v2621_v13, %v2621_v13 }
 0x408   : > { %v4009_v48 = vpop.permute.xlu0 %4008 }
 0x409   : > { %v4014_v2 = vsel %vm2668_vm3, %v4009_v48, 0  ;;  %5922 = vmatmul.mubr.msk.bf16.vlgmr.msra.gmra.mxu0 %vm2664_vm5, %v2637_v24  ;;  %v4153_v33 = vpop.permute.xlu1 %4152 }
 0x40a   : > { %5932 = vmatpush3.bf16.msra.mxu0 %v3966_v1  ;;  %5938 = vmatpush3.bf16.msra.mxu1 %v4014_v2  ;;  %v4158_v58 = vsel %vm2668_vm3, %v4153_v33, 0 }
 0x40b   : > { %5949 = vmatprep.subr.bf16.mxu1 %v7719_v42  ;;  %5933 = vmatprep.mubr.msk.bf16.mxu0 %vm6288_vm1, %v7719_v42 }
 0x40c   : > { %v4105_v19 = vpop.permute.xlu0 %4104  ;;  %5943 = vmatprep.subr.bf16.mxu0 %v7719_v42 }
 0x40d   : > { %v4110_v57 = vsel %vm2668_vm3, %v4105_v19, 0 }
 0x40e   : > { %5940 = vmatmul.mubr.msk.bf16.vlgmr.msra.gmra.mxu1 %vm2664_vm5, %v2649_v51  ;;  %v6200_v39 = vpop.eup %6199 }
 0x40f   : > { %5950 = vmatpush3.bf16.msra.mxu1 %v4110_v57  ;;  %5951 = vmatprep.mubr.msk.bf16.mxu1 %vm6288_vm1, %v7719_v42  ;;  %v2629_v34 = vmul.f32 %v6200_v39, %v7146_v41 }
 0x411   : > { %5934 = vmatmul.mubr.msk.bf16.vlgmr.msra.gmra.mxu0 %vm2664_vm5, %v2645_v46  ;;  %v2661_v15 = vpack.c.bf16 %v2629_v34, %v2629_v34 }
 0x412   : > { %5944 = vmatpush3.bf16.msra.mxu0 %v4062_v23  ;;  %5945 = vmatprep.mubr.msk.bf16.mxu0 %vm6288_vm1, %v7719_v42 }
 0x413   : > { %5955 = vmatprep.subr.bf16.mxu0 %v7719_v42 }
 0x416   : > { %5952 = vmatmul.mubr.msk.bf16.vlgmr.msra.gmra.mxu1 %vm2664_vm5, %v2657_v29 }
 0x419   : > { %5946 = vmatmul.mubr.msk.bf16.vlgmr.msra.gmra.mxu0 %vm2664_vm5, %v2653_v16 }
 0x41a   : > { %5956 = vmatpush3.bf16.msra.mxu0 %v4158_v58  ;;  %5957 = vmatprep.mubr.msk.bf16.mxu0 %vm6288_vm1, %v7719_v42 }
 0x421   : > { %5958 = vmatmul.mubr.msk.bf16.vlgmr.msra.gmra.mxu0 %vm2664_vm5, %v2661_v15 }
 0x426   : > { %v7338_v49 = vpop.f32.mrf.mxu1 }
 0x428   : > { %v5773_v37 = vpop.f32.mrf.mxu1 }
 0x42a   : > { %v2709_v4 = vpop.f32.mrf.mxu1 }
 0x42c   : > { %v5774_v27 = vpop.f32.mrf.mxu1 }
 0x42e   : > { %v7340_v7 = vpop.f32.mrf.mxu0  ;;  %v7342_v31 = vpop.f32.mrf.mxu1 }
 0x430   : > { %v5779_v36 = vpop.f32.mrf.mxu0  ;;  %v5785_v56 = vpop.f32.mrf.mxu1 }
 0x432   : > { %v2757_v43 = vpop.f32.mrf.mxu0  ;;  %v2805_v3 = vpop.f32.mrf.mxu1 }
 0x434   : > { %v5780_v22 = vpop.f32.mrf.mxu0  ;;  %v5786_v42 = vpop.f32.mrf.mxu1 }
 0x436   : > { %v7344_v62 = vpop.f32.mrf.mxu0 }
 0x438   : > { %v5791_v41 = vpop.f32.mrf.mxu0 }
 0x43a   : > { %v2853_v17 = vpop.f32.mrf.mxu0 }
 0x43c   : > { %v5792_v60 = vpop.f32.mrf.mxu0 }
 0x463   : > { %v7346_v50 = vpop.f32.mrf.mxu1 }
 0x465   : > { %v5797_v53 = vpop.f32.mrf.mxu1 }
 0x467   : > { %v2901_v63 = vpop.f32.mrf.mxu1 }
 0x469   : > { %v5798_v32 = vpop.f32.mrf.mxu1 }
 0x46b   : > { %v7348_v38 = vpop.f32.mrf.mxu1 }
 0x46c   : > { %v7350_v40 = vpop.f32.mrf.mxu0 }
 0x46d   : > { %v5809_v26 = vpop.f32.mrf.mxu1 }
 0x46e   : > { %v5803_v30 = vpop.f32.mrf.mxu0 }
 0x46f   : > { %v2997_v12 = vpop.f32.mrf.mxu1 }
 0x470   : > { %v2949_v45 = vpop.f32.mrf.mxu0 }
 0x471   : > { %v5810_v18 = vpop.f32.mrf.mxu1 }
 0x472   : > { %v5804_v14 = vpop.f32.mrf.mxu0 }
 0x473   : > { %v3090_v21 = vpop.f32.mrf.mxu1 }
 0x474   : > { %v7352_v61 = vpop.f32.mrf.mxu0  ;;  %4208 = vrot.lane.b32.xlu0 %v3090_v21, %s6300_s21 }
 0x475   : > { %v5821_v54 = vpop.f32.mrf.mxu1 }
 0x476   : > { %v5815_v44 = vpop.f32.mrf.mxu0 }
 0x477   : > { %v3093_v55 = vpop.f32.mrf.mxu1 }
 0x478   : > { %v3045_v6 = vpop.f32.mrf.mxu0 }
 0x479   : > { %v5822_v52 = vpop.f32.mrf.mxu1 }
 0x47a   : > { %v5816_v11 = vpop.f32.mrf.mxu0 }
 0x47b   : > { %v3186_v47 = vpop.f32.mrf.mxu1 }
 0x47c   : > { %v3138_v25 = vpop.f32.mrf.mxu0  ;;  %4212 = vrot.lane.b32.xlu0 %v3186_v47, %s6300_s21 }
 0x47d   : > { %4210 = vrot.lane.b32.xlu1 %v3138_v25, %s6300_s21  ;;  %v5833_v8 = vpop.f32.mrf.mxu1 }
 0x47e   : > { %v5827_v28 = vpop.f32.mrf.mxu0 }
 0x47f   : > { %v3189_v24 = vpop.f32.mrf.mxu1 }
 0x480   : > { %v3141_v10 = vpop.f32.mrf.mxu0 }
 0x481   : > { %v5834_v20 = vpop.f32.mrf.mxu1 }
 0x482   : > { %v5828_v48 = vpop.f32.mrf.mxu0 }
 0x483   : > { %v3282_v1 = vpop.f32.mrf.mxu1 }
 0x484   : > { %v3234_v2 = vpop.f32.mrf.mxu0  ;;  %4216 = vrot.lane.b32.xlu0 %v3282_v1, %s6300_s21 }
 0x485   : > { %4214 = vrot.lane.b32.xlu1 %v3234_v2, %s6300_s21  ;;  %v5845_v0 = vpop.f32.mrf.mxu1 }
 0x486   : > { %v5839_v51 = vpop.f32.mrf.mxu0 }
 0x487   : > { %v3285_v19 = vpop.f32.mrf.mxu1 }
 0x488   : > { %v3237_v5 = vpop.f32.mrf.mxu0 }
 0x489   : > { %v5846_v57 = vpop.f32.mrf.mxu1 }
 0x48a   : > { %v5840_v59 = vpop.f32.mrf.mxu0 }
 0x48b   : > { %v3378_v46 = vpop.f32.mrf.mxu1 }
 0x48c   : > { %v3330_v35 = vpop.f32.mrf.mxu0  ;;  %4220 = vrot.lane.b32.xlu0 %v3378_v46, %s6300_s21  ;;  %v6061_v46 = vld [vmem:[%s7686_s4 + $0x8] sm:$0xff]  }
 0x48d   : > { %4218 = vrot.lane.b32.xlu1 %v3330_v35, %s6300_s21  ;;  %v5857_v9 = vpop.f32.mrf.mxu1  ;;  %5961 = vmatprep.subr.bf16.mxu1 %v6061_v46 }
 0x48e   : > { %v5851_v23 = vpop.f32.mrf.mxu0  ;;  %5962 = vmatpush3.bf16.msra.mxu1 %v6061_v46 }
 0x48f   : > { %v3381_v13 = vpop.f32.mrf.mxu1 }
 0x490   : > { %v3333_v29 = vpop.f32.mrf.mxu0 }
 0x491   : > { %v5858_v33 = vpop.f32.mrf.mxu1 }
 0x492   : > { %v5852_v16 = vpop.f32.mrf.mxu0 }
 0x493   : > { %v3474_v39 = vpop.f32.mrf.mxu1 }
 0x494   : > { %v3426_v58 = vpop.f32.mrf.mxu0  ;;  %4240 = vrot.lane.b32.xlu0 %v3474_v39, %s6301_s22 }
 0x495   : > { %4222 = vrot.lane.b32.xlu1 %v3426_v58, %s6300_s21  ;;  %v5869_v34 = vpop.f32.mrf.mxu1  ;;  %v6062_v58 = vld [vmem:[%s7686_s4] sm:$0xff]  }
 0x496   : > { %v5863_v15 = vpop.f32.mrf.mxu0  ;;  %5963 = vmatprep.subr.bf16.mxu1 %v6062_v58 }
 0x497   : > { %v3477_v37 = vpop.f32.mrf.mxu1  ;;  %5964 = vmatpush3.bf16.msra.mxu1 %v6062_v58 }
 0x498   : > { %v3429_v4 = vpop.f32.mrf.mxu0 }
 0x499   : > { %v5870_v27 = vpop.f32.mrf.mxu1 }
 0x49a   : > { %v5864_v36 = vpop.f32.mrf.mxu0 }
 0x49b   : > { %v3570_v56 = vpop.f32.mrf.mxu1 }
 0x49c   : > { %v3522_v43 = vpop.f32.mrf.mxu0  ;;  %4244 = vrot.lane.b32.xlu0 %v3570_v56, %s6301_s22 }
 0x49d   : > { %4242 = vrot.lane.b32.xlu1 %v3522_v43, %s6301_s22  ;;  %v5881_v3 = vpop.f32.mrf.mxu1 }
 0x49e   : > { %v5875_v22 = vpop.f32.mrf.mxu0 }
 0x49f   : > { %v3573_v42 = vpop.f32.mrf.mxu1 }
 0x4a0   : > { %v3525_v41 = vpop.f32.mrf.mxu0 }
 0x4a1   : > { %v5882_v17 = vpop.f32.mrf.mxu1 }
 0x4a2   : > { %v5876_v60 = vpop.f32.mrf.mxu0 }
 0x4a3   : > { %v3666_v53 = vpop.f32.mrf.mxu1 }
 0x4a4   : > { %v3618_v63 = vpop.f32.mrf.mxu0  ;;  %4248 = vrot.lane.b32.xlu0 %v3666_v53, %s6301_s22 }
 0x4a5   : > { %4246 = vrot.lane.b32.xlu1 %v3618_v63, %s6301_s22  ;;  %v5893_v32 = vpop.f32.mrf.mxu1 }
 0x4a6   : > { %v5887_v26 = vpop.f32.mrf.mxu0 }
 0x4a7   : > { %v3669_v30 = vpop.f32.mrf.mxu1 }
 0x4a8   : > { %v3621_v12 = vpop.f32.mrf.mxu0 }
 0x4a9   : > { %v5894_v45 = vpop.f32.mrf.mxu1 }
 0x4aa   : > { %v5888_v18 = vpop.f32.mrf.mxu0 }
 0x4ab   : > { %v3762_v14 = vpop.f32.mrf.mxu1 }
 0x4ac   : > { %v3714_v21 = vpop.f32.mrf.mxu0  ;;  %4252 = vrot.lane.b32.xlu0 %v3762_v14, %s6301_s22 }
 0x4ad   : > { %4250 = vrot.lane.b32.xlu1 %v3714_v21, %s6301_s22  ;;  %v5905_v54 = vpop.f32.mrf.mxu1 }
 0x4ae   : > { %v5899_v44 = vpop.f32.mrf.mxu0 }
 0x4af   : > { %v3765_v55 = vpop.f32.mrf.mxu1 }
 0x4b0   : > { %v3717_v6 = vpop.f32.mrf.mxu0 }
 0x4b1   : > { %v5906_v52 = vpop.f32.mrf.mxu1 }
 0x4b2   : > { %v5900_v11 = vpop.f32.mrf.mxu0 }
 0x4b4   : > { %v3810_v47 = vpop.f32.mrf.mxu0 }
 0x4b5   : > { %4254 = vrot.lane.b32.xlu1 %v3810_v47, %s6301_s22 }
 0x4b6   : > { %v5911_v25 = vpop.f32.mrf.mxu0 }
 0x4b8   : > { %v3813_v8 = vpop.f32.mrf.mxu0 }
 0x4ba   : > { %v5912_v28 = vpop.f32.mrf.mxu0 }
 0x4be   : > { %v3858_v24 = vpop.f32.mrf.mxu1 }
 0x4bf   : > { %4272 = vrot.lane.b32.xlu0 %v3858_v24, %s6302_s26 }
 0x4c0   : > { %v5917_v10 = vpop.f32.mrf.mxu1 }
 0x4c2   : > { %v3861_v20 = vpop.f32.mrf.mxu1 }
 0x4c4   : > { %v5918_v48 = vpop.f32.mrf.mxu1 }
 0x4c6   : > { %v3954_v1 = vpop.f32.mrf.mxu1 }
 0x4c7   : > { %4276 = vrot.lane.b32.xlu0 %v3954_v1, %s6302_s26 }
 0x4c8   : > { %v5929_v2 = vpop.f32.mrf.mxu1 }
 0x4c9   : > { %v3906_v0 = vpop.f32.mrf.mxu0 }
 0x4ca   : > { %v3957_v51 = vpop.f32.mrf.mxu1  ;;  %4274 = vrot.lane.b32.xlu1 %v3906_v0, %s6302_s26 }
 0x4cb   : > { %v5923_v19 = vpop.f32.mrf.mxu0 }
 0x4cc   : > { %v5930_v5 = vpop.f32.mrf.mxu1 }
 0x4cd   : > { %v3909_v57 = vpop.f32.mrf.mxu0 }
 0x4ce   : > { %v4050_v59 = vpop.f32.mrf.mxu1 }
 0x4cf   : > { %v5924_v35 = vpop.f32.mrf.mxu0  ;;  %4280 = vrot.lane.b32.xlu0 %v4050_v59, %s6302_s26 }
 0x4d0   : > { %v5941_v9 = vpop.f32.mrf.mxu1 }
 0x4d1   : > { %v4002_v23 = vpop.f32.mrf.mxu0 }
 0x4d2   : > { %4278 = vrot.lane.b32.xlu1 %v4002_v23, %s6302_s26  ;;  %v4053_v13 = vpop.f32.mrf.mxu1 }
 0x4d3   : > { %v5935_v29 = vpop.f32.mrf.mxu0 }
 0x4d4   : > { %v5942_v33 = vpop.f32.mrf.mxu1 }
 0x4d5   : > { %v4005_v16 = vpop.f32.mrf.mxu0 }
 0x4d6   : > { %v4146_v39 = vpop.f32.mrf.mxu1 }
 0x4d7   : > { %v5936_v34 = vpop.f32.mrf.mxu0  ;;  %4284 = vrot.lane.b32.xlu0 %v4146_v39, %s6302_s26 }
 0x4d8   : > { %v5953_v15 = vpop.f32.mrf.mxu1 }
 0x4d9   : > { %v4098_v37 = vpop.f32.mrf.mxu0 }
 0x4da   : > { %4282 = vrot.lane.b32.xlu1 %v4098_v37, %s6302_s26  ;;  %v4149_v4 = vpop.f32.mrf.mxu1  ;;  %v5389_v37 = vld [vmem:[%s7687_s5] ss:$0 sm:$0xff] }
 0x4db   : > { %v5947_v27 = vpop.f32.mrf.mxu0 }
 0x4dc   : > { %v5954_v36 = vpop.f32.mrf.mxu1 }
 0x4dd   : > { %v4101_v56 = vpop.f32.mrf.mxu0 }
 0x4df   : > { %v5948_v43 = vpop.f32.mrf.mxu0 }
 0x4e1   : > { %v4194_v3 = vpop.f32.mrf.mxu0 }
 0x4e2   : > { %4286 = vrot.lane.b32.xlu1 %v4194_v3, %s6302_s26  ;;  %s7632_s26 = scalar_lea.hbm %s7696_s14, %s5418_s27  ;;  %s6305_s27 = smov [#allocation2]  }
 0x4e3   : > { %v5959_v22 = vpop.f32.mrf.mxu0  ;;  %s6229_s22 = sshll.u32 %s6305_s27, 4  ;;  %s6230_s22 = int_to_ptr.vmem [resolvable:$false] %s6229_s22 }
 0x4e4   : > { %s6231_s18 = scalar_lea.vmem %s6230_s22, 1024 }
 0x4e5   : > { %v4197_v42 = vpop.f32.mrf.mxu0 }
 0x4e6   : > { %v4209_v17 = vpop.permute.xlu0 %4208 }
 0x4e7   : > { %v5960_v41 = vpop.f32.mrf.mxu0  ;;  %v4296_v28 = vsel %vm623_vm2, %v7338_v49, %v4209_v17 }
 0x4e8   : > { %v6217_v41 = vld [vmem:[%s6443_s25 + $0x14] sm:$0xf] }
 0x4ee   : > { %v4213_v53 = vpop.permute.xlu0 %4212 }
 0x4ef   : > { %v4211_v60 = vpop.permute.xlu1 %4210  ;;  %v4298_v24 = vsel %vm623_vm2, %v7342_v31, %v4213_v53  ;;  %v6218_v53 = vld [vmem:[%s6443_s25] sm:$0xf] }
 0x4f0   : > { %v4297_v47 = vsel %vm623_vm2, %v7340_v7, %v4211_v60 }
 0x4f6   : > { %v4217_v32 = vpop.permute.xlu0 %4216 }
 0x4f7   : > { %v4215_v63 = vpop.permute.xlu1 %4214  ;;  %v4300_v9 = vsel %vm623_vm2, %v7346_v50, %v4217_v32  ;;  %v6219_v32 = vld [vmem:[%s6443_s25 + $0x4] sm:$0xf] }
 0x4f8   : > { %v4299_v10 = vsel %vm623_vm2, %v7344_v62, %v4215_v63 }
 0x4fe   : > { %v4221_v30 = vpop.permute.xlu0 %4220 }
 0x4ff   : > { %v4219_v26 = vpop.permute.xlu1 %4218  ;;  %v4302_v23 = vsel %vm623_vm2, %v7348_v38, %v4221_v30 }
 0x500   : > { %v4301_v59 = vsel %vm623_vm2, %v7350_v40, %v4219_v26 }
 0x506   : > { %v4241_v45 = vpop.permute.xlu0 %4240 }
 0x507   : > { %v4223_v12 = vpop.permute.xlu1 %4222  ;;  %v4305_v48 = vsel %vm4304_vm6, %v4296_v28, %v4241_v45  ;;  %v6220_v45 = vld [vmem:[%s6443_s25 + $0x10] sm:$0xf] }
 0x508   : > { %v4303_v13 = vsel %vm623_vm2, %v7352_v61, %v4223_v12 }
 0x50e   : > { %v4245_v14 = vpop.permute.xlu0 %4244 }
 0x50f   : > { %v4243_v18 = vpop.permute.xlu1 %4242  ;;  %v4307_v7 = vsel %vm4304_vm6, %v4298_v24, %v4245_v14 }
 0x510   : > { %v4306_v25 = vsel %vm4304_vm6, %v4297_v47, %v4243_v18 }
 0x516   : > { %v4249_v54 = vpop.permute.xlu0 %4248 }
 0x517   : > { %v4247_v21 = vpop.permute.xlu1 %4246  ;;  %v4309_v33 = vsel %vm4304_vm6, %v4300_v9, %v4249_v54 }
 0x518   : > { %v4308_v1 = vsel %vm4304_vm6, %v4299_v10, %v4247_v21 }
 0x51e   : > { %v4253_v55 = vpop.permute.xlu0 %4252 }
 0x51f   : > { %v4251_v44 = vpop.permute.xlu1 %4250  ;;  %v4311_v16 = vsel %vm4304_vm6, %v4302_v23, %v4253_v55 }
 0x520   : > { %v4310_v46 = vsel %vm4304_vm6, %v4301_v59, %v4251_v44  ;;  %v6221_v44 = vld [vmem:[%s6443_s25 + $0x1c] sm:$0xf] }
 0x527   : > { %v4255_v6 = vpop.permute.xlu1 %4254 }
 0x528   : > { %v4312_v40 = vsel %vm4304_vm6, %v4303_v13, %v4255_v6  ;;  %v6222_v6 = vld [vmem:[%s6443_s25 + $0x8] sm:$0xf] }
 0x531   : > { %v4273_v52 = vpop.permute.xlu0 %4272 }
 0x532   : > { %v4314_v0 = vsel %vm4313_vm7, %v4305_v48, %v4273_v52 }
 0x539   : > { %v4277_v8 = vpop.permute.xlu0 %4276 }
 0x53a   : > { %v4316_v51 = vsel %vm4313_vm7, %v4307_v7, %v4277_v8  ;;  %v6224_v8 = vld [vmem:[%s6443_s25 + $0x18] sm:$0xf] }
 0x53c   : > { %v4275_v11 = vpop.permute.xlu1 %4274 }
 0x53d   : > { %v4315_v20 = vsel %vm4313_vm7, %v4306_v25, %v4275_v11  ;;  %v6223_v11 = vld [vmem:[%s6443_s25 + $0xc] sm:$0xf]  ;;  %s477_s25 = sand.u32 1, %s6277_s30  }
 0x53e   : > { %v4330_v19 = vcombine.low %v4314_v0, %v4315_v20  ;;  %v4478_v0 = vlaneseq  ;;  %s5314_s28 = sshll.u32 %s477_s25, 5  ;;  %s7640_s17 = scalar_lea.sflag [#allocation3], %s477_s25 }
 0x53f   : > { %s479_s20 = scalar_lea.vmem [#allocation2], %s5314_s28 }
 0x540   : > { %s5236_s21 = sshll.u32 %s479_s20, 4  ;;  %s7634_s21 = int_to_ptr.vmem [resolvable:$true] %s5236_s21 }
 0x541   : > { %v4281_v62 = vpop.permute.xlu0 %4280  ;;  %s6225_s28 = scalar_lea.vmem %s7634_s21, 512  ;;  %p6232_p0 = scmp.lt.s32.totalorder %s7634_s21, %s6230_s22 }
 0x542   : > { %v4318_v58 = vsel %vm4313_vm7, %v4309_v33, %v4281_v62  ;;  %p6226_p11 = scmp.ne.s32.totalorder %s7634_s21, %s6225_s28  ;;  %p6233_p1 = scmp.lt.s32.totalorder %s6231_s18, %s6225_s28 }
 0x544   : > { %v4279_v2 = vpop.permute.xlu1 %4278  ;;  %p6227_p12 = pnand %p6226_p11, %p6420_p5  ;;  %p6234_p2 = por %p6233_p1, %p6232_p0 }
 0x545   : > { %v4317_v49 = vsel %vm4313_vm7, %v4308_v1, %v4279_v2  ;;  %v6303_v1 = vmov 839922192  }
 0x546   : > { %v4331_v31 = vcombine.low %v4316_v51, %v4317_v49  ;;  %v4476_v2 = vunpack.c.l.s4 %v6303_v1  ;;  %v6304_v51 = vmov 1985246804   ;;  %p6228_p13 = pneg %p6227_p12 }
 0x547   : > { %v4483_v49 = vunpack.c.l.s4 %v6304_v51 }
 0x548   : > { %v4338_v5 = vpack.c.bf16 %v4331_v31, %v4330_v19  ;;  %v4477_v19 = vunpack.c.0.s8 %v4476_v2  ;;  %v4479_v31 = vshrl.u32 %v4478_v0, 7  ;;  %p6235_p3 = pnand %p6234_p2, %p6228_p13 }
 0x549   : > { %v4285_v35 = vpop.permute.xlu0 %4284 }
 0x54a   : > { %5965 = vmatprep.mubr.msk.bf16.mxu1 %vm544_vm0, %v4338_v5  ;;  %v4320_v50 = vsel %vm4313_vm7, %v4311_v16, %v4285_v35  ;;  %v4484_v5 = vunpack.c.0.s8 %v4483_v49  ;;  %v7433_v62 = vsub.s32 %v4477_v19, %v4479_v31  ;;  %v5394_v19 = vld [vmem:[%s7688_s6] ss:$0 sm:$0xff] }
 0x54c   : > { %v4283_v57 = vpop.permute.xlu1 %4282 }
 0x54d   : > { %v4319_v29 = vsel %vm4313_vm7, %v4310_v46, %v4283_v57  ;;  %v7435_v57 = vsub.s32 %v4484_v5, %v4479_v31 }
 0x54e   : > { %v4332_v38 = vcombine.low %v4318_v58, %v4319_v29 }
 0x554   : > { %v4287_v39 = vpop.permute.xlu1 %4286 }
 0x555   : > { %v4321_v34 = vsel %vm4313_vm7, %v4312_v40, %v4287_v39 }
 0x556   : > { %v4333_v15 = vcombine.low %v4320_v50, %v4321_v34 }
 0x558   : > { %v4339_v61 = vpack.c.bf16 %v4333_v15, %v4332_v38 }
 0x55a   : > { %5966 = vmatmul.mubr.msk.bf16.vlgmr.msra.gmra.mxu1 %vm544_vm0, %v4339_v61 }
 0x61a   : > { %v5967_v4 = vpop.f32.mrf.mxu1 }
 0x61b   : > { %v4412_v27 = vadd.f32 %v5967_v4, %v5389_v37 }
 0x61c   : > { %v4403_v36 = vpop.f32.mrf.mxu1 }
 0x61d   : > { %v4424_v56 = vcombine.high %v4412_v27, %v4412_v27  ;;  %v4404_v43 = vadd.f32 %v5389_v37, %v4403_v36  ;;  %v4434_v18 = vadd.f32 %v6220_v45, %v4412_v27 }
 0x61e   : > { %v5968_v3 = vpop.f32.mrf.mxu1 }
 0x61f   : > { %v4422_v22 = vcombine.high %v4404_v43, %v4404_v43  ;;  %v4415_v42 = vadd.f32 %v5968_v3, %v5389_v37  ;;  %v4435_v17 = vadd.f32 %v6217_v41, %v4424_v56  ;;  %v4430_v63 = vadd.f32 %v6218_v53, %v4404_v43 }
 0x620   : > { %v4406_v60 = vpop.f32.mrf.mxu1 }
 0x621   : > { %v4431_v26 = vadd.f32 %v6219_v32, %v4422_v22  ;;  %v4425_v30 = vcombine.high %v4415_v42, %v4415_v42  ;;  %v4407_v12 = vadd.f32 %v5389_v37, %v4406_v60  ;;  %v4448_v54 = vcombine.low %v4434_v18, %v4435_v17 }
 0x622   : > { %v4436_v28 = vadd.f32 %v6224_v8, %v4415_v42 }
 0x623   : > { %v4423_v14 = vcombine.high %v4407_v12, %v4407_v12  ;;  %v4446_v21 = vcombine.low %v4430_v63, %v4431_v26  ;;  %v4437_v55 = vadd.f32 %v6221_v44, %v4425_v30  ;;  %v4432_v52 = vadd.f32 %v6222_v6, %v4407_v12  ;;  %v6063_v44 = vld [vmem:[%s7690_s8 + $0x8] sm:$0xff]   ;;  %v6065_v6 = vld [vmem:[%s7692_s10 + $0x38] sm:$0xff]  }
 0x624   : > { %v4460_v20 = vsel %vm544_vm0, %v4448_v54, 0.0  ;;  %5969 = vmatprep.subr.bf16.mxu0 %v6063_v44  ;;  %5977 = vmatprep.subr.bf16.mxu1 %v6065_v6 }
 0x625   : > { %v4433_v47 = vadd.f32 %v6223_v11, %v4423_v14  ;;  %v4454_v25 = vsel %vm544_vm0, %v4446_v21, 0.0  ;;  %v4449_v48 = vcombine.low %v4436_v28, %v4437_v55  ;;  %5970 = vmatpush3.bf16.msra.mxu0 %v6063_v44  ;;  %5978 = vmatpush3.bf16.msra.mxu1 %v6065_v6  ;;  %v6067_v11 = vld [vmem:[%s7692_s10 + $0x28] sm:$0xff]  }
 0x626   : > { %4455 = vadd.xlane.f32.xlu0 %v4454_v25  ;;  %v6069_v25 = vld [vmem:[%s7692_s10 + $0x18] sm:$0xff]  }
 0x627   : > { %v4447_v24 = vcombine.low %v4432_v52, %v4433_v47  ;;  %v4463_v7 = vsel %vm544_vm0, %v4449_v48, 0.0 }
 0x629   : > { %v4457_v10 = vsel %vm544_vm0, %v4447_v24, 0.0 }
 0x62a   : > { %4458 = vadd.xlane.f32.xlu1 %v4457_v10  ;;  %4461 = vadd.xlane.f32.xlu0 %v4460_v20 }
 0x62e   : > { %4464 = vadd.xlane.f32.xlu0 %v4463_v7 }
 0x6af   : > { %v4456_v59 = vpop.xlane.xlu0 %4455 }
 0x6b0   : > { %v4467_v46 = vmul.f32 0.03125, %v4456_v59 }
 0x6b2   : > { %v4481_v35 = vrot.slane %v4467_v46, %v7433_v62  ;;  %v4488_v9 = vrot.slane %v4467_v46, %v7435_v57  ;;  %v4678_v46 = vcombine.high %v5394_v19, %v5394_v19 }
 0x6b3   : > { %v4459_v23 = vpop.xlane.xlu1 %4458  ;;  %v4462_v13 = vpop.xlane.xlu0 %4461 }
 0x6b4   : > { %v7439_v29 = vsub.f32 %v4430_v63, %v4481_v35  ;;  %v7441_v33 = vsub.f32 %v4431_v26, %v4488_v9  ;;  %v4468_v16 = vmul.f32 0.03125, %v4459_v23  ;;  %v4469_v40 = vmul.f32 0.03125, %v4462_v13  ;;  %v5395_v35 = vld [vmem:[%s7689_s7] ss:$0 sm:$0xff] }
 0x6b6   : > { %v4495_v39 = vrot.slane %v4468_v16, %v7433_v62  ;;  %v4502_v58 = vrot.slane %v4468_v16, %v7435_v57  ;;  %v4509_v50 = vrot.slane %v4469_v40, %v7433_v62  ;;  %v4516_v34 = vrot.slane %v4469_v40, %v7435_v57 }
 0x6b7   : > { %v4465_v38 = vpop.xlane.xlu0 %4464  ;;  %v4547_v15 = vmul.f32 %v7439_v29, %v7439_v29  ;;  %v4548_v61 = vmul.f32 %v7441_v33, %v7441_v33 }
 0x6b8   : > { %v7451_v37 = vsub.f32 %v4432_v52, %v4495_v39  ;;  %v7453_v4 = vsub.f32 %v4433_v47, %v4502_v58  ;;  %v7455_v27 = vsub.f32 %v4434_v18, %v4509_v50  ;;  %v7457_v36 = vsub.f32 %v4435_v17, %v4516_v34  ;;  %v6066_v52 = vld [vmem:[%s7692_s10 + $0x30] sm:$0xff]   ;;  %v6068_v47 = vld [vmem:[%s7692_s10 + $0x20] sm:$0xff]  }
 0x6b9   : > { %v4470_v56 = vmul.f32 0.03125, %v4465_v38  ;;  %v4563_v43 = vcombine.low %v4547_v15, %v4548_v61  ;;  %5979 = vmatprep.subr.bf16.mxu1 %v6066_v52  ;;  %v4695_v58 = vcombine.high %v5395_v35, %v5395_v35 }
 0x6ba   : > { %v4549_v3 = vmul.f32 %v7451_v37, %v7451_v37  ;;  %v4550_v22 = vmul.f32 %v7453_v4, %v7453_v4  ;;  %v4551_v42 = vmul.f32 %v7455_v27, %v7455_v27  ;;  %v4552_v41 = vmul.f32 %v7457_v36, %v7457_v36  ;;  %5980 = vmatpush3.bf16.msra.mxu1 %v6066_v52 }
 0x6bb   : > { %v4523_v60 = vrot.slane %v4470_v56, %v7433_v62  ;;  %v4530_v53 = vrot.slane %v4470_v56, %v7435_v57  ;;  %v4571_v17 = vsel %vm544_vm0, %v4563_v43, 0.0  ;;  %5981 = vmatprep.subr.bf16.mxu1 %v6067_v11 }
 0x6bc   : > { %4572 = vadd.xlane.f32.xlu1 %v4571_v17  ;;  %v4564_v63 = vcombine.low %v4549_v3, %v4550_v22  ;;  %v4565_v32 = vcombine.low %v4551_v42, %v4552_v41 }
 0x6bd   : > { %v7470_v26 = vsub.f32 %v4436_v28, %v4523_v60  ;;  %v7472_v30 = vsub.f32 %v4437_v55, %v4530_v53  ;;  %v6064_v55 = vld [vmem:[%s7690_s8] sm:$0xff]  }
 0x6be   : > { %v4574_v12 = vsel %vm544_vm0, %v4564_v63, 0.0  ;;  %v4577_v45 = vsel %vm544_vm0, %v4565_v32, 0.0  ;;  %5971 = vmatprep.subr.bf16.mxu0 %v6064_v55  ;;  %5982 = vmatpush3.bf16.msra.mxu1 %v6067_v11 }
 0x6bf   : > { %4575 = vadd.xlane.f32.xlu0 %v4574_v12  ;;  %v4553_v18 = vmul.f32 %v7470_v26, %v7470_v26  ;;  %v4554_v14 = vmul.f32 %v7472_v30, %v7472_v30  ;;  %5972 = vmatpush3.bf16.msra.mxu0 %v6064_v55 }
 0x6c0   : > { %4578 = vadd.xlane.f32.xlu1 %v4577_v45  ;;  %5983 = vmatprep.subr.bf16.mxu1 %v6068_v47 }
 0x6c1   : > { %v4566_v21 = vcombine.low %v4553_v18, %v4554_v14 }
 0x6c2   : > { %5984 = vmatpush3.bf16.msra.mxu1 %v6068_v47  ;;  %v6072_v47 = vld [vmem:[%s7692_s10] sm:$0xff]  }
 0x6c3   : > { %v4580_v54 = vsel %vm544_vm0, %v4566_v21, 0.0  ;;  %5985 = vmatprep.subr.bf16.mxu1 %v6069_v25 }
 0x6c4   : > { %4581 = vadd.xlane.f32.xlu0 %v4580_v54 }
 0x6c6   : > { %5986 = vmatpush3.bf16.msra.mxu1 %v6069_v25 }
 0x745   : > { %v4573_v8 = vpop.xlane.xlu1 %4572 }
 0x746   : > { %v4583_v28 = vmul.f32 0.03125, %v4573_v8 }
 0x748   : > { %v4587_v24 = vadd.f32 1e-05, %v4583_v28  ;;  %v4576_v10 = vpop.xlane.xlu0 %4575  ;;  %v5396_v28 = vld [vmem:[%s7691_s9] ss:$0 sm:$0xff] }
 0x749   : > { %v4579_v20 = vpop.xlane.xlu1 %4578  ;;  %v4584_v48 = vmul.f32 0.03125, %v4576_v10 }
 0x74a   : > { %6201 = vrsqrt.f32 %v4587_v24  ;;  %v4585_v7 = vmul.f32 0.03125, %v4579_v20 }
 0x74b   : > { %v4588_v1 = vadd.f32 1e-05, %v4584_v48 }
 0x74c   : > { %v4589_v2 = vadd.f32 1e-05, %v4585_v7 }
 0x74d   : > { %6203 = vrsqrt.f32 %v4588_v1  ;;  %v4582_v0 = vpop.xlane.xlu0 %4581 }
 0x74e   : > { %6205 = vrsqrt.f32 %v4589_v2  ;;  %v4586_v51 = vmul.f32 0.03125, %v4582_v0 }
 0x750   : > { %v4590_v49 = vadd.f32 1e-05, %v4586_v51 }
 0x752   : > { %6207 = vrsqrt.f32 %v4590_v49 }
 0x757   : > { %v6202_v31 = vpop.eup %6201 }
 0x758   : > { %v4605_v5 = vrot.slane %v6202_v31, %v7433_v62  ;;  %v4612_v59 = vrot.slane %v6202_v31, %v7435_v57 }
 0x75a   : > { %v6204_v9 = vpop.eup %6203  ;;  %v4663_v23 = vmul.f32 %v4605_v5, %v7439_v29  ;;  %v4664_v13 = vmul.f32 %v4612_v59, %v7441_v33  ;;  %v5401_v5 = vld [vmem:[%s7693_s11] ss:$0 sm:$0xff] }
 0x75b   : > { %v6206_v16 = vpop.eup %6205  ;;  %v4619_v40 = vrot.slane %v6204_v9, %v7433_v62  ;;  %v4626_v39 = vrot.slane %v6204_v9, %v7435_v57 }
 0x75c   : > { %v4633_v50 = vrot.slane %v6206_v16, %v7433_v62  ;;  %v4640_v34 = vrot.slane %v6206_v16, %v7435_v57  ;;  %v4680_v38 = vmul.f32 %v5394_v19, %v4663_v23  ;;  %v4681_v15 = vmul.f32 %v4678_v46, %v4664_v13 }
 0x75d   : > { %v4665_v61 = vmul.f32 %v4619_v40, %v7451_v37  ;;  %v4666_v56 = vmul.f32 %v4626_v39, %v7453_v4 }
 0x75e   : > { %v4667_v29 = vmul.f32 %v4633_v50, %v7455_v27  ;;  %v4668_v33 = vmul.f32 %v4640_v34, %v7457_v36  ;;  %v4697_v42 = vadd.f32 %v5395_v35, %v4680_v38  ;;  %v4698_v41 = vadd.f32 %v4695_v58, %v4681_v15 }
 0x75f   : > { %v6208_v43 = vpop.eup %6207  ;;  %v4682_v3 = vmul.f32 %v5394_v19, %v4665_v61  ;;  %v4683_v22 = vmul.f32 %v4678_v46, %v4666_v56 }
 0x760   : > { %v4684_v60 = vmul.f32 %v5394_v19, %v4667_v29  ;;  %v4685_v53 = vmul.f32 %v4678_v46, %v4668_v33  ;;  %v4647_v17 = vrot.slane %v6208_v43, %v7433_v62  ;;  %v4654_v63 = vrot.slane %v6208_v43, %v7435_v57 }
 0x761   : > { %v7522_v32 = vadd.f32 %v5395_v35, %v4682_v3  ;;  %v7524_v37 = vadd.f32 %v4695_v58, %v4683_v22  ;;  %v4713_v36 = vcombine.low %v4697_v42, %v4698_v41 }
 0x762   : > { %v4669_v4 = vmul.f32 %v4647_v17, %v7470_v26  ;;  %v4670_v27 = vmul.f32 %v4654_v63, %v7472_v30  ;;  %v4701_v14 = vadd.f32 %v5395_v35, %v4684_v60  ;;  %v4702_v21 = vadd.f32 %v4695_v58, %v4685_v53  ;;  %v6070_v26 = vld [vmem:[%s7692_s10 + $0x10] sm:$0xff]   ;;  %v6071_v30 = vld [vmem:[%s7692_s10 + $0x8] sm:$0xff]  }
 0x763   : > { %v4714_v12 = vcombine.low %v7522_v32, %v7524_v37  ;;  %5987 = vmatprep.subr.bf16.mxu1 %v6070_v26 }
 0x764   : > { %v4686_v45 = vmul.f32 %v5394_v19, %v4669_v4  ;;  %v4687_v18 = vmul.f32 %v4678_v46, %v4670_v27  ;;  %v4715_v6 = vcombine.low %v4701_v14, %v4702_v21  ;;  %5988 = vmatpush3.bf16.msra.mxu1 %v6070_v26 }
 0x765   : > { %v4721_v54 = vpack.c.bf16 %v4714_v12, %v4713_v36  ;;  %5989 = vmatprep.subr.bf16.mxu1 %v6071_v30 }
 0x766   : > { %v4703_v44 = vadd.f32 %v5395_v35, %v4686_v45  ;;  %v4704_v55 = vadd.f32 %v4695_v58, %v4687_v18 }
 0x767   : > { %5973 = vmatprep.mubr.msk.bf16.mxu0 %vm544_vm0, %v4721_v54 }
 0x768   : > { %v4716_v52 = vcombine.low %v4703_v44, %v4704_v55  ;;  %5990 = vmatpush3.bf16.msra.mxu1 %v6071_v30 }
 0x769   : > { %5991 = vmatprep.subr.bf16.mxu1 %v6072_v47 }
 0x76a   : > { %v4722_v11 = vpack.c.bf16 %v4716_v52, %v4715_v6 }
 0x76c   : > { %5974 = vmatmul.mubr.msk.bf16.vlgmr.msra.gmra.mxu0 %vm544_vm0, %v4722_v11  ;;  %5992 = vmatpush3.bf16.msra.mxu1 %v6072_v47 }
 0x82c   : > { %v5975_v25 = vpop.f32.mrf.mxu0 }
 0x82d   : > { %v4795_v48 = vadd.f32 %v5975_v25, %v5396_v28 }
 0x82e   : > { %v4786_v8 = vpop.f32.mrf.mxu0 }
 0x82f   : > { %v4787_v10 = vadd.f32 %v5396_v28, %v4786_v8  ;;  %v4803_v49 = vmax.f32 %v4795_v48, 0.0 }
 0x830   : > { %v5976_v24 = vpop.f32.mrf.mxu0 }
 0x831   : > { %v4798_v20 = vadd.f32 %v5976_v24, %v5396_v28  ;;  %v4801_v0 = vmax.f32 %v4787_v10, 0.0 }
 0x832   : > { %v4789_v7 = vpop.f32.mrf.mxu0 }
 0x833   : > { %v4790_v1 = vadd.f32 %v5396_v28, %v4789_v7  ;;  %v4804_v2 = vmax.f32 %v4798_v20, 0.0 }
 0x835   : > { %v4802_v51 = vmax.f32 %v4790_v1, 0.0  ;;  %v4806_v31 = vpack.c.bf16 %v4804_v2, %v4803_v49 }
 0x837   : > { %v4805_v19 = vpack.c.bf16 %v4802_v51, %v4801_v0 }
 0x839   : > { %5993 = vmatprep.mubr.bf16.mxu1 %v4805_v19 }
 0x83a   : > { %5994 = vmatmul.mubr.bf16.vlgmr.msra.gmra.mxu1 %v4806_v31 }
 0x8fa   : > { %v5995_v59 = vpop.f32.mrf.mxu1 }
 0x8fb   : > { %v4921_v46 = vadd.f32 %v5995_v59, %v5401_v5 }
 0x8fc   : > { %v4912_v35 = vpop.f32.mrf.mxu1 }
 0x8fd   : > { %v4933_v9 = vcombine.high %v4921_v46, %v4921_v46  ;;  %v4913_v23 = vadd.f32 %v5401_v5, %v4912_v35  ;;  %v4943_v61 = vadd.f32 %v4921_v46, %v4701_v14 }
 0x8fe   : > { %v5996_v13 = vpop.f32.mrf.mxu1 }
 0x8ff   : > { %v4931_v16 = vcombine.high %v4913_v23, %v4913_v23  ;;  %v4924_v40 = vadd.f32 %v5996_v13, %v5401_v5  ;;  %v4944_v39 = vadd.f32 %v4933_v9, %v4702_v21  ;;  %v4939_v50 = vadd.f32 %v4913_v23, %v4697_v42 }
 0x900   : > { %v4915_v58 = vpop.f32.mrf.mxu1 }
 0x901   : > { %v4940_v34 = vadd.f32 %v4931_v16, %v4698_v41  ;;  %v4934_v38 = vcombine.high %v4924_v40, %v4924_v40  ;;  %v4916_v15 = vadd.f32 %v5401_v5, %v4915_v58  ;;  %v4957_v33 = vcombine.low %v4943_v61, %v4944_v39 }
 0x902   : > { %v4945_v53 = vadd.f32 %v4924_v40, %v4703_v44 }
 0x903   : > { %v4932_v56 = vcombine.high %v4916_v15, %v4916_v15  ;;  %v4955_v29 = vcombine.low %v4939_v50, %v4940_v34  ;;  %v4946_v43 = vadd.f32 %v4934_v38, %v4704_v55  ;;  %v4941_v3 = vadd.f32 %v4916_v15, %v7522_v32 }
 0x904   : > { %v4969_v42 = vsel %vm544_vm0, %v4957_v33, 0.0 }
 0x905   : > { %v4942_v22 = vadd.f32 %v4932_v56, %v7524_v37  ;;  %v4963_v60 = vsel %vm544_vm0, %v4955_v29, 0.0  ;;  %v4958_v41 = vcombine.low %v4945_v53, %v4946_v43 }
 0x906   : > { %4964 = vadd.xlane.f32.xlu1 %v4963_v60 }
 0x907   : > { %v4956_v17 = vcombine.low %v4941_v3, %v4942_v22  ;;  %v4972_v4 = vsel %vm544_vm0, %v4958_v41, 0.0 }
 0x909   : > { %v4966_v63 = vsel %vm544_vm0, %v4956_v17, 0.0 }
 0x90a   : > { %4967 = vadd.xlane.f32.xlu0 %v4966_v63  ;;  %4970 = vadd.xlane.f32.xlu1 %v4969_v42 }
 0x90e   : > { %4973 = vadd.xlane.f32.xlu0 %v4972_v4 }
 0x98f   : > { %v4965_v27 = vpop.xlane.xlu1 %4964 }
 0x990   : > { %v4975_v36 = vmul.f32 0.03125, %v4965_v27 }
 0x992   : > { %v4989_v32 = vrot.slane %v4975_v36, %v7433_v62  ;;  %v4996_v37 = vrot.slane %v4975_v36, %v7435_v57 }
 0x993   : > { %v4968_v12 = vpop.xlane.xlu0 %4967  ;;  %v4971_v45 = vpop.xlane.xlu1 %4970 }
 0x994   : > { %v7555_v18 = vsub.f32 %v4939_v50, %v4989_v32  ;;  %v7557_v14 = vsub.f32 %v4940_v34, %v4996_v37  ;;  %v4976_v21 = vmul.f32 0.03125, %v4968_v12  ;;  %v4977_v54 = vmul.f32 0.03125, %v4971_v45 }
 0x996   : > { %v5003_v44 = vrot.slane %v4976_v21, %v7433_v62  ;;  %v5010_v55 = vrot.slane %v4976_v21, %v7435_v57  ;;  %v5017_v6 = vrot.slane %v4977_v54, %v7433_v62  ;;  %v5024_v52 = vrot.slane %v4977_v54, %v7435_v57 }
 0x997   : > { %v4974_v11 = vpop.xlane.xlu0 %4973  ;;  %v5055_v26 = vmul.f32 %v7555_v18, %v7555_v18  ;;  %v5056_v30 = vmul.f32 %v7557_v14, %v7557_v14 }
 0x998   : > { %v7567_v47 = vsub.f32 %v4941_v3, %v5003_v44  ;;  %v7569_v25 = vsub.f32 %v4942_v22, %v5010_v55  ;;  %v7571_v8 = vsub.f32 %v4943_v61, %v5017_v6  ;;  %v7573_v28 = vsub.f32 %v4944_v39, %v5024_v52  ;;  %v5411_v22 = vld [vmem:[%s7695_s13] ss:$0 sm:$0xff] }
 0x999   : > { %v4978_v24 = vmul.f32 0.03125, %v4974_v11  ;;  %v5071_v10 = vcombine.low %v5055_v26, %v5056_v30  ;;  %v5203_v42 = vcombine.high %v5411_v22, %v5411_v22 }
 0x99a   : > { %v5057_v20 = vmul.f32 %v7567_v47, %v7567_v47  ;;  %v5058_v48 = vmul.f32 %v7569_v25, %v7569_v25  ;;  %v5059_v7 = vmul.f32 %v7571_v8, %v7571_v8  ;;  %v5060_v1 = vmul.f32 %v7573_v28, %v7573_v28 }
 0x99b   : > { %v5031_v2 = vrot.slane %v4978_v24, %v7433_v62  ;;  %v5038_v0 = vrot.slane %v4978_v24, %v7435_v57  ;;  %v5079_v51 = vsel %vm544_vm0, %v5071_v10, 0.0 }
 0x99c   : > { %5080 = vadd.xlane.f32.xlu1 %v5079_v51  ;;  %v5072_v49 = vcombine.low %v5057_v20, %v5058_v48  ;;  %v5073_v19 = vcombine.low %v5059_v7, %v5060_v1 }
 0x99d   : > { %v7586_v31 = vsub.f32 %v4945_v53, %v5031_v2  ;;  %v7588_v5 = vsub.f32 %v4946_v43, %v5038_v0  ;;  %v5410_v43 = vld [vmem:[%s7694_s12] ss:$0 sm:$0xff] }
 0x99e   : > { %v5082_v59 = vsel %vm544_vm0, %v5072_v49, 0.0  ;;  %v5085_v46 = vsel %vm544_vm0, %v5073_v19, 0.0  ;;  %v5186_v60 = vcombine.high %v5410_v43, %v5410_v43 }
 0x99f   : > { %5083 = vadd.xlane.f32.xlu0 %v5082_v59  ;;  %v5061_v35 = vmul.f32 %v7586_v31, %v7586_v31  ;;  %v5062_v9 = vmul.f32 %v7588_v5, %v7588_v5 }
 0x9a0   : > { %5086 = vadd.xlane.f32.xlu1 %v5085_v46 }
 0x9a1   : > { %v5074_v23 = vcombine.low %v5061_v35, %v5062_v9 }
 0x9a3   : > { %v5088_v13 = vsel %vm544_vm0, %v5074_v23, 0.0 }
 0x9a4   : > { %5089 = vadd.xlane.f32.xlu0 %v5088_v13 }
 0xa25   : > { %v5081_v16 = vpop.xlane.xlu1 %5080 }
 0xa26   : > { %v5091_v40 = vmul.f32 0.03125, %v5081_v16 }
 0xa28   : > { %v5095_v39 = vadd.f32 1e-05, %v5091_v40  ;;  %v5084_v58 = vpop.xlane.xlu0 %5083 }
 0xa29   : > { %v5092_v50 = vmul.f32 0.03125, %v5084_v58  ;;  %v5087_v34 = vpop.xlane.xlu1 %5086 }
 0xa2a   : > { %6209 = vrsqrt.f32 %v5095_v39  ;;  %v5093_v38 = vmul.f32 0.03125, %v5087_v34 }
 0xa2b   : > { %v5096_v15 = vadd.f32 1e-05, %v5092_v50 }
 0xa2c   : > { %v5097_v61 = vadd.f32 1e-05, %v5093_v38 }
 0xa2d   : > { %6211 = vrsqrt.f32 %v5096_v15  ;;  %v5090_v56 = vpop.xlane.xlu0 %5089 }
 0xa2e   : > { %6213 = vrsqrt.f32 %v5097_v61  ;;  %v5094_v29 = vmul.f32 0.03125, %v5090_v56 }
 0xa30   : > { %v5098_v33 = vadd.f32 1e-05, %v5094_v29 }
 0xa32   : > { %6215 = vrsqrt.f32 %v5098_v33 }
 0xa37   : > { %v6210_v3 = vpop.eup %6209 }
 0xa38   : > { %v5113_v53 = vrot.slane %v6210_v3, %v7433_v62  ;;  %v5120_v17 = vrot.slane %v6210_v3, %v7435_v57 }
 0xa3a   : > { %v6212_v63 = vpop.eup %6211  ;;  %v5171_v41 = vmul.f32 %v5113_v53, %v7555_v18  ;;  %v5172_v4 = vmul.f32 %v5120_v17, %v7557_v14 }
 0xa3b   : > { %v6214_v27 = vpop.eup %6213  ;;  %v5127_v36 = vrot.slane %v6212_v63, %v7433_v62  ;;  %v5134_v32 = vrot.slane %v6212_v63, %v7435_v57 }
 0xa3c   : > { %v5188_v37 = vmul.f32 %v5410_v43, %v5171_v41  ;;  %v5189_v12 = vmul.f32 %v5186_v60, %v5172_v4  ;;  %v5141_v45 = vrot.slane %v6214_v27, %v7433_v62  ;;  %v5148_v21 = vrot.slane %v6214_v27, %v7435_v57 }
 0xa3d   : > { %v5173_v54 = vmul.f32 %v5127_v36, %v7567_v47  ;;  %v5174_v44 = vmul.f32 %v5134_v32, %v7569_v25 }
 0xa3e   : > { %v5205_v55 = vadd.f32 %v5411_v22, %v5188_v37  ;;  %v5206_v18 = vadd.f32 %v5203_v42, %v5189_v12  ;;  %v5175_v14 = vmul.f32 %v5141_v45, %v7571_v8  ;;  %v5176_v6 = vmul.f32 %v5148_v21, %v7573_v28 }
 0xa3f   : > { %v6216_v52 = vpop.eup %6215  ;;  %v5190_v11 = vmul.f32 %v5410_v43, %v5173_v54  ;;  %v5191_v26 = vmul.f32 %v5186_v60, %v5174_v44 }
 0xa40   : > { %5214 = vst.msk [vmem:[%s479_s20] sm:$0xf] %vm5213_vm8, %v5205_v55  ;;  %5215 = vst.msk [vmem:[%s479_s20 + $0x4] sm:$0xf] %vm5213_vm8, %v5206_v18  ;;  %v5192_v30 = vmul.f32 %v5410_v43, %v5175_v14  ;;  %v5193_v24 = vmul.f32 %v5186_v60, %v5176_v6  ;;  %v5155_v47 = vrot.slane %v6216_v52, %v7433_v62 }
 0xa41   : > { %v5162_v25 = vrot.slane %v6216_v52, %v7435_v57  ;;  %v5207_v10 = vadd.f32 %v5411_v22, %v5190_v11  ;;  %v5208_v20 = vadd.f32 %v5203_v42, %v5191_v26 }
 0xa42   : > { %v5209_v8 = vadd.f32 %v5411_v22, %v5192_v30  ;;  %v5210_v48 = vadd.f32 %v5203_v42, %v5193_v24  ;;  %v5177_v28 = vmul.f32 %v5155_v47, %v7586_v31 }
 0xa43   : > { %v5178_v7 = vmul.f32 %v5162_v25, %v7588_v5  ;;  %5216 = vst.msk [vmem:[%s479_s20 + $0x8] sm:$0xf] %vm5213_vm8, %v5207_v10  ;;  %5217 = vst.msk [vmem:[%s479_s20 + $0xc] sm:$0xf] %vm5213_vm8, %v5208_v20 }
 0xa44   : > { %5218 = vst.msk [vmem:[%s479_s20 + $0x10] sm:$0xf] %vm5213_vm8, %v5209_v8  ;;  %5219 = vst.msk [vmem:[%s479_s20 + $0x14] sm:$0xf] %vm5213_vm8, %v5210_v48  ;;  %v5194_v62 = vmul.f32 %v5410_v43, %v5177_v28 }
 0xa45   : > { %v5195_v57 = vmul.f32 %v5186_v60, %v5178_v7 }
 0xa46   : > { %v5211_v1 = vadd.f32 %v5411_v22, %v5194_v62 }
 0xa47   : > { %v5212_v2 = vadd.f32 %v5203_v42, %v5195_v57 }
 0xa48   : > { %5220 = vst.msk [vmem:[%s479_s20 + $0x18] sm:$0xf] %vm5213_vm8, %v5211_v1 }
 0xa49   : > { %5221 = vst.msk [vmem:[%s479_s20 + $0x1c] sm:$0xf] %vm5213_vm8, %v5212_v2 }
 0xa4a   : > { %6238 = shalt.err (!%p6235_p3)
}
 0xa4b   : > { %s6239_s25 = scalar_lea.hbm %s7632_s26, 512  ;;  %s6243_s27 = scalar_lea.hbm %s7696_s14, 1024 }
 0xa4c   : > { %p6240_p4 = scmp.ne.s32.totalorder %s7632_s26, %s6239_s25  ;;  %p6244_p9 = scmp.lt.s32.totalorder %s7632_s26, %s7696_s14 }
 0xa4d   : > { %p6245_p10 = scmp.lt.s32.totalorder %s6243_s27, %s6239_s25 }
 0xa4e   : > { %p6241_p7 = pnand %p6240_p4, %p6420_p5 }
 0xa4f   : > { %p6246_p11 = por %p6245_p10, %p6244_p9 }
 0xa50   : > { %p6242_p8 = pneg %p6241_p7 }
 0xa52   : > { %p6247_p12 = pnand %p6246_p11, %p6242_p8 }
 0xa54   : > { %6250 = shalt.err (!%p6247_p12)
}
 0xa55   : > { %s6306_s28 = smov 4   ;;  %s7730_s22 = smov 64  }
 0xa56   : > { %5997 = dma.vmem_to_hbm [thread:$0]  (%p6420_p5), %s7634_s21, 512, %s7632_s26, %s7640_s17, %s7730_s22, %s7730_s22, %s6306_s28  }
 0xa57 PF: > { %p6003_p13 = scmp.ge.s32.totalorder %s6285_s16, 2  ;;  %s5251_s0 = sand.u32 1, %s6273_s29  }
 0xa58   : > { %s5252_s1 = scalar_lea.sflag [#allocation3], %s5251_s0 }
 0xa59   : > { %p6000_p0 = pnand %p6003_p13, %p6424_p6 }
 0xa5b   : > { %p6001_p1 = pneg %p6000_p0 }
 0xa5d   : > { %6268 = dma.done.wait (%p6001_p1), %s5252_s1, 512  }
 0xa5e   : > { %6270 = vsyncadd (%p6001_p1), %s5252_s1, 4294966784  ;;  %s7731_s2 = sld [smem:[#allocation5_spill]]  ;;  %p24_p2 = scmp.ge.s32.totalorder %s6407_s19, 4  }
 0xa5f   : > { %s7732_s29 = smov %s6277_s30  ;;  %s7733_s30 = smov %s6281_s15 }
 0xa60   : > { %s7735_s16 = smov %s6407_s19  ;;  %26 = sbr.rel (!%p24_p2) target bundleno = 7 (0x7), region = 114 }
 0xa64   : > { %s7734_s15 = smov %s7731_s2 }
 0xa65   :  { %5257 = vsyncpa [#allocation3], 1 }
 0xa66   :  { %5259 = vsyncpa [#allocation3 + $0x1], 1 }

</bundles_post_ra>
